<compile_context>
chip_gen: v7x
topology: tpu7x:2x2x1
jax: 0.10.0
libtpu: 0.0.40
codegen_flags: <defaults>
</compile_context>

<pallas_src>
import jax
import jax.numpy as jnp
from jax.experimental import pallas as pl
from jax.experimental.pallas import tpu as pltpu

POOL = 4
BN_EPS = 1e-5
_PREC = jax.lax.Precision.HIGHEST


def _make_fused_kernel(B, N, P3, R, Cin, Cp):
    """Fully fused kernel: t/p/g 1x1 convs, adaptive max pool, attention, softmax,
    z conv and training-mode BatchNorm3d, for the whole (small) batch."""

    def kernel(x1_ref, x2_ref, x3_ref, wtpg_ref, wz_ref, gb_ref, out_ref):
        # x1_ref : (B, Cin, N)        spatial on lanes, channels on sublanes
        # x2_ref : (B, Cin, R*P3)     columns ordered (offset r slow, bin p3 fast)
        # x3_ref : (B, Cin, R*P3)
        # wtpg_ref: (3, Cp, Cin)      packed [wt, wp, wg], PyTorch (out, in) layout
        # wz_ref : (Cin, Cp)
        # gb_ref : (2, Cin, 1)        gamma, beta
        # out_ref: (B, Cin, N)
        f32 = jnp.float32

        wt = wtpg_ref[0]                        # (Cp, Cin)
        wp = wtpg_ref[1]
        wg = wtpg_ref[2]
        wz = wz_ref[...]                        # (Cin, Cp)

        def project_pool(x, w):
            # Single matmul over all R*P3 columns, then max over the R offset groups
            # (each group is a contiguous, static 64-wide lane slice).
            proj = jnp.dot(w, x, preferred_element_type=f32, precision=_PREC)  # (Cp, R*P3)
            pooled = proj[:, 0:P3]
            for r in range(1, R):                                   # cheap VPU maxes
                pooled = jnp.maximum(pooled, proj[:, r * P3:(r + 1) * P3])
            return pooled                                            # (Cp, P3)

        zs = []
        for b in range(B):                      # B is small and static
            x1 = x1_ref[b]                      # (Cin, N)
            x2 = x2_ref[b]                      # (Cin, R*P3)
            x3 = x3_ref[b]

            t = jnp.dot(wt, x1, preferred_element_type=f32, precision=_PREC)   # (Cp, N)
            p = project_pool(x2, wp)                                 # (Cp, P3)
            g = project_pool(x3, wg)                                 # (Cp, P3)

            # s[p3, n] = sum_c p[c, p3] * t[c, n]  -> (P3, N), lane-dense in N
            s = jax.lax.dot_general(
                p, t, dimension_numbers=(((0,), (0,)), ((), ())),
                preferred_element_type=f32, precision=_PREC)         # (P3, N)
            # softmax over the pooled axis (torch dim=2); max-subtraction for stability
            s = s - jnp.max(s, axis=0, keepdims=True)
            e = jnp.exp(s)                                           # (P3, N) f32
            l = jnp.sum(e, axis=0, keepdims=True)                    # (1, N)

            # y = g @ e -> (Cp, N); softmax 1/l normalization folded in afterwards
            y = jnp.dot(g, e, preferred_element_type=f32, precision=_PREC)     # (Cp, N)
            y = y / l
            z = jnp.dot(wz, y, preferred_element_type=f32, precision=_PREC)    # (Cin, N)
            zs.append(z)

        # ---- fused BatchNorm3d (training mode: biased batch statistics, affine) ----
        inv_cnt = 1.0 / float(B * N)
        total = zs[0].sum(axis=1, keepdims=True)
        for z in zs[1:]:
            total = total + z.sum(axis=1, keepdims=True)             # (Cin, 1)
        mean = total * inv_cnt
        ssq = jnp.square(zs[0] - mean).sum(axis=1, keepdims=True)
        for z in zs[1:]:
            ssq = ssq + jnp.square(z - mean).sum(axis=1, keepdims=True)
        var = ssq * inv_cnt
        gamma = gb_ref[0]                                            # (Cin, 1)
        beta = gb_ref[1]
        scale = jax.lax.rsqrt(var + BN_EPS) * gamma                  # (Cin, 1)
        shift = beta - mean * scale
        for b in range(B):
            out_ref[b] = zs[b] * scale + shift                       # lane-dense store

    return kernel


def cross_attention_forward(x1, x2, x3, wt, wp, wg, wz, gamma, beta):
    """x1/x2/x3: (B, Cin, D, H, W) NCDHW. wt/wp/wg: (Cp, Cin). wz: (Cin, Cp)."""
    B, Cin, D, H, W = x1.shape
    Cp = wt.shape[0]
    N = D * H * W
    P3 = POOL ** 3
    rd, rh, rw = D // POOL, H // POOL, W // POOL
    R = rd * rh * rw

    # ---- glue (layout only) ----
    x1r = x1.reshape(B, Cin, N)                       # pure reshape, no transpose

    def to_offset_major(x):
        # (B, C, D, H, W) -> (B, C, R*P3): column = r*P3 + p3,
        #   r  = within-bin offset (di, hi, wi),  p3 = bin (Db, Hb, Wb) d-major.
        xr = x.reshape(B, Cin, POOL, rd, POOL, rh, POOL, rw)
        xr = jnp.transpose(xr, (0, 1, 3, 5, 7, 2, 4, 6))
        return xr.reshape(B, Cin, R * P3)

    x2r = to_offset_major(x2)
    x3r = to_offset_major(x3)

    wtpg = jnp.stack([wt, wp, wg], axis=0)            # (3, Cp, Cin) -> one weight DMA
    gb = jnp.stack([gamma, beta], axis=0).reshape(2, Cin, 1)

    kernel = _make_fused_kernel(B, N, P3, R, Cin, Cp)
    out = pl.pallas_call(
        kernel,
        out_shape=jax.ShapeDtypeStruct((B, Cin, N), jnp.float32),
        grid=(1,),
        in_specs=[
            pl.BlockSpec((B, Cin, N), lambda i: (0, 0, 0)),
            pl.BlockSpec((B, Cin, R * P3), lambda i: (0, 0, 0)),
            pl.BlockSpec((B, Cin, R * P3), lambda i: (0, 0, 0)),
            pl.BlockSpec((3, Cp, Cin), lambda i: (0, 0, 0)),
            pl.BlockSpec((Cin, Cp), lambda i: (0, 0)),
            pl.BlockSpec((2, Cin, 1), lambda i: (0, 0, 0)),
        ],
        out_specs=pl.BlockSpec((B, Cin, N), lambda i: (0, 0, 0)),
        compiler_params=pltpu.CompilerParams(dimension_semantics=("arbitrary",)),
    )(x1r, x2r, x3r, wtpg, wz, gb)

    return out.reshape(B, Cin, D, H, W)               # pure reshape back to NCDHW


def cross_attention_reference(x1, x2, x3, wt, wp, wg, wz, gamma, beta):
    """Plain-JAX f32 reference mirroring the PyTorch forward (training-mode BN)."""
    B, Cin, D, H, W = x1.shape
    Cp = wt.shape[0]
    f32 = jnp.float32

    def conv1(x, w):  # 1x1x1 Conv3d, no bias, (out, in) weight layout
        return jnp.einsum('oc,bcdhw->bodhw', w, x,
                          preferred_element_type=f32, precision=_PREC)

    def pool(x):      # AdaptiveMaxPool3d(4), dims divisible by 4
        b, c, d, h, w = x.shape
        x = x.reshape(b, c, POOL, d // POOL, POOL, h // POOL, POOL, w // POOL)
        return x.max(axis=(3, 5, 7))

    t = conv1(x1, wt)                                   # (B, Cp, D, H, W)
    p = pool(conv1(x2, wp))                             # (B, Cp, 4, 4, 4)
    g = pool(conv1(x3, wg))

    tN = t.reshape(B, Cp, -1)                           # (B, Cp, N)
    pN = p.reshape(B, Cp, -1)                           # (B, Cp, 64)
    gN = g.reshape(B, Cp, -1)                           # (B, Cp, 64)

    # att = t^T p, softmax over pooled axis; 1/l normalization folded after the g matmul
    s = jnp.einsum('bcn,bcm->bnm', tN, pN, preferred_element_type=f32, precision=_PREC)
    s = s - s.max(axis=2, keepdims=True)
    e = jnp.exp(s)                                      # (B, N, 64) f32
    l = e.sum(axis=2, keepdims=True)                    # (B, N, 1)
    y = jnp.einsum('bcm,bnm->bcn', gN, e, preferred_element_type=f32, precision=_PREC)
    y = y / jnp.swapaxes(l, 1, 2)                       # (B, Cp, N)
    z = jnp.einsum('oc,bcn->bon', wz, y, preferred_element_type=f32, precision=_PREC)

    mean = z.mean(axis=(0, 2), keepdims=True)
    var = jnp.square(z - mean).mean(axis=(0, 2), keepdims=True)
    zn = (z - mean) * jax.lax.rsqrt(var + BN_EPS)
    zn = zn * gamma.reshape(1, Cin, 1) + beta.reshape(1, Cin, 1)
    return zn.reshape(B, Cin, D, H, W)


if __name__ == "__main__":
    B, Cin, Cp = 2, 8, 8          # inplanes=8, planes=8
    D = H = W = 8                 # spatial dims (multiples of pool_size=4)

    key = jax.random.PRNGKey(0)
    k1, k2, k3, kt, kp, kg, kz, kgm, kbt = jax.random.split(key, 9)
    x1 = jax.random.normal(k1, (B, Cin, D, H, W), jnp.float32)
    x2 = jax.random.normal(k2, (B, Cin, D, H, W), jnp.float32)
    x3 = jax.random.normal(k3, (B, Cin, D, H, W), jnp.float32)

    # Conv3d 1x1x1 weights in PyTorch (out_channels, in_channels) layout
    wt = 0.3 * jax.random.normal(kt, (Cp, Cin), jnp.float32)
    wp = 0.3 * jax.random.normal(kp, (Cp, Cin), jnp.float32)
    wg = 0.3 * jax.random.normal(kg, (Cp, Cin), jnp.float32)
    wz = 0.3 * jax.random.normal(kz, (Cin, Cp), jnp.float32)
    gamma = 1.0 + 0.1 * jax.random.normal(kgm, (Cin,), jnp.float32)
    beta = 0.1 * jax.random.normal(kbt, (Cin,), jnp.float32)

    out = cross_attention_forward(x1, x2, x3, wt, wp, wg, wz, gamma, beta)
    out = jax.block_until_ready(out)

    ref = cross_attention_reference(x1, x2, x3, wt, wp, wg, wz, gamma, beta)
    assert out.shape == (B, Cin, D, H, W)
    # Both paths are full f32 with HIGHEST-precision matmuls; only accumulation order
    # differs, so the remaining error is ~1e-5 even after BatchNorm amplification.
    assert jnp.allclose(out, ref, atol=2e-3, rtol=2e-3), \
        float(jnp.max(jnp.abs(out - ref)))

    # TODO(synk): use_scale branch (global max subtraction) skipped (module default is
    # use_scale=False); BN running-stat buffer updates are not modeled (they don't
    # affect the training-mode forward output).
    print("KERNEL_OK")
</pallas_src>

<mosaic_0001>
module attributes {stable_mosaic.version = 11 : i64} {
  func.func @kernel(%arg0: i32, %arg1: memref<2x8x512xf32, #tpu.memory_space<vmem>>, %arg2: memref<2x8x512xf32, #tpu.memory_space<vmem>>, %arg3: memref<2x8x512xf32, #tpu.memory_space<vmem>>, %arg4: memref<3x8x8xf32, #tpu.memory_space<vmem>>, %arg5: memref<8x8xf32, #tpu.memory_space<vmem>>, %arg6: memref<2x8x1xf32, #tpu.memory_space<vmem>>, %arg7: memref<2x8x512xf32, #tpu.memory_space<vmem>>) attributes {dimension_semantics = [#tpu.dimension_semantics<arbitrary>], iteration_bounds = array<i64: 1>, scalar_prefetch = 0 : i64, scratch_operands = 0 : i64, tpu.core_type = #tpu.core_type<tc>, window_params = [{pipeline_mode = #tpu.pipeline_mode<synchronous>, transform_indices = @transform_0, window_bounds = array<i64: 2, 8, 512>}, {pipeline_mode = #tpu.pipeline_mode<synchronous>, transform_indices = @transform_1, window_bounds = array<i64: 2, 8, 512>}, {pipeline_mode = #tpu.pipeline_mode<synchronous>, transform_indices = @transform_2, window_bounds = array<i64: 2, 8, 512>}, {pipeline_mode = #tpu.pipeline_mode<synchronous>, transform_indices = @transform_3, window_bounds = array<i64: 3, 8, 8>}, {pipeline_mode = #tpu.pipeline_mode<synchronous>, transform_indices = @transform_4, window_bounds = array<i64: 8, 8>}, {pipeline_mode = #tpu.pipeline_mode<synchronous>, transform_indices = @transform_5, window_bounds = array<i64: 2, 8, 1>}, {pipeline_mode = #tpu.pipeline_mode<synchronous>, transform_indices = @transform_6, window_bounds = array<i64: 2, 8, 512>}]} {
    %c0 = arith.constant 0 : index
    %c0_0 = arith.constant 0 : index
    %c0_1 = arith.constant 0 : index
    %0 = vector.load %arg4[%c0, %c0_0, %c0_1] : memref<3x8x8xf32, #tpu.memory_space<vmem>>, vector<1x8x8xf32>
    %1 = vector.shape_cast %0 : vector<1x8x8xf32> to vector<8x8xf32>
    %c1 = arith.constant 1 : index
    %c0_2 = arith.constant 0 : index
    %c0_3 = arith.constant 0 : index
    %2 = vector.load %arg4[%c1, %c0_2, %c0_3] : memref<3x8x8xf32, #tpu.memory_space<vmem>>, vector<1x8x8xf32>
    %3 = vector.shape_cast %2 : vector<1x8x8xf32> to vector<8x8xf32>
    %c2 = arith.constant 2 : index
    %c0_4 = arith.constant 0 : index
    %c0_5 = arith.constant 0 : index
    %4 = vector.load %arg4[%c2, %c0_4, %c0_5] : memref<3x8x8xf32, #tpu.memory_space<vmem>>, vector<1x8x8xf32>
    %5 = vector.shape_cast %4 : vector<1x8x8xf32> to vector<8x8xf32>
    %c0_6 = arith.constant 0 : index
    %c0_7 = arith.constant 0 : index
    %6 = vector.load %arg5[%c0_6, %c0_7] : memref<8x8xf32, #tpu.memory_space<vmem>>, vector<8x8xf32>
    %c0_8 = arith.constant 0 : index
    %c0_9 = arith.constant 0 : index
    %c0_10 = arith.constant 0 : index
    %7 = vector.load %arg1[%c0_8, %c0_9, %c0_10] : memref<2x8x512xf32, #tpu.memory_space<vmem>>, vector<1x8x512xf32>
    %8 = vector.shape_cast %7 : vector<1x8x512xf32> to vector<8x512xf32>
    %c0_11 = arith.constant 0 : index
    %c0_12 = arith.constant 0 : index
    %c0_13 = arith.constant 0 : index
    %9 = vector.load %arg2[%c0_11, %c0_12, %c0_13] : memref<2x8x512xf32, #tpu.memory_space<vmem>>, vector<1x8x512xf32>
    %10 = vector.shape_cast %9 : vector<1x8x512xf32> to vector<8x512xf32>
    %c0_14 = arith.constant 0 : index
    %c0_15 = arith.constant 0 : index
    %c0_16 = arith.constant 0 : index
    %11 = vector.load %arg3[%c0_14, %c0_15, %c0_16] : memref<2x8x512xf32, #tpu.memory_space<vmem>>, vector<1x8x512xf32>
    %12 = vector.shape_cast %11 : vector<1x8x512xf32> to vector<8x512xf32>
    %cst = arith.constant dense<0.000000e+00> : vector<8x512xf32>
    %13 = tpu.matmul %1, %8, %cst {dimension_numbers = #tpu.dot_dimension_numbers<[1], [0], [0], [1], [0, 0, 1, 1], [], []>, precision = #tpu.contract_precision<fp32>} : vector<8x8xf32>, vector<8x512xf32>, vector<8x512xf32> -> vector<8x512xf32>
    %cst_17 = arith.constant dense<0.000000e+00> : vector<8x512xf32>
    %14 = tpu.matmul %3, %10, %cst_17 {dimension_numbers = #tpu.dot_dimension_numbers<[1], [0], [0], [1], [0, 0, 1, 1], [], []>, precision = #tpu.contract_precision<fp32>} : vector<8x8xf32>, vector<8x512xf32>, vector<8x512xf32> -> vector<8x512xf32>
    %15 = vector.extract_strided_slice %14 {offsets = [0, 0], sizes = [8, 64], strides = [1, 1]} : vector<8x512xf32> to vector<8x64xf32>
    %16 = vector.extract_strided_slice %14 {offsets = [0, 64], sizes = [8, 64], strides = [1, 1]} : vector<8x512xf32> to vector<8x64xf32>
    %17 = arith.maximumf %15, %16 : vector<8x64xf32>
    %18 = vector.extract_strided_slice %14 {offsets = [0, 128], sizes = [8, 64], strides = [1, 1]} : vector<8x512xf32> to vector<8x64xf32>
    %19 = arith.maximumf %17, %18 : vector<8x64xf32>
    %20 = vector.extract_strided_slice %14 {offsets = [0, 192], sizes = [8, 64], strides = [1, 1]} : vector<8x512xf32> to vector<8x64xf32>
    %21 = arith.maximumf %19, %20 : vector<8x64xf32>
    %22 = vector.extract_strided_slice %14 {offsets = [0, 256], sizes = [8, 64], strides = [1, 1]} : vector<8x512xf32> to vector<8x64xf32>
    %23 = arith.maximumf %21, %22 : vector<8x64xf32>
    %24 = vector.extract_strided_slice %14 {offsets = [0, 320], sizes = [8, 64], strides = [1, 1]} : vector<8x512xf32> to vector<8x64xf32>
    %25 = arith.maximumf %23, %24 : vector<8x64xf32>
    %26 = vector.extract_strided_slice %14 {offsets = [0, 384], sizes = [8, 64], strides = [1, 1]} : vector<8x512xf32> to vector<8x64xf32>
    %27 = arith.maximumf %25, %26 : vector<8x64xf32>
    %28 = vector.extract_strided_slice %14 {offsets = [0, 448], sizes = [8, 64], strides = [1, 1]} : vector<8x512xf32> to vector<8x64xf32>
    %29 = arith.maximumf %27, %28 : vector<8x64xf32>
    %cst_18 = arith.constant dense<0.000000e+00> : vector<8x512xf32>
    %30 = tpu.matmul %5, %12, %cst_18 {dimension_numbers = #tpu.dot_dimension_numbers<[1], [0], [0], [1], [0, 0, 1, 1], [], []>, precision = #tpu.contract_precision<fp32>} : vector<8x8xf32>, vector<8x512xf32>, vector<8x512xf32> -> vector<8x512xf32>
    %31 = vector.extract_strided_slice %30 {offsets = [0, 0], sizes = [8, 64], strides = [1, 1]} : vector<8x512xf32> to vector<8x64xf32>
    %32 = vector.extract_strided_slice %30 {offsets = [0, 64], sizes = [8, 64], strides = [1, 1]} : vector<8x512xf32> to vector<8x64xf32>
    %33 = arith.maximumf %31, %32 : vector<8x64xf32>
    %34 = vector.extract_strided_slice %30 {offsets = [0, 128], sizes = [8, 64], strides = [1, 1]} : vector<8x512xf32> to vector<8x64xf32>
    %35 = arith.maximumf %33, %34 : vector<8x64xf32>
    %36 = vector.extract_strided_slice %30 {offsets = [0, 192], sizes = [8, 64], strides = [1, 1]} : vector<8x512xf32> to vector<8x64xf32>
    %37 = arith.maximumf %35, %36 : vector<8x64xf32>
    %38 = vector.extract_strided_slice %30 {offsets = [0, 256], sizes = [8, 64], strides = [1, 1]} : vector<8x512xf32> to vector<8x64xf32>
    %39 = arith.maximumf %37, %38 : vector<8x64xf32>
    %40 = vector.extract_strided_slice %30 {offsets = [0, 320], sizes = [8, 64], strides = [1, 1]} : vector<8x512xf32> to vector<8x64xf32>
    %41 = arith.maximumf %39, %40 : vector<8x64xf32>
    %42 = vector.extract_strided_slice %30 {offsets = [0, 384], sizes = [8, 64], strides = [1, 1]} : vector<8x512xf32> to vector<8x64xf32>
    %43 = arith.maximumf %41, %42 : vector<8x64xf32>
    %44 = vector.extract_strided_slice %30 {offsets = [0, 448], sizes = [8, 64], strides = [1, 1]} : vector<8x512xf32> to vector<8x64xf32>
    %45 = arith.maximumf %43, %44 : vector<8x64xf32>
    %cst_19 = arith.constant dense<0.000000e+00> : vector<64x512xf32>
    %46 = tpu.matmul %29, %13, %cst_19 {dimension_numbers = #tpu.dot_dimension_numbers<[0], [0], [1], [1], [0, 1, 1, 1], [], []>, precision = #tpu.contract_precision<fp32>} : vector<8x64xf32>, vector<8x512xf32>, vector<64x512xf32> -> vector<64x512xf32>
    %cst_20 = arith.constant dense<0xFF800000> : vector<512xf32>
    %47 = vector.multi_reduction <maximumf>, %46, %cst_20 [0] : vector<64x512xf32> to vector<512xf32>
    %48 = vector.shape_cast %47 : vector<512xf32> to vector<1x512xf32>
    %49 = vector.broadcast %48 : vector<1x512xf32> to vector<64x512xf32>
    %50 = arith.subf %46, %49 : vector<64x512xf32>
    %51 = math.exp %50 : vector<64x512xf32>
    %cst_21 = arith.constant dense<0.000000e+00> : vector<512xf32>
    %52 = vector.multi_reduction <add>, %51, %cst_21 [0] : vector<64x512xf32> to vector<512xf32>
    %53 = vector.shape_cast %52 : vector<512xf32> to vector<1x512xf32>
    %cst_22 = arith.constant dense<0.000000e+00> : vector<8x512xf32>
    %54 = tpu.matmul %45, %51, %cst_22 {dimension_numbers = #tpu.dot_dimension_numbers<[1], [0], [0], [1], [0, 0, 1, 1], [], []>, precision = #tpu.contract_precision<fp32>} : vector<8x64xf32>, vector<64x512xf32>, vector<8x512xf32> -> vector<8x512xf32>
    %55 = vector.broadcast %53 : vector<1x512xf32> to vector<8x512xf32>
    %56 = arith.divf %54, %55 : vector<8x512xf32>
    %cst_23 = arith.constant dense<0.000000e+00> : vector<8x512xf32>
    %57 = tpu.matmul %6, %56, %cst_23 {dimension_numbers = #tpu.dot_dimension_numbers<[1], [0], [0], [1], [0, 0, 1, 1], [], []>, precision = #tpu.contract_precision<fp32>} : vector<8x8xf32>, vector<8x512xf32>, vector<8x512xf32> -> vector<8x512xf32>
    %c1_24 = arith.constant 1 : index
    %c0_25 = arith.constant 0 : index
    %c0_26 = arith.constant 0 : index
    %58 = vector.load %arg1[%c1_24, %c0_25, %c0_26] : memref<2x8x512xf32, #tpu.memory_space<vmem>>, vector<1x8x512xf32>
    %59 = vector.shape_cast %58 : vector<1x8x512xf32> to vector<8x512xf32>
    %c1_27 = arith.constant 1 : index
    %c0_28 = arith.constant 0 : index
    %c0_29 = arith.constant 0 : index
    %60 = vector.load %arg2[%c1_27, %c0_28, %c0_29] : memref<2x8x512xf32, #tpu.memory_space<vmem>>, vector<1x8x512xf32>
    %61 = vector.shape_cast %60 : vector<1x8x512xf32> to vector<8x512xf32>
    %c1_30 = arith.constant 1 : index
    %c0_31 = arith.constant 0 : index
    %c0_32 = arith.constant 0 : index
    %62 = vector.load %arg3[%c1_30, %c0_31, %c0_32] : memref<2x8x512xf32, #tpu.memory_space<vmem>>, vector<1x8x512xf32>
    %63 = vector.shape_cast %62 : vector<1x8x512xf32> to vector<8x512xf32>
    %cst_33 = arith.constant dense<0.000000e+00> : vector<8x512xf32>
    %64 = tpu.matmul %1, %59, %cst_33 {dimension_numbers = #tpu.dot_dimension_numbers<[1], [0], [0], [1], [0, 0, 1, 1], [], []>, precision = #tpu.contract_precision<fp32>} : vector<8x8xf32>, vector<8x512xf32>, vector<8x512xf32> -> vector<8x512xf32>
    %cst_34 = arith.constant dense<0.000000e+00> : vector<8x512xf32>
    %65 = tpu.matmul %3, %61, %cst_34 {dimension_numbers = #tpu.dot_dimension_numbers<[1], [0], [0], [1], [0, 0, 1, 1], [], []>, precision = #tpu.contract_precision<fp32>} : vector<8x8xf32>, vector<8x512xf32>, vector<8x512xf32> -> vector<8x512xf32>
    %66 = vector.extract_strided_slice %65 {offsets = [0, 0], sizes = [8, 64], strides = [1, 1]} : vector<8x512xf32> to vector<8x64xf32>
    %67 = vector.extract_strided_slice %65 {offsets = [0, 64], sizes = [8, 64], strides = [1, 1]} : vector<8x512xf32> to vector<8x64xf32>
    %68 = arith.maximumf %66, %67 : vector<8x64xf32>
    %69 = vector.extract_strided_slice %65 {offsets = [0, 128], sizes = [8, 64], strides = [1, 1]} : vector<8x512xf32> to vector<8x64xf32>
    %70 = arith.maximumf %68, %69 : vector<8x64xf32>
    %71 = vector.extract_strided_slice %65 {offsets = [0, 192], sizes = [8, 64], strides = [1, 1]} : vector<8x512xf32> to vector<8x64xf32>
    %72 = arith.maximumf %70, %71 : vector<8x64xf32>
    %73 = vector.extract_strided_slice %65 {offsets = [0, 256], sizes = [8, 64], strides = [1, 1]} : vector<8x512xf32> to vector<8x64xf32>
    %74 = arith.maximumf %72, %73 : vector<8x64xf32>
    %75 = vector.extract_strided_slice %65 {offsets = [0, 320], sizes = [8, 64], strides = [1, 1]} : vector<8x512xf32> to vector<8x64xf32>
    %76 = arith.maximumf %74, %75 : vector<8x64xf32>
    %77 = vector.extract_strided_slice %65 {offsets = [0, 384], sizes = [8, 64], strides = [1, 1]} : vector<8x512xf32> to vector<8x64xf32>
    %78 = arith.maximumf %76, %77 : vector<8x64xf32>
    %79 = vector.extract_strided_slice %65 {offsets = [0, 448], sizes = [8, 64], strides = [1, 1]} : vector<8x512xf32> to vector<8x64xf32>
    %80 = arith.maximumf %78, %79 : vector<8x64xf32>
    %cst_35 = arith.constant dense<0.000000e+00> : vector<8x512xf32>
    %81 = tpu.matmul %5, %63, %cst_35 {dimension_numbers = #tpu.dot_dimension_numbers<[1], [0], [0], [1], [0, 0, 1, 1], [], []>, precision = #tpu.contract_precision<fp32>} : vector<8x8xf32>, vector<8x512xf32>, vector<8x512xf32> -> vector<8x512xf32>
    %82 = vector.extract_strided_slice %81 {offsets = [0, 0], sizes = [8, 64], strides = [1, 1]} : vector<8x512xf32> to vector<8x64xf32>
    %83 = vector.extract_strided_slice %81 {offsets = [0, 64], sizes = [8, 64], strides = [1, 1]} : vector<8x512xf32> to vector<8x64xf32>
    %84 = arith.maximumf %82, %83 : vector<8x64xf32>
    %85 = vector.extract_strided_slice %81 {offsets = [0, 128], sizes = [8, 64], strides = [1, 1]} : vector<8x512xf32> to vector<8x64xf32>
    %86 = arith.maximumf %84, %85 : vector<8x64xf32>
    %87 = vector.extract_strided_slice %81 {offsets = [0, 192], sizes = [8, 64], strides = [1, 1]} : vector<8x512xf32> to vector<8x64xf32>
    %88 = arith.maximumf %86, %87 : vector<8x64xf32>
    %89 = vector.extract_strided_slice %81 {offsets = [0, 256], sizes = [8, 64], strides = [1, 1]} : vector<8x512xf32> to vector<8x64xf32>
    %90 = arith.maximumf %88, %89 : vector<8x64xf32>
    %91 = vector.extract_strided_slice %81 {offsets = [0, 320], sizes = [8, 64], strides = [1, 1]} : vector<8x512xf32> to vector<8x64xf32>
    %92 = arith.maximumf %90, %91 : vector<8x64xf32>
    %93 = vector.extract_strided_slice %81 {offsets = [0, 384], sizes = [8, 64], strides = [1, 1]} : vector<8x512xf32> to vector<8x64xf32>
    %94 = arith.maximumf %92, %93 : vector<8x64xf32>
    %95 = vector.extract_strided_slice %81 {offsets = [0, 448], sizes = [8, 64], strides = [1, 1]} : vector<8x512xf32> to vector<8x64xf32>
    %96 = arith.maximumf %94, %95 : vector<8x64xf32>
    %cst_36 = arith.constant dense<0.000000e+00> : vector<64x512xf32>
    %97 = tpu.matmul %80, %64, %cst_36 {dimension_numbers = #tpu.dot_dimension_numbers<[0], [0], [1], [1], [0, 1, 1, 1], [], []>, precision = #tpu.contract_precision<fp32>} : vector<8x64xf32>, vector<8x512xf32>, vector<64x512xf32> -> vector<64x512xf32>
    %cst_37 = arith.constant dense<0xFF800000> : vector<512xf32>
    %98 = vector.multi_reduction <maximumf>, %97, %cst_37 [0] : vector<64x512xf32> to vector<512xf32>
    %99 = vector.shape_cast %98 : vector<512xf32> to vector<1x512xf32>
    %100 = vector.broadcast %99 : vector<1x512xf32> to vector<64x512xf32>
    %101 = arith.subf %97, %100 : vector<64x512xf32>
    %102 = math.exp %101 : vector<64x512xf32>
    %cst_38 = arith.constant dense<0.000000e+00> : vector<512xf32>
    %103 = vector.multi_reduction <add>, %102, %cst_38 [0] : vector<64x512xf32> to vector<512xf32>
    %104 = vector.shape_cast %103 : vector<512xf32> to vector<1x512xf32>
    %cst_39 = arith.constant dense<0.000000e+00> : vector<8x512xf32>
    %105 = tpu.matmul %96, %102, %cst_39 {dimension_numbers = #tpu.dot_dimension_numbers<[1], [0], [0], [1], [0, 0, 1, 1], [], []>, precision = #tpu.contract_precision<fp32>} : vector<8x64xf32>, vector<64x512xf32>, vector<8x512xf32> -> vector<8x512xf32>
    %106 = vector.broadcast %104 : vector<1x512xf32> to vector<8x512xf32>
    %107 = arith.divf %105, %106 : vector<8x512xf32>
    %cst_40 = arith.constant dense<0.000000e+00> : vector<8x512xf32>
    %108 = tpu.matmul %6, %107, %cst_40 {dimension_numbers = #tpu.dot_dimension_numbers<[1], [0], [0], [1], [0, 0, 1, 1], [], []>, precision = #tpu.contract_precision<fp32>} : vector<8x8xf32>, vector<8x512xf32>, vector<8x512xf32> -> vector<8x512xf32>
    %cst_41 = arith.constant dense<0.000000e+00> : vector<8xf32>
    %109 = vector.multi_reduction <add>, %57, %cst_41 [1] : vector<8x512xf32> to vector<8xf32>
    %110 = vector.shape_cast %109 : vector<8xf32> to vector<8x1xf32>
    %cst_42 = arith.constant dense<0.000000e+00> : vector<8xf32>
    %111 = vector.multi_reduction <add>, %108, %cst_42 [1] : vector<8x512xf32> to vector<8xf32>
    %112 = vector.shape_cast %111 : vector<8xf32> to vector<8x1xf32>
    %113 = arith.addf %110, %112 : vector<8x1xf32>
    %cst_43 = arith.constant 9.765625E-4 : f32
    %114 = vector.broadcast %cst_43 : f32 to vector<8x1xf32>
    %115 = arith.mulf %113, %114 : vector<8x1xf32>
    %116 = vector.broadcast %115 : vector<8x1xf32> to vector<8x512xf32>
    %117 = arith.subf %57, %116 : vector<8x512xf32>
    %118 = arith.mulf %117, %117 : vector<8x512xf32>
    %cst_44 = arith.constant dense<0.000000e+00> : vector<8xf32>
    %119 = vector.multi_reduction <add>, %118, %cst_44 [1] : vector<8x512xf32> to vector<8xf32>
    %120 = vector.shape_cast %119 : vector<8xf32> to vector<8x1xf32>
    %121 = vector.broadcast %115 : vector<8x1xf32> to vector<8x512xf32>
    %122 = arith.subf %108, %121 : vector<8x512xf32>
    %123 = arith.mulf %122, %122 : vector<8x512xf32>
    %cst_45 = arith.constant dense<0.000000e+00> : vector<8xf32>
    %124 = vector.multi_reduction <add>, %123, %cst_45 [1] : vector<8x512xf32> to vector<8xf32>
    %125 = vector.shape_cast %124 : vector<8xf32> to vector<8x1xf32>
    %126 = arith.addf %120, %125 : vector<8x1xf32>
    %cst_46 = arith.constant 9.765625E-4 : f32
    %127 = vector.broadcast %cst_46 : f32 to vector<8x1xf32>
    %128 = arith.mulf %126, %127 : vector<8x1xf32>
    %c0_47 = arith.constant 0 : index
    %c0_48 = arith.constant 0 : index
    %c0_49 = arith.constant 0 : index
    %129 = vector.load %arg6[%c0_47, %c0_48, %c0_49] : memref<2x8x1xf32, #tpu.memory_space<vmem>>, vector<1x8x1xf32>
    %130 = vector.shape_cast %129 : vector<1x8x1xf32> to vector<8x1xf32>
    %c1_50 = arith.constant 1 : index
    %c0_51 = arith.constant 0 : index
    %c0_52 = arith.constant 0 : index
    %131 = vector.load %arg6[%c1_50, %c0_51, %c0_52] : memref<2x8x1xf32, #tpu.memory_space<vmem>>, vector<1x8x1xf32>
    %132 = vector.shape_cast %131 : vector<1x8x1xf32> to vector<8x1xf32>
    %cst_53 = arith.constant 9.99999974E-6 : f32
    %133 = vector.broadcast %cst_53 : f32 to vector<8x1xf32>
    %134 = arith.addf %128, %133 : vector<8x1xf32>
    %135 = math.rsqrt %134 : vector<8x1xf32>
    %136 = arith.mulf %135, %130 : vector<8x1xf32>
    %137 = arith.mulf %115, %136 : vector<8x1xf32>
    %138 = arith.subf %132, %137 : vector<8x1xf32>
    %139 = vector.broadcast %136 : vector<8x1xf32> to vector<8x512xf32>
    %140 = arith.mulf %57, %139 : vector<8x512xf32>
    %141 = vector.broadcast %138 : vector<8x1xf32> to vector<8x512xf32>
    %142 = arith.addf %140, %141 : vector<8x512xf32>
    %c0_54 = arith.constant 0 : index
    %c0_55 = arith.constant 0 : index
    %c0_56 = arith.constant 0 : index
    %143 = vector.load %arg7[%c0_54, %c0_55, %c0_56] : memref<2x8x512xf32, #tpu.memory_space<vmem>>, vector<1x8x512xf32>
    %144 = vector.shape_cast %143 : vector<1x8x512xf32> to vector<8x512xf32>
    %145 = vector.shape_cast %142 : vector<8x512xf32> to vector<1x8x512xf32>
    tpu.vector_store %arg7[%c0_54, %c0_55, %c0_56], %145 {strides = array<i32>} : memref<2x8x512xf32, #tpu.memory_space<vmem>>, vector<1x8x512xf32>,
    %146 = vector.broadcast %136 : vector<8x1xf32> to vector<8x512xf32>
    %147 = arith.mulf %108, %146 : vector<8x512xf32>
    %148 = vector.broadcast %138 : vector<8x1xf32> to vector<8x512xf32>
    %149 = arith.addf %147, %148 : vector<8x512xf32>
    %c1_57 = arith.constant 1 : index
    %c0_58 = arith.constant 0 : index
    %c0_59 = arith.constant 0 : index
    %150 = vector.load %arg7[%c1_57, %c0_58, %c0_59] : memref<2x8x512xf32, #tpu.memory_space<vmem>>, vector<1x8x512xf32>
    %151 = vector.shape_cast %150 : vector<1x8x512xf32> to vector<8x512xf32>
    %152 = vector.shape_cast %149 : vector<8x512xf32> to vector<1x8x512xf32>
    tpu.vector_store %arg7[%c1_57, %c0_58, %c0_59], %152 {strides = array<i32>} : memref<2x8x512xf32, #tpu.memory_space<vmem>>, vector<1x8x512xf32>,
    return
  }
  func.func @transform_0(%arg0: i32) -> (i32, i32, i32) {
    %c0_i32 = arith.constant 0 : i32
    %c0_i32_0 = arith.constant 0 : i32
    %c0_i32_1 = arith.constant 0 : i32
    %c0_i32_2 = arith.constant 0 : i32
    return %c0_i32, %c0_i32_0, %c0_i32_1 : i32, i32, i32
  }
  func.func @transform_1(%arg0: i32) -> (i32, i32, i32) {
    %c0_i32 = arith.constant 0 : i32
    %c0_i32_0 = arith.constant 0 : i32
    %c0_i32_1 = arith.constant 0 : i32
    %c0_i32_2 = arith.constant 0 : i32
    return %c0_i32, %c0_i32_0, %c0_i32_1 : i32, i32, i32
  }
  func.func @transform_2(%arg0: i32) -> (i32, i32, i32) {
    %c0_i32 = arith.constant 0 : i32
    %c0_i32_0 = arith.constant 0 : i32
    %c0_i32_1 = arith.constant 0 : i32
    %c0_i32_2 = arith.constant 0 : i32
    return %c0_i32, %c0_i32_0, %c0_i32_1 : i32, i32, i32
  }
  func.func @transform_3(%arg0: i32) -> (i32, i32, i32) {
    %c0_i32 = arith.constant 0 : i32
    %c0_i32_0 = arith.constant 0 : i32
    %c0_i32_1 = arith.constant 0 : i32
    %c0_i32_2 = arith.constant 0 : i32
    return %c0_i32, %c0_i32_0, %c0_i32_1 : i32, i32, i32
  }
  func.func @transform_4(%arg0: i32) -> (i32, i32) {
    %c0_i32 = arith.constant 0 : i32
    %c0_i32_0 = arith.constant 0 : i32
    %c0_i32_1 = arith.constant 0 : i32
    return %c0_i32, %c0_i32_0 : i32, i32
  }
  func.func @transform_5(%arg0: i32) -> (i32, i32, i32) {
    %c0_i32 = arith.constant 0 : i32
    %c0_i32_0 = arith.constant 0 : i32
    %c0_i32_1 = arith.constant 0 : i32
    %c0_i32_2 = arith.constant 0 : i32
    return %c0_i32, %c0_i32_0, %c0_i32_1 : i32, i32, i32
  }
  func.func @transform_6(%arg0: i32) -> (i32, i32, i32) {
    %c0_i32 = arith.constant 0 : i32
    %c0_i32_0 = arith.constant 0 : i32
    %c0_i32_1 = arith.constant 0 : i32
    %c0_i32_2 = arith.constant 0 : i32
    return %c0_i32, %c0_i32_0, %c0_i32_1 : i32, i32, i32
  }
}

</mosaic_0001>

<bundles_post_ra>
// kernel: tpu_custom_call.1
= control target key start
LH: loop header
LB: loop body
LE: loop exit
PB: predicated region body
PF: predicated region fallthrough
CT: control target
= control target key end

     0   :  { %11 = vsyncpa [#allocation3], 0  ;;  %s18114_s0 = inlined_call_operand.hbm [shape: f32[2,8,512], index: 0, kind: input, shape index: {}]   ;;  %s18115_s1 = inlined_call_operand.hbm [shape: f32[2,8,512], index: 1, kind: input, shape index: {}]   ;;  %s18116_s2 = inlined_call_operand.hbm [shape: f32[2,8,512], index: 2, kind: input, shape index: {}]   ;;  %s18117_s3 = inlined_call_operand.vmem [shape: f32[3,8,8], index: 3, kind: input, shape index: {}]   ;;  %s18118_s4 = inlined_call_operand.vmem [shape: f32[8,8], index: 4, kind: input, shape index: {}]   ;;  %s18119_s5 = inlined_call_operand.vmem [shape: f32[2,8,1], index: 5, kind: input, shape index: {}]   ;;  %s18120_s6 = inlined_call_operand.hbm [shape: f32[2,8,512], index: 6, kind: output, shape index: {}]  }
   0x1   :  { %12 = vsyncpa [#allocation6], 0 }
   0x2   :  { %13 = vsyncpa [#allocation4], 0  ;;  %s15257_s21 = smov [#allocation5]   ;;  %s15258_s23 = smov [#allocation2]  }
   0x3   :  { %s31_s22 = sshll.u32 %s15257_s21, 4  ;;  %s19_s24 = sshll.u32 %s15258_s23, 4  ;;  %s32_s22 = int_to_ptr.vmem [resolvable:$true] %s31_s22  ;;  %s15301_s24 = int_to_ptr.vmem [resolvable:$true] %s19_s24 }
   0x4   :  { %s15163_s27 = scalar_lea.hbm %s18115_s1, 1024 }
   0x5   :  { %p15164_p0 = scmp.ne.s32.totalorder %s18115_s1, %s15163_s27  ;;  %p15167_p1 = scmp.lt.u32.totalorder %s15163_s27, %s18115_s1 }
   0x7   :  { %p15169_p2 = pnand %p15167_p1, %p15164_p0 }
   0x9   :  { %15172 = shalt.err (!%p15169_p2)
}
   0xa   :  { %s15173_s8 = scalar_lea.vmem %s32_s22, 1024  ;;  %p15178_p4 = scmp.lt.s32.totalorder %s32_s22, %s32_s22 }
   0xb   :  { %p15174_p3 = scmp.ne.s32.totalorder %s32_s22, %s15173_s8  ;;  %p15179_p5 = scmp.lt.s32.totalorder %s15173_s8, %s15173_s8 }
   0xd   :  { %p15180_p6 = por %p15179_p5, %p15178_p4 }
   0xf   :  { %p15181_p7 = pnand %p15180_p6, %p15174_p3 }
  0x11   :  { %15184 = shalt.err (!%p15181_p7)
}
  0x12   :  { %s15259_s9 = smov 512   ;;  %s15260_s10 = smov 32  }
  0x13   :  { %37 = dma.hbm_to_vmem [thread:$0]  %s18115_s1, 1024, %s32_s22, [#allocation6], %s15259_s9, %s15259_s9, %s15260_s10  }
  0x14   :  { %s15185_s15 = scalar_lea.hbm %s18114_s0, 1024 }
  0x15   :  { %p15186_p8 = scmp.ne.s32.totalorder %s18114_s0, %s15185_s15  ;;  %p15189_p9 = scmp.lt.u32.totalorder %s15185_s15, %s18114_s0 }
  0x17   :  { %p15191_p10 = pnand %p15189_p9, %p15186_p8 }
  0x19   :  { %15194 = shalt.err (!%p15191_p10)
}
  0x1a   :  { %s15195_s20 = scalar_lea.vmem %s15301_s24, 1024  ;;  %p15200_p12 = scmp.lt.s32.totalorder %s15301_s24, %s15301_s24 }
  0x1b   :  { %p15196_p11 = scmp.ne.s32.totalorder %s15301_s24, %s15195_s20  ;;  %p15201_p13 = scmp.lt.s32.totalorder %s15195_s20, %s15195_s20 }
  0x1d   :  { %p15202_p0 = por %p15201_p13, %p15200_p12 }
  0x1f   :  { %p15203_p1 = pnand %p15202_p0, %p15196_p11 }
  0x21   :  { %15206 = shalt.err (!%p15203_p1)
}
  0x22   :  { %25 = dma.hbm_to_vmem [thread:$0]  %s18114_s0, 1024, %s15301_s24, [#allocation3], %s15259_s9, %s15259_s9, %s15260_s10  }
  0x23   :  { %s15261_s22 = smov [#allocation7]   ;;  %s15207_s27 = scalar_lea.hbm %s18116_s2, 1024 }
  0x24   :  { %s43_s23 = sshll.u32 %s15261_s22, 4  ;;  %p15208_p2 = scmp.ne.s32.totalorder %s18116_s2, %s15207_s27  ;;  %s44_s23 = int_to_ptr.vmem [resolvable:$true] %s43_s23 }
  0x25   :  { %p15211_p3 = scmp.lt.u32.totalorder %s15207_s27, %s18116_s2 }
  0x27   :  { %p15213_p4 = pnand %p15211_p3, %p15208_p2 }
  0x29   :  { %15216 = shalt.err (!%p15213_p4)
}
  0x2a   :  { %s15217_s8 = scalar_lea.vmem %s44_s23, 1024  ;;  %p15222_p6 = scmp.lt.s32.totalorder %s44_s23, %s44_s23 }
  0x2b   :  { %p15218_p5 = scmp.ne.s32.totalorder %s44_s23, %s15217_s8  ;;  %p15223_p7 = scmp.lt.s32.totalorder %s15217_s8, %s15217_s8 }
  0x2d   :  { %p15224_p8 = por %p15223_p7, %p15222_p6 }
  0x2f   :  { %p15225_p9 = pnand %p15224_p8, %p15218_p5 }
  0x31   :  { %15228 = shalt.err (!%p15225_p9)
}
  0x32   :  { %49 = dma.hbm_to_vmem [thread:$0]  %s18116_s2, 1024, %s44_s23, [#allocation6], %s15259_s9, %s15259_s9, %s15260_s10  }
  0x33   :  { %15251 = dma.done.wait [#allocation3], 1024  }
  0x34   :  { %15252 = vsyncadd [#allocation3], 4294966272 }
  0x35   :  { %15253 = dma.done.wait [#allocation6], 2048  }
  0x36   :  { %15254 = vsyncadd [#allocation6], 4294965248  ;;  %v18121_v0 = vmov 0.0   ;;  %vm83_vm0 = vcmask 64512   ;;  %v72_v1 = vld [vmem:[#allocation2 + $0x8] sm:$0xff]  ;;  %v74_v2 = vld [vmem:[#allocation2 + $0x18] sm:$0xff] }
  0x37   :  { %153 = vmatprep.mubr.f32.mxu0 %v18121_v0  ;;  %618 = vmatprep.mubr.f32.mxu1 %v18121_v0  ;;  %v71_v3 = vld [vmem:[#allocation2] sm:$0xff]  ;;  %v15355_v4 = vand.u32 4294901760, %v72_v1  ;;  %v15357_v5 = vand.u32 4294901760, %v74_v2  ;;  %v73_v7 = vld [vmem:[#allocation2 + $0x10] sm:$0xff]  ;;  %v14099_v32 = vld [vmem:[%s18117_s3 + $0x8] sm:$0xff]  ;;  %vm4801_vm1 = vcmask 523264  }
  0x38   :  { %v15359_v6 = vand.u32 4294901760, %v71_v3  ;;  %v65_v8 = vld [vmem:[%s18117_s3] sm:$0xff]  ;;  %v15364_v9 = vand.u32 4294901760, %v73_v7  ;;  %v76_v33 = vld [vmem:[#allocation5 + $0x8] sm:$0xff]  ;;  %v78_v34 = vld [vmem:[#allocation5 + $0x18] sm:$0xff]  ;;  %v1018_v35 = vsel %vm83_vm0, %v14099_v32, 0 }
  0x39   :  { %v85_v10 = vsel %vm83_vm0, %v65_v8, 0  ;;  %88 = vmatprep.subr.mxu0 %v15355_v4  ;;  %553 = vmatprep.subr.mxu1 %v15357_v5  ;;  %v166_v13 = vsub.f32 %v72_v1, %v15355_v4  ;;  %v631_v14 = vsub.f32 %v74_v2, %v15357_v5  ;;  %v75_v36 = vld [vmem:[#allocation5] sm:$0xff]  ;;  %v15407_v37 = vand.u32 4294901760, %v76_v33  ;;  %v77_v39 = vld [vmem:[#allocation5 + $0x10] sm:$0xff]  ;;  %v80_v1 = vld [vmem:[#allocation7 + $0x8] sm:$0xff]  ;;  %s15265_s1 = smov [#allocation8]  }
  0x3a   :  { %v172_v11 = vsub.f32 %v71_v3, %v15359_v6  ;;  %v15370_v12 = vand.u32 4294901760, %v85_v10  ;;  %90 = vmatpush1.msra.mxu0 %v15359_v6  ;;  %555 = vmatpush1.msra.mxu1 %v15364_v9  ;;  %v637_v15 = vsub.f32 %v73_v7, %v15364_v9  ;;  %v15409_v38 = vand.u32 4294901760, %v78_v34  ;;  %v14100_v63 = vld [vmem:[%s18117_s3 + $0x10] sm:$0xff]  ;;  %v82_v2 = vld [vmem:[#allocation7 + $0x18] sm:$0xff]  ;;  %s15263_s3 = smov 64   ;;  %s14086_s21 = sshll.u32 %s15265_s1, 4  ;;  %s14087_s21 = int_to_ptr.vmem [resolvable:$true] %s14086_s21 }
  0x3b   :  { %v167_v17 = vand.u32 4294901760, %v166_v13  ;;  %v632_v18 = vand.u32 4294901760, %v631_v14  ;;  %v15413_v40 = vand.u32 4294901760, %v1018_v35  ;;  %v15416_v41 = vand.u32 4294901760, %v75_v36  ;;  %v81_v7 = vld [vmem:[#allocation7 + $0x10] sm:$0xff]  ;;  %p15234_p11 = scmp.lt.s32.totalorder %s14087_s21, %s14087_s21 }
  0x3c   :  { %18355 = vst [vmem:[#allocation12_spill] sm:$0xff] %v15370_v12  ;;  %v15378_v16 = vsub.f32 %v85_v10, %v15370_v12  ;;  %v173_v19 = vand.u32 4294901760, %v172_v11  ;;  %v638_v20 = vand.u32 4294901760, %v637_v15  ;;  %v15419_v42 = vand.u32 4294901760, %v77_v39 }
  0x3d   :  { %v168_v22 = vsub.f32 %v166_v13, %v167_v17  ;;  %v633_v23 = vsub.f32 %v631_v14, %v632_v18  ;;  %18359 = vst [vmem:[#allocation16_spill] sm:$0xff] %v15413_v40  ;;  %v1099_v43 = vsub.f32 %v76_v33, %v15407_v37  ;;  %v1564_v44 = vsub.f32 %v78_v34, %v15409_v38 }
  0x3e   :  { %18356 = vst [vmem:[#allocation13_spill] sm:$0xff] %v15378_v16  ;;  %v15381_v21 = vand.u32 4294901760, %v15378_v16  ;;  %v174_v24 = vsub.f32 %v172_v11, %v173_v19  ;;  %v639_v25 = vsub.f32 %v637_v15, %v638_v20  ;;  %v15426_v45 = vsub.f32 %v1018_v35, %v15413_v40 }
  0x3f   :  { %v169_v27 = vand.u32 4294901760, %v168_v22  ;;  %v634_v28 = vand.u32 4294901760, %v633_v23  ;;  %v15429_v46 = vsub.f32 %v75_v36, %v15416_v41  ;;  %v15432_v47 = vsub.f32 %v77_v39, %v15419_v42 }
  0x40   :  { %18357 = vst [vmem:[#allocation14_spill] sm:$0xff] %v15381_v21  ;;  %v157_v26 = vsub.f32 %v15378_v16, %v15381_v21  ;;  %v175_v29 = vand.u32 4294901760, %v174_v24  ;;  %v640_v31 = vand.u32 4294901760, %v639_v25  ;;  %18360 = vst [vmem:[#allocation17_spill] sm:$0xff] %v15426_v45  ;;  %v1100_v48 = vand.u32 4294901760, %v1099_v43 }
  0x41   :  { %170 = vmatprep.subr.mxu0 %v169_v27  ;;  %635 = vmatprep.subr.mxu1 %v634_v28  ;;  %v1565_v49 = vand.u32 4294901760, %v1564_v44  ;;  %v15437_v50 = vand.u32 4294901760, %v15426_v45  ;;  %v1106_v51 = vand.u32 4294901760, %v15429_v46  ;;  %v1571_v52 = vand.u32 4294901760, %v15432_v47 }
  0x42   :  { %v15385_v30 = vand.u32 4294901760, %v157_v26  ;;  %v1101_v53 = vsub.f32 %v1099_v43, %v1100_v48  ;;  %v1974_v3 = vsel %vm83_vm0, %v14100_v63, 0  ;;  %v15493_v10 = vand.u32 4294901760, %v81_v7 }
  0x43   :  { %18361 = vst [vmem:[#allocation18_spill] sm:$0xff] %v15437_v50  ;;  %v1566_v54 = vsub.f32 %v1564_v44, %v1565_v49  ;;  %v1090_v55 = vsub.f32 %v15426_v45, %v15437_v50  ;;  %v1107_v56 = vsub.f32 %v15429_v46, %v1106_v51  ;;  %v1572_v57 = vsub.f32 %v15432_v47, %v1571_v52 }
  0x44   :  { %18358 = vst [vmem:[#allocation15_spill] sm:$0xff] %v15385_v30  ;;  %159 = vmatmul.mubr.f32.vlgmr.msra.gmra.mrb[0].mxu0 %v15385_v30  ;;  %624 = vmatmul.mubr.f32.vlgmr.msra.gmra.mrb[0].mxu1 %v15385_v30  ;;  %v1102_v58 = vand.u32 4294901760, %v1101_v53  ;;  %v15487_v8 = vand.u32 4294901760, %v1974_v3 }
  0x45   :  { %176 = vmatpush1.msra.mxu0 %v175_v29  ;;  %239 = vmatprep.mubr.f32.mxu0 %v18121_v0  ;;  %v1567_v59 = vand.u32 4294901760, %v1566_v54  ;;  %v15453_v60 = vand.u32 4294901760, %v1090_v55  ;;  %v1108_v61 = vand.u32 4294901760, %v1107_v56  ;;  %v1573_v62 = vand.u32 4294901760, %v1572_v57 }
  0x46   :  { %641 = vmatpush1.msra.mxu1 %v640_v31  ;;  %704 = vmatprep.mubr.f32.mxu1 %v18121_v0  ;;  %18363 = vst [vmem:[#allocation20_spill] sm:$0xff] %v15487_v8 }
  0x47   :  { %249 = vmatprep.subr.mxu0 %v166_v13  ;;  %714 = vmatprep.subr.mxu1 %v631_v14  ;;  %18362 = vst [vmem:[#allocation19_spill] sm:$0xff] %v15453_v60  ;;  %v15500_v14 = vsub.f32 %v1974_v3, %v15487_v8 }
  0x49   :  { %18364 = vst [vmem:[#allocation21_spill] sm:$0xff] %v15500_v14 }
  0x4c   :  { %241 = vmatmul.mubr.f32.vlgmr.msra.gmra.mrb[0].mxu0 %v15370_v12  ;;  %706 = vmatmul.mubr.f32.vlgmr.msra.gmra.mrb[0].mxu1 %v15370_v12 }
  0x4d   :  { %252 = vmatpush1.msra.mxu0 %v172_v11  ;;  %315 = vmatprep.mubr.f32.mxu0 %v18121_v0 }
  0x4e   :  { %717 = vmatpush1.msra.mxu1 %v637_v15  ;;  %780 = vmatprep.mubr.f32.mxu1 %v18121_v0 }
  0x4f   :  { %325 = vmatprep.subr.mxu0 %v15355_v4  ;;  %790 = vmatprep.subr.mxu1 %v15357_v5 }
  0x54   :  { %318 = vmatmul.mubr.f32.vlgmr.msra.gmra.mrb[0].mxu0 %v15378_v16  ;;  %783 = vmatmul.mubr.f32.vlgmr.msra.gmra.mrb[0].mxu1 %v15378_v16 }
  0x55   :  { %327 = vmatpush1.msra.mxu0 %v15359_v6  ;;  %390 = vmatprep.mubr.f32.mxu0 %v18121_v0 }
  0x56   :  { %792 = vmatpush1.msra.mxu1 %v15364_v9  ;;  %855 = vmatprep.mubr.f32.mxu1 %v18121_v0 }
  0x57   :  { %403 = vmatprep.subr.mxu0 %v167_v17  ;;  %868 = vmatprep.subr.mxu1 %v632_v18  ;;  %v2526_v17 = vsub.f32 %v81_v7, %v15493_v10 }
  0x59   :  { %v2527_v23 = vand.u32 4294901760, %v2526_v17 }
  0x5b   :  { %v2528_v28 = vsub.f32 %v2526_v17, %v2527_v23 }
  0x5c   :  { %394 = vmatmul.mubr.f32.vlgmr.msra.gmra.mrb[0].mxu0 %v15381_v21  ;;  %859 = vmatmul.mubr.f32.vlgmr.msra.gmra.mrb[0].mxu1 %v15381_v21 }
  0x5d   :  { %407 = vmatpush1.msra.mxu0 %v173_v19  ;;  %470 = vmatprep.mubr.f32.mxu0 %v18121_v0  ;;  %v2529_v34 = vand.u32 4294901760, %v2528_v28 }
  0x5e   :  { %872 = vmatpush1.msra.mxu1 %v638_v20  ;;  %935 = vmatprep.mubr.f32.mxu1 %v18121_v0  ;;  %v15507_v20 = vand.u32 4294901760, %v15500_v14 }
  0x5f   :  { %479 = vmatprep.subr.mxu0 %v15355_v4  ;;  %944 = vmatprep.subr.mxu1 %v15357_v5  ;;  %v79_v4 = vld [vmem:[#allocation7] sm:$0xff]  ;;  %v15481_v5 = vand.u32 4294901760, %v80_v1 }
  0x60   :  { %18365 = vst [vmem:[#allocation22_spill] sm:$0xff] %v15507_v20  ;;  %v2046_v26 = vsub.f32 %v15500_v14, %v15507_v20 }
  0x61   :  { %v2055_v11 = vsub.f32 %v80_v1, %v15481_v5 }
  0x62   :  { %v15519_v32 = vand.u32 4294901760, %v2046_v26 }
  0x63   :  { %v2056_v18 = vand.u32 4294901760, %v2055_v11 }
  0x64   :  { %472 = vmatmul.mubr.f32.vlgmr.msra.gmra.mrb[0].mxu0 %v15370_v12  ;;  %937 = vmatmul.mubr.f32.vlgmr.msra.gmra.mrb[0].mxu1 %v15370_v12  ;;  %18366 = vst [vmem:[#allocation23_spill] sm:$0xff] %v15519_v32 }
  0x65   :  { %481 = vmatpush1.msra.mxu0 %v15359_v6  ;;  %544 = vmatprep.mubr.f32.mxu0 %v18121_v0  ;;  %v15483_v6 = vand.u32 4294901760, %v82_v2  ;;  %v2057_v24 = vsub.f32 %v2055_v11, %v2056_v18 }
  0x66   :  { %946 = vmatpush1.msra.mxu1 %v15364_v9  ;;  %1009 = vmatprep.mubr.f32.mxu1 %v18121_v0  ;;  %v15490_v9 = vand.u32 4294901760, %v79_v4 }
  0x67   :  { %1021 = vmatprep.subr.mxu0 %v15407_v37  ;;  %1486 = vmatprep.subr.mxu1 %v15409_v38  ;;  %v2520_v13 = vsub.f32 %v82_v2, %v15483_v6  ;;  %v2058_v29 = vand.u32 4294901760, %v2057_v24 }
  0x68   :  { %v2061_v15 = vsub.f32 %v79_v4, %v15490_v9 }
  0x69   :  { %v2521_v19 = vand.u32 4294901760, %v2520_v13 }
  0x6a   :  { %v2062_v22 = vand.u32 4294901760, %v2061_v15 }
  0x6b   :  { %v2522_v25 = vsub.f32 %v2520_v13, %v2521_v19 }
  0x6c   :  { %546 = vmatmul.mubr.f32.vlgmr.msra.gmra.mrb[0].mxu0 %v15370_v12  ;;  %1011 = vmatmul.mubr.f32.vlgmr.msra.gmra.mrb[0].mxu1 %v15370_v12  ;;  %v2063_v27 = vsub.f32 %v2061_v15, %v2062_v22 }
  0x6d   :  { %1023 = vmatpush1.msra.mxu0 %v15416_v41  ;;  %1086 = vmatprep.mubr.f32.mxu0 %v18121_v0  ;;  %v2523_v31 = vand.u32 4294901760, %v2522_v25 }
  0x6e   :  { %1488 = vmatpush1.msra.mxu1 %v15419_v42  ;;  %1551 = vmatprep.mubr.f32.mxu1 %v18121_v0  ;;  %v2064_v33 = vand.u32 4294901760, %v2063_v27 }
  0x6f   :  { %1103 = vmatprep.subr.mxu0 %v1102_v58  ;;  %1568 = vmatprep.subr.mxu1 %v1567_v59 }
  0x70   :  { %1092 = vmatmul.mubr.f32.vlgmr.msra.gmra.mrb[2].mxu0 %v15453_v60  ;;  %1557 = vmatmul.mubr.f32.vlgmr.msra.gmra.mrb[2].mxu1 %v15453_v60 }
  0x71   :  { %1109 = vmatpush1.msra.mxu0 %v1108_v61  ;;  %1172 = vmatprep.mubr.f32.mxu0 %v18121_v0 }
  0x72   :  { %1574 = vmatpush1.msra.mxu1 %v1573_v62  ;;  %1637 = vmatprep.mubr.f32.mxu1 %v18121_v0 }
  0x73   :  { %1182 = vmatprep.subr.mxu0 %v1099_v43  ;;  %1647 = vmatprep.subr.mxu1 %v1564_v44 }
  0x78   :  { %1174 = vmatmul.mubr.f32.vlgmr.msra.gmra.mrb[2].mxu0 %v15413_v40  ;;  %1639 = vmatmul.mubr.f32.vlgmr.msra.gmra.mrb[2].mxu1 %v15413_v40 }
  0x79   :  { %1185 = vmatpush1.msra.mxu0 %v15429_v46  ;;  %1248 = vmatprep.mubr.f32.mxu0 %v18121_v0 }
  0x7a   :  { %1650 = vmatpush1.msra.mxu1 %v15432_v47  ;;  %1713 = vmatprep.mubr.f32.mxu1 %v18121_v0 }
  0x7b   :  { %1258 = vmatprep.subr.mxu0 %v15407_v37  ;;  %1723 = vmatprep.subr.mxu1 %v15409_v38 }
  0x80   :  { %1251 = vmatmul.mubr.f32.vlgmr.msra.gmra.mrb[2].mxu0 %v15426_v45  ;;  %1716 = vmatmul.mubr.f32.vlgmr.msra.gmra.mrb[2].mxu1 %v15426_v45 }
  0x81   :  { %1260 = vmatpush1.msra.mxu0 %v15416_v41  ;;  %1323 = vmatprep.mubr.f32.mxu0 %v18121_v0 }
  0x82   :  { %1725 = vmatpush1.msra.mxu1 %v15419_v42  ;;  %1788 = vmatprep.mubr.f32.mxu1 %v18121_v0 }
  0x83   :  { %1336 = vmatprep.subr.mxu0 %v1100_v48  ;;  %1801 = vmatprep.subr.mxu1 %v1565_v49 }
  0x88   :  { %1327 = vmatmul.mubr.f32.vlgmr.msra.gmra.mrb[2].mxu0 %v15437_v50  ;;  %1792 = vmatmul.mubr.f32.vlgmr.msra.gmra.mrb[2].mxu1 %v15437_v50 }
  0x89   :  { %1340 = vmatpush1.msra.mxu0 %v1106_v51  ;;  %1403 = vmatprep.mubr.f32.mxu0 %v18121_v0 }
  0x8a   :  { %1805 = vmatpush1.msra.mxu1 %v1571_v52  ;;  %1868 = vmatprep.mubr.f32.mxu1 %v18121_v0 }
  0x8b   :  { %1412 = vmatprep.subr.mxu0 %v15407_v37  ;;  %1877 = vmatprep.subr.mxu1 %v15409_v38 }
  0x90   :  { %1405 = vmatmul.mubr.f32.vlgmr.msra.gmra.mrb[2].mxu0 %v15413_v40  ;;  %1870 = vmatmul.mubr.f32.vlgmr.msra.gmra.mrb[2].mxu1 %v15413_v40 }
  0x91   :  { %1414 = vmatpush1.msra.mxu0 %v15416_v41  ;;  %1477 = vmatprep.mubr.f32.mxu0 %v18121_v0 }
  0x92   :  { %1879 = vmatpush1.msra.mxu1 %v15419_v42  ;;  %1942 = vmatprep.mubr.f32.mxu1 %v18121_v0 }
  0x93   :  { %1977 = vmatprep.subr.mxu0 %v15481_v5  ;;  %2442 = vmatprep.subr.mxu1 %v15483_v6 }
  0x98   :  { %1479 = vmatmul.mubr.f32.vlgmr.msra.gmra.mrb[2].mxu0 %v15413_v40  ;;  %1944 = vmatmul.mubr.f32.vlgmr.msra.gmra.mrb[2].mxu1 %v15413_v40 }
  0x99   :  { %1979 = vmatpush1.msra.mxu0 %v15490_v9  ;;  %2042 = vmatprep.mubr.f32.mxu0 %v18121_v0 }
  0x9a   :  { %2444 = vmatpush1.msra.mxu1 %v15493_v10  ;;  %2507 = vmatprep.mubr.f32.mxu1 %v18121_v0 }
  0x9b   :  { %2059 = vmatprep.subr.mxu0 %v2058_v29  ;;  %2524 = vmatprep.subr.mxu1 %v2523_v31 }
  0x9c   :  { %2048 = vmatmul.mubr.f32.vlgmr.msra.gmra.mrb[4].mxu0 %v15519_v32  ;;  %2513 = vmatmul.mubr.f32.vlgmr.msra.gmra.mrb[4].mxu1 %v15519_v32 }
  0x9d   :  { %2065 = vmatpush1.msra.mxu0 %v2064_v33  ;;  %2128 = vmatprep.mubr.f32.mxu0 %v18121_v0 }
  0x9e   :  { %2530 = vmatpush1.msra.mxu1 %v2529_v34  ;;  %2593 = vmatprep.mubr.f32.mxu1 %v18121_v0 }
  0x9f   :  { %2138 = vmatprep.subr.mxu0 %v2055_v11  ;;  %2603 = vmatprep.subr.mxu1 %v2520_v13 }
  0xa4   :  { %2130 = vmatmul.mubr.f32.vlgmr.msra.gmra.mrb[4].mxu0 %v15487_v8  ;;  %2595 = vmatmul.mubr.f32.vlgmr.msra.gmra.mrb[4].mxu1 %v15487_v8 }
  0xa5   :  { %2141 = vmatpush1.msra.mxu0 %v2061_v15  ;;  %2204 = vmatprep.mubr.f32.mxu0 %v18121_v0 }
  0xa6   :  { %2606 = vmatpush1.msra.mxu1 %v2526_v17  ;;  %2669 = vmatprep.mubr.f32.mxu1 %v18121_v0 }
  0xa7   :  { %2214 = vmatprep.subr.mxu0 %v15481_v5  ;;  %2679 = vmatprep.subr.mxu1 %v15483_v6 }
  0xac   :  { %2207 = vmatmul.mubr.f32.vlgmr.msra.gmra.mrb[4].mxu0 %v15500_v14  ;;  %2672 = vmatmul.mubr.f32.vlgmr.msra.gmra.mrb[4].mxu1 %v15500_v14 }
  0xad   :  { %2216 = vmatpush1.msra.mxu0 %v15490_v9  ;;  %2279 = vmatprep.mubr.f32.mxu0 %v18121_v0 }
  0xae   :  { %2681 = vmatpush1.msra.mxu1 %v15493_v10  ;;  %2744 = vmatprep.mubr.f32.mxu1 %v18121_v0 }
  0xaf   :  { %2292 = vmatprep.subr.mxu0 %v2056_v18  ;;  %2757 = vmatprep.subr.mxu1 %v2521_v19 }
  0xb4   :  { %2283 = vmatmul.mubr.f32.vlgmr.msra.gmra.mrb[4].mxu0 %v15507_v20  ;;  %2748 = vmatmul.mubr.f32.vlgmr.msra.gmra.mrb[4].mxu1 %v15507_v20 }
  0xb5   :  { %2296 = vmatpush1.msra.mxu0 %v2062_v22  ;;  %2359 = vmatprep.mubr.f32.mxu0 %v18121_v0 }
  0xb6   :  { %2761 = vmatpush1.msra.mxu1 %v2527_v23  ;;  %2824 = vmatprep.mubr.f32.mxu1 %v18121_v0 }
  0xb7   :  { %2368 = vmatprep.subr.mxu0 %v15481_v5  ;;  %2833 = vmatprep.subr.mxu1 %v15483_v6 }
  0xbc   :  { %2361 = vmatmul.mubr.f32.vlgmr.msra.gmra.mrb[4].mxu0 %v15487_v8  ;;  %2826 = vmatmul.mubr.f32.vlgmr.msra.gmra.mrb[4].mxu1 %v15487_v8 }
  0xbd   :  { %2370 = vmatpush1.msra.mxu0 %v15490_v9  ;;  %2835 = vmatpush1.msra.mxu1 %v15493_v10 }
  0xbe   :  { %2433 = vmatprep.mubr.f32.mxu0 %v18121_v0  ;;  %2898 = vmatprep.mubr.f32.mxu1 %v18121_v0 }
  0xc4   :  { %2435 = vmatmul.mubr.f32.vlgmr.msra.gmra.mrb[4].mxu0 %v15487_v8  ;;  %2900 = vmatmul.mubr.f32.vlgmr.msra.gmra.mrb[4].mxu1 %v15487_v8 }
  0xc5   :  { %3051 = vmatprep.mubr.f32.mxu0 %v18121_v0  ;;  %3859 = vmatprep.mubr.f32.mxu1 %v18121_v0 }
 0x13f   :  { %v547_v35 = vpop.f32.mrb[0].mxu0  ;;  %v1012_v36 = vpop.f32.mrb[0].mxu1 }
 0x140   :  { %v549_v37 = vpop.f32.mrb[1].mxu0  ;;  %v1014_v38 = vpop.f32.mrb[1].mxu1  ;;  %v15561_v42 = vand.u32 4294901760, %v547_v35  ;;  %v15563_v43 = vand.u32 4294901760, %v1012_v36 }
 0x141   :  { %v15557_v39 = vand.u32 4294901760, %v549_v37  ;;  %v15559_v41 = vand.u32 4294901760, %v1014_v38 }
 0x142   :  { %v15604_v13 = vsub.f32 %v547_v35, %v15561_v42  ;;  %v15607_v15 = vsub.f32 %v1012_v36, %v15563_v43 }
 0x143   :  { %v15566_v44 = vsub.f32 %v549_v37, %v15557_v39  ;;  %v15569_v46 = vsub.f32 %v1014_v38, %v15559_v41  ;;  %2986 = vmatprep.subr.mxu0 %v15557_v39  ;;  %3794 = vmatprep.subr.mxu1 %v15559_v41 }
 0x144   :  { %2988 = vmatpush1.msra.mxu0 %v15561_v42  ;;  %3796 = vmatpush1.msra.mxu1 %v15563_v43  ;;  %v3148_v22 = vand.u32 4294901760, %v15604_v13  ;;  %v3956_v23 = vand.u32 4294901760, %v15607_v15 }
 0x145   :  { %v3142_v47 = vand.u32 4294901760, %v15566_v44  ;;  %v3950_v48 = vand.u32 4294901760, %v15569_v46 }
 0x146   :  { %v3149_v29 = vsub.f32 %v15604_v13, %v3148_v22  ;;  %v3957_v31 = vsub.f32 %v15607_v15, %v3956_v23 }
 0x147   :  { %v3143_v49 = vsub.f32 %v15566_v44, %v3142_v47  ;;  %v3951_v51 = vsub.f32 %v15569_v46, %v3950_v48 }
 0x149   :  { %v3144_v52 = vand.u32 4294901760, %v3143_v49  ;;  %v3952_v53 = vand.u32 4294901760, %v3951_v51  ;;  %v3150_v51 = vand.u32 4294901760, %v3149_v29 }
 0x14b   :  { %3145 = vmatprep.subr.mxu0 %v3144_v52  ;;  %3953 = vmatprep.subr.mxu1 %v3952_v53  ;;  %v3958_v52 = vand.u32 4294901760, %v3957_v31 }
 0x16b   :  { %v1480_v54 = vpop.f32.mrb[2].mxu0  ;;  %v1945_v55 = vpop.f32.mrb[2].mxu1 }
 0x16c   :  { %1963 = vrot.lane.b32.xlu1 %v1945_v55, %s15263_s3  ;;  %v1947_v56 = vpop.f32.mrb[3].mxu1  ;;  %1951 = vrot.lane.b32.xlu0 %v1480_v54, %s15263_s3  ;;  %v1482_v57 = vpop.f32.mrb[3].mxu0 }
 0x170   :  { %1969 = vrot.lane.b32.xlu1 %v1947_v56, %s15263_s3  ;;  %1957 = vrot.lane.b32.xlu0 %v1482_v57, %s15263_s3 }
 0x197   :  { %v15587_v7 = vpop.f32.mrb[4].mxu0  ;;  %v15595_v10 = vpop.f32.mrb[4].mxu1 }
 0x198   :  { %2907 = vrot.lane.b32.xlu1 %v15587_v7, %s15263_s3  ;;  %v15591_v9 = vpop.f32.mrb[5].mxu0  ;;  %v15599_v11 = vpop.f32.mrb[5].mxu1 }
 0x19c   :  { %2913 = vrot.lane.b32.xlu1 %v15591_v9, %s15263_s3 }
 0x1a0   :  { %2919 = vrot.lane.b32.xlu1 %v15595_v10, %s15263_s3 }
 0x1a4   :  { %2925 = vrot.lane.b32.xlu1 %v15599_v11, %s15263_s3 }
 0x1de   :  { %v1952_v58 = vpop.permute.xlu0 %1951  ;;  %v1964_v1 = vpop.permute.xlu1 %1963 }
 0x1df   :  { %v1954_v59 = vmax.f32 %v1480_v54, %v1952_v58 }
 0x1e1   :  { %v1955_v61 = vmax.f32 %v1954_v59, %v1482_v57 }
 0x1e2   :  { %v1958_v62 = vpop.permute.xlu0 %1957  ;;  %v1970_v5 = vpop.permute.xlu1 %1969 }
 0x1e3   :  { %v1960_v63 = vmax.f32 %v1955_v61, %v1958_v62 }
 0x1e5   :  { %v1961_v2 = vmax.f32 %v1960_v63, %v1945_v55 }
 0x1e7   :  { %v1966_v3 = vmax.f32 %v1961_v2, %v1964_v1 }
 0x1e9   :  { %v1967_v4 = vmax.f32 %v1966_v3, %v1947_v56 }
 0x1eb   :  { %v1972_v6 = vmax.f32 %v1967_v4, %v1970_v5 }
 0x1ed   :  { %2929 = vxpose.xlu0.b32.start.end [1/1] (short) (narrow) %v1972_v6, 64 }
 0x26d   :  { %v2945_v17 = vpop.trf.xlu0 }
 0x26e   :  { %v2962_v18 = vsel %vm83_vm0, %v2945_v17, 0 }
 0x26f   :  { %v15610_v19 = vand.u32 4294901760, %v2962_v18 }
 0x271   :  { %v15615_v24 = vsub.f32 %v2962_v18, %v15610_v19  ;;  %v2946_v25 = vpop.trf.xlu0 }
 0x272   :  { %v2965_v26 = vsel %vm83_vm0, %v2946_v25, 0 }
 0x273   :  { %v15619_v27 = vand.u32 4294901760, %v15615_v24  ;;  %v15621_v28 = vand.u32 4294901760, %v2965_v26 }
 0x275   :  { %v15630_v33 = vsub.f32 %v2965_v26, %v15621_v28  ;;  %v2947_v34 = vpop.trf.xlu0  ;;  %v3055_v35 = vsub.f32 %v15615_v24, %v15619_v27 }
 0x276   :  { %v2968_v36 = vsel %vm83_vm0, %v2947_v34, 0 }
 0x277   :  { %v15635_v37 = vand.u32 4294901760, %v2968_v36  ;;  %v3056_v38 = vand.u32 4294901760, %v3055_v35  ;;  %v15638_v49 = vand.u32 4294901760, %v15630_v33 }
 0x279   :  { %v15641_v53 = vsub.f32 %v2968_v36, %v15635_v37  ;;  %3057 = vmatmul.mubr.f32.vlgmr.msra.gmra.mrb[6].mxu0 %v3056_v38  ;;  %3865 = vmatmul.mubr.f32.vlgmr.msra.gmra.mrb[6].mxu1 %v3056_v38  ;;  %v2948_v54 = vpop.trf.xlu0  ;;  %v3066_v55 = vsub.f32 %v15630_v33, %v15638_v49 }
 0x27a   :  { %3151 = vmatpush1.msra.mxu0 %v3150_v51  ;;  %3959 = vmatpush1.msra.mxu1 %v3958_v52  ;;  %v2971_v56 = vsel %vm83_vm0, %v2948_v54, 0 }
 0x27b   :  { %v15646_v57 = vand.u32 4294901760, %v2971_v56  ;;  %3273 = vmatprep.subr.mxu0 %v15566_v44  ;;  %4081 = vmatprep.subr.mxu1 %v15569_v46  ;;  %v3067_v58 = vand.u32 4294901760, %v3066_v55  ;;  %v15651_v59 = vand.u32 4294901760, %v15641_v53 }
 0x27c   :  { %3062 = vmatprep.mubr.f32.mxu0 %v18121_v0  ;;  %3870 = vmatprep.mubr.f32.mxu1 %v18121_v0 }
 0x27d   :  { %v15656_v61 = vsub.f32 %v2971_v56, %v15646_v57  ;;  %3068 = vmatmul.mubr.f32.gmra.mrb[8].mxu0 %v3067_v58  ;;  %3876 = vmatmul.mubr.f32.gmra.mrb[8].mxu1 %v3067_v58  ;;  %v2949_v62 = vpop.trf.xlu0  ;;  %v3077_v63 = vsub.f32 %v15641_v53, %v15651_v59 }
 0x27e   :  { %v2974_v1 = vsel %vm83_vm0, %v2949_v62, 0  ;;  %3073 = vmatprep.mubr.f32.mxu0 %v18121_v0  ;;  %3881 = vmatprep.mubr.f32.mxu1 %v18121_v0 }
 0x27f   :  { %v15663_v2 = vand.u32 4294901760, %v2974_v1  ;;  %v3078_v3 = vand.u32 4294901760, %v3077_v63  ;;  %v15666_v4 = vand.u32 4294901760, %v15656_v61 }
 0x281   :  { %v15669_v5 = vsub.f32 %v2974_v1, %v15663_v2  ;;  %3079 = vmatmul.mubr.f32.gmra.mrb[10].mxu0 %v3078_v3  ;;  %3887 = vmatmul.mubr.f32.gmra.mrb[10].mxu1 %v3078_v3  ;;  %v2950_v6 = vpop.trf.xlu0  ;;  %v3088_v17 = vsub.f32 %v15656_v61, %v15666_v4 }
 0x282   :  { %v2977_v18 = vsel %vm83_vm0, %v2950_v6, 0  ;;  %3084 = vmatprep.mubr.f32.mxu0 %v18121_v0  ;;  %3892 = vmatprep.mubr.f32.mxu1 %v18121_v0 }
 0x283   :  { %v15676_v25 = vand.u32 4294901760, %v2977_v18  ;;  %v3089_v26 = vand.u32 4294901760, %v3088_v17  ;;  %v15679_v29 = vand.u32 4294901760, %v15669_v5 }
 0x285   :  { %v15682_v31 = vsub.f32 %v2977_v18, %v15676_v25  ;;  %3090 = vmatmul.mubr.f32.gmra.mrb[12].mxu0 %v3089_v26  ;;  %3898 = vmatmul.mubr.f32.gmra.mrb[12].mxu1 %v3089_v26  ;;  %v2951_v34 = vpop.trf.xlu0  ;;  %v3099_v35 = vsub.f32 %v15669_v5, %v15679_v29 }
 0x286   :  { %v2980_v36 = vsel %vm83_vm0, %v2951_v34, 0  ;;  %3095 = vmatprep.mubr.f32.mxu0 %v18121_v0  ;;  %3903 = vmatprep.mubr.f32.mxu1 %v18121_v0 }
 0x287   :  { %v15689_v38 = vand.u32 4294901760, %v2980_v36  ;;  %v3100_v51 = vand.u32 4294901760, %v3099_v35  ;;  %v15692_v52 = vand.u32 4294901760, %v15682_v31  ;;  %v2908_v35 = vpop.permute.xlu1 %2907 }
 0x289   :  { %v15695_v54 = vsub.f32 %v2980_v36, %v15689_v38  ;;  %3101 = vmatmul.mubr.f32.gmra.mrb[14].mxu0 %v3100_v51  ;;  %3909 = vmatmul.mubr.f32.gmra.mrb[14].mxu1 %v3100_v51  ;;  %v2952_v55 = vpop.trf.xlu0  ;;  %v3110_v56 = vsub.f32 %v15682_v31, %v15692_v52  ;;  %v2910_v36 = vmax.f32 %v15587_v7, %v2908_v35 }
 0x28a   :  { %v2983_v58 = vsel %vm83_vm0, %v2952_v55, 0  ;;  %3106 = vmatprep.mubr.f32.mxu0 %v18121_v0  ;;  %3914 = vmatprep.mubr.f32.mxu1 %v18121_v0 }
 0x28b   :  { %v15702_v62 = vand.u32 4294901760, %v2983_v58  ;;  %v3111_v63 = vand.u32 4294901760, %v3110_v56  ;;  %v15705_v1 = vand.u32 4294901760, %v15695_v54  ;;  %v2914_v51 = vpop.permute.xlu1 %2913  ;;  %v2911_v55 = vmax.f32 %v2910_v36, %v15591_v9 }
 0x28d   :  { %v15708_v3 = vsub.f32 %v2983_v58, %v15702_v62  ;;  %3112 = vmatmul.mubr.f32.gmra.mrb[16].mxu0 %v3111_v63  ;;  %3920 = vmatmul.mubr.f32.gmra.mrb[16].mxu1 %v3111_v63  ;;  %v3121_v6 = vsub.f32 %v15695_v54, %v15705_v1  ;;  %v2916_v7 = vmax.f32 %v2911_v55, %v2914_v51 }
 0x28e   :  { %3117 = vmatprep.mubr.f32.mxu0 %v18121_v0  ;;  %3925 = vmatprep.mubr.f32.mxu1 %v18121_v0 }
 0x28f   :  { %v3122_v17 = vand.u32 4294901760, %v3121_v6  ;;  %v15715_v18 = vand.u32 4294901760, %v15708_v3  ;;  %v2920_v56 = vpop.permute.xlu1 %2919  ;;  %v2917_v58 = vmax.f32 %v2916_v7, %v15595_v10 }
 0x291   :  { %3123 = vmatmul.mubr.f32.gmra.mrb[18].mxu0 %v3122_v17  ;;  %3931 = vmatmul.mubr.f32.gmra.mrb[18].mxu1 %v3122_v17  ;;  %v3132_v26 = vsub.f32 %v15708_v3, %v15715_v18  ;;  %v2922_v63 = vmax.f32 %v2917_v58, %v2920_v56 }
 0x292   :  { %3128 = vmatprep.mubr.f32.mxu0 %v18121_v0  ;;  %3936 = vmatprep.mubr.f32.mxu1 %v18121_v0 }
 0x293   :  { %v3133_v34 = vand.u32 4294901760, %v3132_v26  ;;  %v15745_v9 = vmax.f32 %v2922_v63, %v15599_v11 }
 0x295   :  { %3134 = vmatmul.mubr.f32.gmra.mrb[20].mxu0 %v3133_v34  ;;  %3942 = vmatmul.mubr.f32.gmra.mrb[20].mxu1 %v3133_v34 }
 0x296   :  { %3214 = vmatprep.mubr.f32.mxu0 %v18121_v0  ;;  %4022 = vmatprep.mubr.f32.mxu1 %v18121_v0 }
 0x299   :  { %3216 = vmatmul.mubr.f32.vlgmr.msra.gmra.mrb[6].mxu0 %v15610_v19  ;;  %4024 = vmatmul.mubr.f32.vlgmr.msra.gmra.mrb[6].mxu1 %v15610_v19 }
 0x29a   :  { %3276 = vmatpush1.msra.mxu0 %v15604_v13  ;;  %4084 = vmatpush1.msra.mxu1 %v15607_v15 }
 0x29b   :  { %3405 = vmatprep.subr.mxu0 %v15557_v39  ;;  %4213 = vmatprep.subr.mxu1 %v15559_v41 }
 0x29c   :  { %3221 = vmatprep.mubr.f32.mxu0 %v18121_v0  ;;  %4029 = vmatprep.mubr.f32.mxu1 %v18121_v0 }
 0x29d   :  { %3223 = vmatmul.mubr.f32.gmra.mrb[8].mxu0 %v15621_v28  ;;  %4031 = vmatmul.mubr.f32.gmra.mrb[8].mxu1 %v15621_v28 }
 0x29e   :  { %3228 = vmatprep.mubr.f32.mxu0 %v18121_v0  ;;  %4036 = vmatprep.mubr.f32.mxu1 %v18121_v0 }
 0x2a1   :  { %3230 = vmatmul.mubr.f32.gmra.mrb[10].mxu0 %v15635_v37  ;;  %4038 = vmatmul.mubr.f32.gmra.mrb[10].mxu1 %v15635_v37 }
 0x2a2   :  { %3235 = vmatprep.mubr.f32.mxu0 %v18121_v0  ;;  %4043 = vmatprep.mubr.f32.mxu1 %v18121_v0 }
 0x2a5   :  { %3237 = vmatmul.mubr.f32.gmra.mrb[12].mxu0 %v15646_v57  ;;  %4045 = vmatmul.mubr.f32.gmra.mrb[12].mxu1 %v15646_v57 }
 0x2a6   :  { %3242 = vmatprep.mubr.f32.mxu0 %v18121_v0  ;;  %4050 = vmatprep.mubr.f32.mxu1 %v18121_v0 }
 0x2a9   :  { %3244 = vmatmul.mubr.f32.gmra.mrb[14].mxu0 %v15663_v2  ;;  %4052 = vmatmul.mubr.f32.gmra.mrb[14].mxu1 %v15663_v2 }
 0x2aa   :  { %3249 = vmatprep.mubr.f32.mxu0 %v18121_v0  ;;  %4057 = vmatprep.mubr.f32.mxu1 %v18121_v0 }
 0x2ad   :  { %3251 = vmatmul.mubr.f32.gmra.mrb[16].mxu0 %v15676_v25  ;;  %4059 = vmatmul.mubr.f32.gmra.mrb[16].mxu1 %v15676_v25 }
 0x2ae   :  { %3256 = vmatprep.mubr.f32.mxu0 %v18121_v0  ;;  %4064 = vmatprep.mubr.f32.mxu1 %v18121_v0 }
 0x2b1   :  { %3258 = vmatmul.mubr.f32.gmra.mrb[18].mxu0 %v15689_v38  ;;  %4066 = vmatmul.mubr.f32.gmra.mrb[18].mxu1 %v15689_v38 }
 0x2b2   :  { %3263 = vmatprep.mubr.f32.mxu0 %v18121_v0  ;;  %4071 = vmatprep.mubr.f32.mxu1 %v18121_v0 }
 0x2b5   :  { %3265 = vmatmul.mubr.f32.gmra.mrb[20].mxu0 %v15702_v62  ;;  %4073 = vmatmul.mubr.f32.gmra.mrb[20].mxu1 %v15702_v62 }
 0x2b6   :  { %3339 = vmatprep.mubr.f32.mxu0 %v18121_v0  ;;  %4147 = vmatprep.mubr.f32.mxu1 %v18121_v0 }
 0x2b9   :  { %3342 = vmatmul.mubr.f32.vlgmr.msra.gmra.mrb[6].mxu0 %v15615_v24  ;;  %4150 = vmatmul.mubr.f32.vlgmr.msra.gmra.mrb[6].mxu1 %v15615_v24 }
 0x2ba   :  { %3407 = vmatpush1.msra.mxu0 %v15561_v42  ;;  %4215 = vmatpush1.msra.mxu1 %v15563_v43 }
 0x2bb   :  { %3546 = vmatprep.subr.mxu0 %v3142_v47  ;;  %4354 = vmatprep.subr.mxu1 %v3950_v48 }
 0x2bc   :  { %3347 = vmatprep.mubr.f32.mxu0 %v18121_v0  ;;  %4155 = vmatprep.mubr.f32.mxu1 %v18121_v0 }
 0x2bd   :  { %3350 = vmatmul.mubr.f32.gmra.mrb[8].mxu0 %v15630_v33  ;;  %4158 = vmatmul.mubr.f32.gmra.mrb[8].mxu1 %v15630_v33 }
 0x2be   :  { %3355 = vmatprep.mubr.f32.mxu0 %v18121_v0  ;;  %4163 = vmatprep.mubr.f32.mxu1 %v18121_v0 }
 0x2c1   :  { %3358 = vmatmul.mubr.f32.gmra.mrb[10].mxu0 %v15641_v53  ;;  %4166 = vmatmul.mubr.f32.gmra.mrb[10].mxu1 %v15641_v53 }
 0x2c2   :  { %3363 = vmatprep.mubr.f32.mxu0 %v18121_v0  ;;  %4171 = vmatprep.mubr.f32.mxu1 %v18121_v0 }
 0x2c5   :  { %3366 = vmatmul.mubr.f32.gmra.mrb[12].mxu0 %v15656_v61  ;;  %4174 = vmatmul.mubr.f32.gmra.mrb[12].mxu1 %v15656_v61 }
 0x2c6   :  { %3371 = vmatprep.mubr.f32.mxu0 %v18121_v0  ;;  %4179 = vmatprep.mubr.f32.mxu1 %v18121_v0 }
 0x2c9   :  { %3374 = vmatmul.mubr.f32.gmra.mrb[14].mxu0 %v15669_v5  ;;  %4182 = vmatmul.mubr.f32.gmra.mrb[14].mxu1 %v15669_v5 }
 0x2ca   :  { %3379 = vmatprep.mubr.f32.mxu0 %v18121_v0  ;;  %4187 = vmatprep.mubr.f32.mxu1 %v18121_v0 }
 0x2cd   :  { %3382 = vmatmul.mubr.f32.gmra.mrb[16].mxu0 %v15682_v31  ;;  %4190 = vmatmul.mubr.f32.gmra.mrb[16].mxu1 %v15682_v31 }
 0x2ce   :  { %3387 = vmatprep.mubr.f32.mxu0 %v18121_v0  ;;  %4195 = vmatprep.mubr.f32.mxu1 %v18121_v0 }
 0x2d1   :  { %3390 = vmatmul.mubr.f32.gmra.mrb[18].mxu0 %v15695_v54  ;;  %4198 = vmatmul.mubr.f32.gmra.mrb[18].mxu1 %v15695_v54 }
 0x2d2   :  { %3395 = vmatprep.mubr.f32.mxu0 %v18121_v0  ;;  %4203 = vmatprep.mubr.f32.mxu1 %v18121_v0 }
 0x2d5   :  { %3398 = vmatmul.mubr.f32.gmra.mrb[20].mxu0 %v15708_v3  ;;  %4206 = vmatmul.mubr.f32.gmra.mrb[20].mxu1 %v15708_v3 }
 0x2d6   :  { %3470 = vmatprep.mubr.f32.mxu0 %v18121_v0  ;;  %4278 = vmatprep.mubr.f32.mxu1 %v18121_v0 }
 0x2d9   :  { %3474 = vmatmul.mubr.f32.vlgmr.msra.gmra.mrb[6].mxu0 %v15619_v27  ;;  %4282 = vmatmul.mubr.f32.vlgmr.msra.gmra.mrb[6].mxu1 %v15619_v27 }
 0x2da   :  { %3550 = vmatpush1.msra.mxu0 %v3148_v22  ;;  %4358 = vmatpush1.msra.mxu1 %v3956_v23 }
 0x2db   :  { %3671 = vmatprep.subr.mxu0 %v15557_v39  ;;  %4479 = vmatprep.subr.mxu1 %v15559_v41 }
 0x2dc   :  { %3479 = vmatprep.mubr.f32.mxu0 %v18121_v0  ;;  %4287 = vmatprep.mubr.f32.mxu1 %v18121_v0 }
 0x2dd   :  { %3483 = vmatmul.mubr.f32.gmra.mrb[8].mxu0 %v15638_v49  ;;  %4291 = vmatmul.mubr.f32.gmra.mrb[8].mxu1 %v15638_v49 }
 0x2de   :  { %3488 = vmatprep.mubr.f32.mxu0 %v18121_v0  ;;  %4296 = vmatprep.mubr.f32.mxu1 %v18121_v0 }
 0x2e1   :  { %3492 = vmatmul.mubr.f32.gmra.mrb[10].mxu0 %v15651_v59  ;;  %4300 = vmatmul.mubr.f32.gmra.mrb[10].mxu1 %v15651_v59 }
 0x2e2   :  { %3497 = vmatprep.mubr.f32.mxu0 %v18121_v0  ;;  %4305 = vmatprep.mubr.f32.mxu1 %v18121_v0 }
 0x2e5   :  { %3501 = vmatmul.mubr.f32.gmra.mrb[12].mxu0 %v15666_v4  ;;  %4309 = vmatmul.mubr.f32.gmra.mrb[12].mxu1 %v15666_v4 }
 0x2e6   :  { %3506 = vmatprep.mubr.f32.mxu0 %v18121_v0  ;;  %4314 = vmatprep.mubr.f32.mxu1 %v18121_v0 }
 0x2e9   :  { %3510 = vmatmul.mubr.f32.gmra.mrb[14].mxu0 %v15679_v29  ;;  %4318 = vmatmul.mubr.f32.gmra.mrb[14].mxu1 %v15679_v29 }
 0x2ea   :  { %3515 = vmatprep.mubr.f32.mxu0 %v18121_v0  ;;  %4323 = vmatprep.mubr.f32.mxu1 %v18121_v0 }
 0x2ed   :  { %3519 = vmatmul.mubr.f32.gmra.mrb[16].mxu0 %v15692_v52  ;;  %4327 = vmatmul.mubr.f32.gmra.mrb[16].mxu1 %v15692_v52 }
 0x2ee   :  { %3524 = vmatprep.mubr.f32.mxu0 %v18121_v0  ;;  %4332 = vmatprep.mubr.f32.mxu1 %v18121_v0 }
 0x2f1   :  { %3528 = vmatmul.mubr.f32.gmra.mrb[18].mxu0 %v15705_v1  ;;  %4336 = vmatmul.mubr.f32.gmra.mrb[18].mxu1 %v15705_v1 }
 0x2f2   :  { %3533 = vmatprep.mubr.f32.mxu0 %v18121_v0  ;;  %4341 = vmatprep.mubr.f32.mxu1 %v18121_v0 }
 0x2f5   :  { %3537 = vmatmul.mubr.f32.gmra.mrb[20].mxu0 %v15715_v18  ;;  %4345 = vmatmul.mubr.f32.gmra.mrb[20].mxu1 %v15715_v18 }
 0x2f6   :  { %3613 = vmatprep.mubr.f32.mxu0 %v18121_v0  ;;  %4421 = vmatprep.mubr.f32.mxu1 %v18121_v0 }
 0x2f9   :  { %3615 = vmatmul.mubr.f32.vlgmr.msra.gmra.mrb[6].mxu0 %v15610_v19  ;;  %4423 = vmatmul.mubr.f32.vlgmr.msra.gmra.mrb[6].mxu1 %v15610_v19 }
 0x2fa   :  { %3673 = vmatpush1.msra.mxu0 %v15561_v42  ;;  %4481 = vmatpush1.msra.mxu1 %v15563_v43 }
 0x2fb   :  { %3620 = vmatprep.mubr.f32.mxu0 %v18121_v0  ;;  %4428 = vmatprep.mubr.f32.mxu1 %v18121_v0 }
 0x2fd   :  { %3622 = vmatmul.mubr.f32.gmra.mrb[8].mxu0 %v15621_v28  ;;  %4430 = vmatmul.mubr.f32.gmra.mrb[8].mxu1 %v15621_v28 }
 0x2fe   :  { %3627 = vmatprep.mubr.f32.mxu0 %v18121_v0  ;;  %4435 = vmatprep.mubr.f32.mxu1 %v18121_v0 }
 0x301   :  { %3629 = vmatmul.mubr.f32.gmra.mrb[10].mxu0 %v15635_v37  ;;  %4437 = vmatmul.mubr.f32.gmra.mrb[10].mxu1 %v15635_v37 }
 0x302   :  { %3634 = vmatprep.mubr.f32.mxu0 %v18121_v0  ;;  %4442 = vmatprep.mubr.f32.mxu1 %v18121_v0 }
 0x305   :  { %3636 = vmatmul.mubr.f32.gmra.mrb[12].mxu0 %v15646_v57  ;;  %4444 = vmatmul.mubr.f32.gmra.mrb[12].mxu1 %v15646_v57 }
 0x306   :  { %3641 = vmatprep.mubr.f32.mxu0 %v18121_v0  ;;  %4449 = vmatprep.mubr.f32.mxu1 %v18121_v0 }
 0x309   :  { %3643 = vmatmul.mubr.f32.gmra.mrb[14].mxu0 %v15663_v2  ;;  %4451 = vmatmul.mubr.f32.gmra.mrb[14].mxu1 %v15663_v2 }
 0x30a   :  { %3648 = vmatprep.mubr.f32.mxu0 %v18121_v0  ;;  %4456 = vmatprep.mubr.f32.mxu1 %v18121_v0 }
 0x30d   :  { %3650 = vmatmul.mubr.f32.gmra.mrb[16].mxu0 %v15676_v25  ;;  %4458 = vmatmul.mubr.f32.gmra.mrb[16].mxu1 %v15676_v25 }
 0x30e   :  { %3655 = vmatprep.mubr.f32.mxu0 %v18121_v0  ;;  %4463 = vmatprep.mubr.f32.mxu1 %v18121_v0 }
 0x311   :  { %3657 = vmatmul.mubr.f32.gmra.mrb[18].mxu0 %v15689_v38  ;;  %4465 = vmatmul.mubr.f32.gmra.mrb[18].mxu1 %v15689_v38 }
 0x312   :  { %3662 = vmatprep.mubr.f32.mxu0 %v18121_v0  ;;  %4470 = vmatprep.mubr.f32.mxu1 %v18121_v0 }
 0x315   :  { %3664 = vmatmul.mubr.f32.gmra.mrb[20].mxu0 %v15702_v62  ;;  %4472 = vmatmul.mubr.f32.gmra.mrb[20].mxu1 %v15702_v62 }
 0x316   :  { %3736 = vmatprep.mubr.f32.mxu0 %v18121_v0  ;;  %4544 = vmatprep.mubr.f32.mxu1 %v18121_v0 }
 0x319   :  { %3738 = vmatmul.mubr.f32.vlgmr.msra.gmra.mrb[6].mxu0 %v15610_v19  ;;  %4546 = vmatmul.mubr.f32.vlgmr.msra.gmra.mrb[6].mxu1 %v15610_v19 }
 0x31a   :  { %3743 = vmatprep.mubr.f32.mxu0 %v18121_v0  ;;  %4551 = vmatprep.mubr.f32.mxu1 %v18121_v0 }
 0x31d   :  { %3745 = vmatmul.mubr.f32.gmra.mrb[8].mxu0 %v15621_v28  ;;  %4553 = vmatmul.mubr.f32.gmra.mrb[8].mxu1 %v15621_v28 }
 0x31e   :  { %3750 = vmatprep.mubr.f32.mxu0 %v18121_v0  ;;  %4558 = vmatprep.mubr.f32.mxu1 %v18121_v0 }
 0x321   :  { %3752 = vmatmul.mubr.f32.gmra.mrb[10].mxu0 %v15635_v37  ;;  %4560 = vmatmul.mubr.f32.gmra.mrb[10].mxu1 %v15635_v37 }
 0x322   :  { %3757 = vmatprep.mubr.f32.mxu0 %v18121_v0  ;;  %4565 = vmatprep.mubr.f32.mxu1 %v18121_v0 }
 0x325   :  { %3759 = vmatmul.mubr.f32.gmra.mrb[12].mxu0 %v15646_v57  ;;  %4567 = vmatmul.mubr.f32.gmra.mrb[12].mxu1 %v15646_v57 }
 0x326   :  { %3764 = vmatprep.mubr.f32.mxu0 %v18121_v0  ;;  %4572 = vmatprep.mubr.f32.mxu1 %v18121_v0 }
 0x329   :  { %3766 = vmatmul.mubr.f32.gmra.mrb[14].mxu0 %v15663_v2  ;;  %4574 = vmatmul.mubr.f32.gmra.mrb[14].mxu1 %v15663_v2 }
 0x32a   :  { %3771 = vmatprep.mubr.f32.mxu0 %v18121_v0  ;;  %4579 = vmatprep.mubr.f32.mxu1 %v18121_v0 }
 0x32d   :  { %3773 = vmatmul.mubr.f32.gmra.mrb[16].mxu0 %v15676_v25  ;;  %4581 = vmatmul.mubr.f32.gmra.mrb[16].mxu1 %v15676_v25  ;;  %v2926_v25 = vpop.permute.xlu1 %2925 }
 0x32e   :  { %3778 = vmatprep.mubr.f32.mxu0 %v18121_v0  ;;  %4586 = vmatprep.mubr.f32.mxu1 %v18121_v0  ;;  %v2928_v6 = vmax.f32 %v15745_v9, %v2926_v25 }
 0x330   :  { %v4803_v7 = vsel %vm4801_vm1, %v2928_v6, 0 }
 0x331   :  { %3780 = vmatmul.mubr.f32.gmra.mrb[18].mxu0 %v15689_v38  ;;  %4588 = vmatmul.mubr.f32.gmra.mrb[18].mxu1 %v15689_v38 }
 0x332   :  { %3785 = vmatprep.mubr.f32.mxu0 %v18121_v0  ;;  %4593 = vmatprep.mubr.f32.mxu1 %v18121_v0 }
 0x335   :  { %3787 = vmatmul.mubr.f32.gmra.mrb[20].mxu0 %v15702_v62  ;;  %4595 = vmatmul.mubr.f32.gmra.mrb[20].mxu1 %v15702_v62 }
 0x336   :  { %4885 = vmatprep.mubr.f32.mxu0 %v18121_v0  ;;  %5532 = vmatprep.mubr.f32.mxu1 %v18121_v0 }
 0x3ec   :  { %v15907_v39 = vpop.f32.mrb[6].mxu0  ;;  %v15909_v41 = vpop.f32.mrb[6].mxu1 }
 0x3ed   :  { %v15911_v42 = vpop.f32.mrb[7].mxu0  ;;  %v15913_v43 = vpop.f32.mrb[7].mxu1 }
 0x3f0   :  { %v15915_v44 = vpop.f32.mrb[8].mxu0  ;;  %v15917_v46 = vpop.f32.mrb[8].mxu1 }
 0x3f1   :  { %v4601_v47 = vmax.f32 %v15907_v39, %v15915_v44  ;;  %v4627_v48 = vmax.f32 %v15909_v41, %v15917_v46  ;;  %v15923_v10 = vpop.f32.mrb[9].mxu0  ;;  %v15925_v11 = vpop.f32.mrb[9].mxu1 }
 0x3f2   :  { %v4614_v13 = vmax.f32 %v15911_v42, %v15923_v10  ;;  %v4640_v15 = vmax.f32 %v15913_v43, %v15925_v11 }
 0x3f4   :  { %v15931_v19 = vpop.f32.mrb[10].mxu0  ;;  %v15933_v22 = vpop.f32.mrb[10].mxu1 }
 0x3f5   :  { %v4602_v23 = vmax.f32 %v4601_v47, %v15931_v19  ;;  %v4628_v24 = vmax.f32 %v4627_v48, %v15933_v22  ;;  %v15937_v27 = vpop.f32.mrb[11].mxu0  ;;  %v15939_v28 = vpop.f32.mrb[11].mxu1 }
 0x3f6   :  { %v4615_v33 = vmax.f32 %v4614_v13, %v15937_v27  ;;  %v4641_v37 = vmax.f32 %v4640_v15, %v15939_v28  ;;  %v15991_v13 = vand.u32 4294901760, %v4803_v7 }
 0x3f8   :  { %v15943_v49 = vpop.f32.mrb[12].mxu0  ;;  %v15945_v53 = vpop.f32.mrb[12].mxu1 }
 0x3f9   :  { %v4603_v57 = vmax.f32 %v4602_v23, %v15943_v49  ;;  %v4629_v59 = vmax.f32 %v4628_v24, %v15945_v53  ;;  %v15949_v61 = vpop.f32.mrb[13].mxu0  ;;  %v15951_v2 = vpop.f32.mrb[13].mxu1 }
 0x3fa   :  { %v4616_v4 = vmax.f32 %v4615_v33, %v15949_v61  ;;  %v4642_v5 = vmax.f32 %v4641_v37, %v15951_v2 }
 0x3fc   :  { %v15955_v29 = vpop.f32.mrb[14].mxu0  ;;  %v15957_v31 = vpop.f32.mrb[14].mxu1 }
 0x3fd   :  { %v4604_v38 = vmax.f32 %v4603_v57, %v15955_v29  ;;  %v4630_v52 = vmax.f32 %v4629_v59, %v15957_v31  ;;  %v15961_v54 = vpop.f32.mrb[15].mxu0  ;;  %v15963_v62 = vpop.f32.mrb[15].mxu1 }
 0x3fe   :  { %v4617_v1 = vmax.f32 %v4616_v4, %v15961_v54  ;;  %v4643_v3 = vmax.f32 %v4642_v5, %v15963_v62  ;;  %v15996_v5 = vsub.f32 %v4803_v7, %v15991_v13 }
 0x400   :  { %v15968_v17 = vpop.f32.mrb[16].mxu0  ;;  %v15970_v18 = vpop.f32.mrb[16].mxu1  ;;  %18367 = vst [vmem:[#allocation24_spill] sm:$0xff] %v15996_v5 }
 0x401   :  { %v4605_v26 = vmax.f32 %v4604_v38, %v15968_v17  ;;  %v4631_v34 = vmax.f32 %v4630_v52, %v15970_v18  ;;  %v15974_v35 = vpop.f32.mrb[17].mxu0  ;;  %v15976_v36 = vpop.f32.mrb[17].mxu1 }
 0x402   :  { %v4618_v51 = vmax.f32 %v4617_v1, %v15974_v35  ;;  %v4644_v55 = vmax.f32 %v4643_v3, %v15976_v36 }
 0x404   :  { %v15981_v56 = vpop.f32.mrb[18].mxu0  ;;  %v15983_v58 = vpop.f32.mrb[18].mxu1 }
 0x405   :  { %v4606_v63 = vmax.f32 %v4605_v26, %v15981_v56  ;;  %v4632_v9 = vmax.f32 %v4631_v34, %v15983_v58  ;;  %v15987_v47 = vpop.f32.mrb[19].mxu0  ;;  %v15989_v48 = vpop.f32.mrb[19].mxu1 }
 0x406   :  { %v4619_v15 = vmax.f32 %v4618_v51, %v15987_v47  ;;  %v4645_v23 = vmax.f32 %v4644_v55, %v15989_v48  ;;  %v15999_v51 = vand.u32 4294901760, %v15996_v5 }
 0x408   :  { %v3788_v24 = vpop.f32.mrb[20].mxu0  ;;  %v4596_v33 = vpop.f32.mrb[20].mxu1  ;;  %18368 = vst [vmem:[#allocation25_spill] sm:$0xff] %v15999_v51 }
 0x409   :  { %v4607_v37 = vmax.f32 %v4606_v63, %v3788_v24  ;;  %v4633_v57 = vmax.f32 %v4632_v9, %v4596_v33  ;;  %v3790_v59 = vpop.f32.mrb[21].mxu0  ;;  %v4598_v4 = vpop.f32.mrb[21].mxu1 }
 0x40a   :  { %v4620_v25 = vmax.f32 %v4619_v15, %v3790_v59  ;;  %v4646_v38 = vmax.f32 %v4645_v23, %v4598_v4  ;;  %v4889_v15 = vsub.f32 %v15996_v5, %v15999_v51 }
 0x40b   :  { %v4608_v52 = vrot.slane %v4607_v37, 4  ;;  %v4634_v1 = vrot.slane %v4633_v57, 4 }
 0x40c   :  { %v4621_v3 = vrot.slane %v4620_v25, 4  ;;  %v4647_v6 = vrot.slane %v4646_v38, 4 }
 0x40d   :  { %v4609_v26 = vmax.f32 %v4607_v37, %v4608_v52  ;;  %v4635_v34 = vmax.f32 %v4633_v57, %v4634_v1 }
 0x40e   :  { %v4622_v55 = vmax.f32 %v4620_v25, %v4621_v3  ;;  %v4648_v0 = vmax.f32 %v4646_v38, %v4647_v6  ;;  %v16011_v3 = vand.u32 4294901760, %v4889_v15 }
 0x40f   :  { %v4610_v63 = vrot.slane %v4609_v26, 2  ;;  %v4636_v9 = vrot.slane %v4635_v34, 2 }
 0x410   :  { %v4623_v20 = vrot.slane %v4622_v55, 2  ;;  %v4649_v14 = vrot.slane %v4648_v0, 2 }
 0x411   :  { %v4611_v8 = vmax.f32 %v4609_v26, %v4610_v63  ;;  %v4637_v7 = vmax.f32 %v4635_v34, %v4636_v9 }
 0x412   :  { %v4624_v23 = vmax.f32 %v4622_v55, %v4623_v20  ;;  %v4650_v32 = vmax.f32 %v4648_v0, %v4649_v14 }
 0x413   :  { %v4612_v50 = vrot.slane %v4611_v8, 1  ;;  %v4638_v45 = vrot.slane %v4637_v7, 1 }
 0x414   :  { %v4625_v37 = vrot.slane %v4624_v23, 1  ;;  %v4651_v57 = vrot.slane %v4650_v32, 1 }
 0x415   :  { %v16003_v52 = vmax.f32 %v4611_v8, %v4612_v50  ;;  %v16005_v1 = vmax.f32 %v4637_v7, %v4638_v45 }
 0x416   :  { %v16007_v25 = vmax.f32 %v4624_v23, %v4625_v37  ;;  %v16009_v38 = vmax.f32 %v4650_v32, %v4651_v57 }
 0x417   :  { %v4681_v6 = vsub.f32 %v3788_v24, %v16003_v52  ;;  %v4683_v26 = vsub.f32 %v4596_v33, %v16005_v1  ;;  %v4653_v0 = vsub.f32 %v15907_v39, %v16003_v52  ;;  %v4657_v14 = vsub.f32 %v15915_v44, %v16003_v52 }
 0x418   :  { %v4682_v50 = vsub.f32 %v3790_v59, %v16007_v25  ;;  %v4684_v45 = vsub.f32 %v4598_v4, %v16009_v38  ;;  %v4654_v8 = vsub.f32 %v15911_v42, %v16007_v25  ;;  %v4658_v20 = vsub.f32 %v15923_v10, %v16007_v25 }
 0x419   :  { %v4741_v32 = vmul.f32 1.442695, %v4681_v6  ;;  %v4745_v24 = vmul.f32 1.442695, %v4683_v26  ;;  %v4656_v33 = vsub.f32 %v15913_v43, %v16009_v38  ;;  %v4660_v39 = vsub.f32 %v15925_v11, %v16009_v38 }
 0x41a   :  { %v4743_v34 = vmul.f32 1.442695, %v4682_v50  ;;  %v4747_v44 = vmul.f32 1.442695, %v4684_v45  ;;  %v4687_v55 = vmul.f32 1.442695, %v4654_v8  ;;  %v4655_v59 = vsub.f32 %v15909_v41, %v16005_v1 }
 0x41b   :  { %15017 = vpow2.f32 %v4741_v32  ;;  %v4695_v4 = vmul.f32 1.442695, %v4658_v20  ;;  %v4691_v42 = vmul.f32 1.442695, %v4656_v33  ;;  %v4699_v63 = vmul.f32 1.442695, %v4660_v39 }
 0x41c   :  { %15019 = vpow2.f32 %v4745_v24  ;;  %v4685_v10 = vmul.f32 1.442695, %v4653_v0  ;;  %v4693_v9 = vmul.f32 1.442695, %v4657_v14  ;;  %v4659_v7 = vsub.f32 %v15917_v46, %v16005_v1 }
 0x41d   :  { %15021 = vpow2.f32 %v4743_v34  ;;  %v4689_v43 = vmul.f32 1.442695, %v4655_v59  ;;  %v4662_v11 = vsub.f32 %v15937_v27, %v16007_v25  ;;  %v4666_v15 = vsub.f32 %v15949_v61, %v16007_v25 }
 0x41e   :  { %15023 = vpow2.f32 %v4747_v44  ;;  %v4697_v41 = vmul.f32 1.442695, %v4659_v7  ;;  %v4664_v23 = vsub.f32 %v15939_v28, %v16009_v38  ;;  %v4668_v37 = vsub.f32 %v15951_v2, %v16009_v38 }
 0x41f   :  { %15025 = vpow2.f32 %v4687_v55  ;;  %v4703_v57 = vmul.f32 1.442695, %v4662_v11  ;;  %v4711_v6 = vmul.f32 1.442695, %v4666_v15  ;;  %v4661_v46 = vsub.f32 %v15931_v19, %v16003_v52 }
 0x420   :  { %15027 = vpow2.f32 %v4695_v4  ;;  %v4707_v26 = vmul.f32 1.442695, %v4664_v23  ;;  %v4715_v27 = vmul.f32 1.442695, %v4668_v37  ;;  %v4665_v61 = vsub.f32 %v15943_v49, %v16003_v52 }
 0x421   :  { %15029 = vpow2.f32 %v4691_v42  ;;  %v4701_v0 = vmul.f32 1.442695, %v4661_v46  ;;  %v4663_v28 = vsub.f32 %v15933_v22, %v16005_v1  ;;  %v4667_v2 = vsub.f32 %v15945_v53, %v16005_v1 }
 0x422   :  { %15031 = vpow2.f32 %v4699_v63  ;;  %v4709_v14 = vmul.f32 1.442695, %v4665_v61  ;;  %v4670_v50 = vsub.f32 %v15961_v54, %v16007_v25  ;;  %v4674_v19 = vsub.f32 %v15974_v35, %v16007_v25 }
 0x423   :  { %15033 = vpow2.f32 %v4685_v10  ;;  %v4705_v45 = vmul.f32 1.442695, %v4663_v28  ;;  %v4713_v8 = vmul.f32 1.442695, %v4667_v2  ;;  %v4672_v49 = vsub.f32 %v15963_v62, %v16009_v38 }
 0x424   :  { %15035 = vpow2.f32 %v4693_v9  ;;  %v4719_v20 = vmul.f32 1.442695, %v4670_v50  ;;  %v4727_v22 = vmul.f32 1.442695, %v4674_v19  ;;  %v4676_v53 = vsub.f32 %v15976_v36, %v16009_v38 }
 0x425   :  { %v16057_v32 = vpop.eup %15017  ;;  %15037 = vpow2.f32 %v4689_v43  ;;  %v16059_v24 = vmul.f32 1.442695, %v4672_v49  ;;  %v4669_v54 = vsub.f32 %v15955_v29, %v16003_v52  ;;  %v4673_v35 = vsub.f32 %v15968_v17, %v16003_v52 }
 0x426   :  { %18369 = vst [vmem:[#allocation26_spill] sm:$0xff] %v16057_v32  ;;  %v16065_v33 = vpop.eup %15019  ;;  %15039 = vpow2.f32 %v4697_v41  ;;  %v4731_v62 = vmul.f32 1.442695, %v4676_v53  ;;  %v4671_v39 = vsub.f32 %v15957_v31, %v16005_v1  ;;  %v4675_v36 = vsub.f32 %v15970_v18, %v16005_v1 }
 0x427   :  { %18370 = vst [vmem:[#allocation27_spill] sm:$0xff] %v16065_v33  ;;  %v16071_v34 = vpop.eup %15021  ;;  %15041 = vpow2.f32 %v4703_v57  ;;  %v16073_v44 = vmul.f32 1.442695, %v4669_v54  ;;  %v16075_v55 = vmul.f32 1.442695, %v4673_v35  ;;  %v4678_v29 = vsub.f32 %v15987_v47, %v16007_v25 }
 0x428   :  { %18371 = vst [vmem:[#allocation28_spill] sm:$0xff] %v16071_v34  ;;  %v16079_v17 = vpop.eup %15023  ;;  %15043 = vpow2.f32 %v4711_v6  ;;  %v16081_v59 = vmul.f32 1.442695, %v4671_v39  ;;  %v16083_v4 = vmul.f32 1.442695, %v4675_v36  ;;  %v18137_v31 = vand.u32 4294901760, %v16071_v34 }
 0x429   :  { %18372 = vst [vmem:[#allocation29_spill] sm:$0xff] %v16079_v17  ;;  %v16086_v18 = vpop.eup %15025  ;;  %15045 = vpow2.f32 %v4707_v26  ;;  %v16088_v42 = vmul.f32 1.442695, %v4678_v29  ;;  %v4680_v63 = vsub.f32 %v15989_v48, %v16009_v38  ;;  %v18136_v10 = vand.u32 4294901760, %v16079_v17 }
 0x42a   :  { %v16093_v47 = vpop.eup %15027  ;;  %v4805_v25 = vand.u32 4294901760, %v16086_v18  ;;  %15047 = vpow2.f32 %v4715_v27  ;;  %v16099_v9 = vsub.f32 %v16071_v34, %v18137_v31  ;;  %v4677_v7 = vsub.f32 %v15981_v56, %v16003_v52 }
 0x42b   :  { %v16103_v43 = vpop.eup %15029  ;;  %v4809_v11 = vand.u32 4294901760, %v16093_v47  ;;  %15049 = vpow2.f32 %v4701_v0  ;;  %v16106_v48 = vmul.f32 1.442695, %v4680_v63  ;;  %v16111_v38 = vsub.f32 %v16079_v17, %v18136_v10 }
 0x42c   :  { %18373 = vst [vmem:[#allocation30_spill] sm:$0xff] %v16099_v9  ;;  %v16113_v15 = vpop.eup %15031  ;;  %v16116_v41 = vsub.f32 %v16086_v18, %v4805_v25  ;;  %v5452_v23 = vand.u32 4294901760, %v16103_v43  ;;  %15051 = vpow2.f32 %v4709_v14  ;;  %v16119_v56 = vmul.f32 1.442695, %v4677_v7 }
 0x42d   :  { %18374 = vst [vmem:[#allocation31_spill] sm:$0xff] %v16111_v38  ;;  %v16121_v52 = vpop.eup %15033  ;;  %v16123_v37 = vpack.c.bf16 %v4809_v11, %v4805_v25  ;;  %v16126_v57 = vsub.f32 %v16093_v47, %v4809_v11  ;;  %v5456_v6 = vand.u32 4294901760, %v16113_v15  ;;  %15053 = vpow2.f32 %v4705_v45 }
 0x42e   :  { %v16129_v46 = vpop.eup %15035  ;;  %v16132_v26 = vsub.f32 %v16103_v43, %v5452_v23  ;;  %v4807_v27 = vand.u32 4294901760, %v16121_v52  ;;  %15055 = vpow2.f32 %v4713_v8  ;;  %v18135_v61 = vand.u32 4294901760, %v16057_v32 }
 0x42f   :  { %18375 = vst [vmem:[#allocation32_spill] sm:$0xff] %v16123_v37  ;;  %v16136_v0 = vpop.eup %15037  ;;  %14103 = vmatprep.subr.bf16.mxu0 %v16123_v37  ;;  %v16139_v28 = vpack.c.bf16 %v5456_v6, %v5452_v23  ;;  %v16142_v2 = vsub.f32 %v16113_v15, %v5456_v6  ;;  %v4811_v14 = vand.u32 4294901760, %v16129_v46  ;;  %15057 = vpow2.f32 %v4719_v20 }
 0x430   :  { %v16145_v50 = vpop.eup %15039  ;;  %v16148_v19 = vsub.f32 %v16121_v52, %v4807_v27  ;;  %v5454_v45 = vand.u32 4294901760, %v16136_v0  ;;  %15059 = vpow2.f32 %v4727_v22  ;;  %v16154_v8 = vsub.f32 %v16057_v32, %v18135_v61 }
 0x431   :  { %18376 = vst [vmem:[#allocation33_spill] sm:$0xff] %v16139_v28  ;;  %v16156_v49 = vpop.eup %15041  ;;  %14199 = vmatprep.subr.bf16.mxu1 %v16139_v28  ;;  %v16159_v53 = vpack.c.bf16 %v4811_v14, %v4807_v27  ;;  %v16162_v20 = vsub.f32 %v16129_v46, %v4811_v14  ;;  %v5458_v54 = vand.u32 4294901760, %v16145_v50  ;;  %15061 = vpow2.f32 %v16059_v24 }
 0x432   :  { %18377 = vst [vmem:[#allocation34_spill] sm:$0xff] %v16154_v8  ;;  %18378 = vst [vmem:[#allocation35_spill] sm:$0xff] %v16156_v49  ;;  %v16166_v35 = vpop.eup %15043  ;;  %v16169_v22 = vsub.f32 %v16136_v0, %v5454_v45  ;;  %v4813_v39 = vand.u32 4294901760, %v16156_v49  ;;  %15063 = vpow2.f32 %v4731_v62  ;;  %v4679_v36 = vsub.f32 %v15983_v58, %v16005_v1 }
 0x433   :  { %18379 = vst [vmem:[#allocation36_spill] sm:$0xff] %v16159_v53  ;;  %18380 = vst [vmem:[#allocation37_spill] sm:$0xff] %v16166_v35  ;;  %v16174_v29 = vpop.eup %15045  ;;  %14105 = vmatpush1.bf16.msra.mxu0 %v16159_v53  ;;  %v16177_v63 = vpack.c.bf16 %v5458_v54, %v5454_v45  ;;  %v16180_v25 = vsub.f32 %v16145_v50, %v5458_v54  ;;  %v4817_v24 = vand.u32 4294901760, %v16166_v35  ;;  %15065 = vpow2.f32 %v16073_v44 }
 0x434   :  { %18381 = vst [vmem:[#allocation38_spill] sm:$0xff] %v16174_v29  ;;  %v16184_v7 = vpop.eup %15047  ;;  %v16187_v62 = vsub.f32 %v16156_v49, %v4813_v39  ;;  %v5460_v58 = vand.u32 4294901760, %v16174_v29  ;;  %15067 = vpow2.f32 %v16075_v55  ;;  %v4737_v1 = vmul.f32 1.442695, %v4679_v36 }
 0x435   :  { %18382 = vst [vmem:[#allocation39_spill] sm:$0xff] %v16177_v63  ;;  %18383 = vst [vmem:[#allocation40_spill] sm:$0xff] %v16184_v7  ;;  %v16191_v11 = vpop.eup %15049  ;;  %14201 = vmatpush1.bf16.msra.mxu1 %v16177_v63  ;;  %v16194_v23 = vpack.c.bf16 %v4817_v24, %v4813_v39  ;;  %v16197_v6 = vsub.f32 %v16166_v35, %v4817_v24  ;;  %v5464_v44 = vand.u32 4294901760, %v16184_v7  ;;  %15069 = vpow2.f32 %v16081_v59 }
 0x436   :  { %v16201_v27 = vpop.eup %15051  ;;  %v16204_v14 = vsub.f32 %v16174_v29, %v5460_v58  ;;  %v4815_v55 = vand.u32 4294901760, %v16191_v11  ;;  %15071 = vpow2.f32 %v16083_v4  ;;  %v18140_v45 = vand.u32 4294901760, %v16065_v33 }
 0x437   :  { %18384 = vst [vmem:[#allocation41_spill] sm:$0xff] %v16194_v23  ;;  %18385 = vst [vmem:[#allocation42_spill] sm:$0xff] %v16201_v27  ;;  %v16209_v54 = vpop.eup %15053  ;;  %14107 = vmatprep.subr.bf16.mxu0 %v16194_v23  ;;  %v16212_v39 = vpack.c.bf16 %v5464_v44, %v5460_v58  ;;  %v16215_v36 = vsub.f32 %v16184_v7, %v5464_v44  ;;  %v4819_v59 = vand.u32 4294901760, %v16201_v27  ;;  %15073 = vpow2.f32 %v16088_v42 }
 0x438   :  { %v16219_v24 = vpop.eup %15055  ;;  %v16222_v61 = vsub.f32 %v16191_v11, %v4815_v55  ;;  %v5462_v4 = vand.u32 4294901760, %v16209_v54  ;;  %15075 = vpow2.f32 %v16106_v48  ;;  %v16229_v58 = vsub.f32 %v16065_v33, %v18140_v45 }
 0x439   :  { %18386 = vst [vmem:[#allocation43_spill] sm:$0xff] %v16212_v39  ;;  %18387 = vst [vmem:[#allocation44_spill] sm:$0xff] %v16219_v24  ;;  %v16231_v44 = vpop.eup %15057  ;;  %14203 = vmatprep.subr.bf16.mxu1 %v16212_v39  ;;  %v16234_v10 = vpack.c.bf16 %v4819_v59, %v4815_v55  ;;  %v16237_v42 = vsub.f32 %v16201_v27, %v4819_v59  ;;  %v5466_v31 = vand.u32 4294901760, %v16219_v24  ;;  %15077 = vpow2.f32 %v16119_v56 }
 0x43a   :  { %18388 = vst [vmem:[#allocation45_spill] sm:$0xff] %v16231_v44  ;;  %v16241_v40 = vpop.eup %15059  ;;  %v16244_v48 = vsub.f32 %v16209_v54, %v5462_v4  ;;  %v4821_v45 = vand.u32 4294901760, %v16231_v44  ;;  %15079 = vpow2.f32 %v4737_v1  ;;  %v18163_v60 = vand.u32 4294901760, %v16116_v41 }
 0x43b   :  { %18389 = vst [vmem:[#allocation46_spill] sm:$0xff] %v16234_v10  ;;  %18390 = vst [vmem:[#allocation47_spill] sm:$0xff] %v16241_v40  ;;  %v16248_v21 = vpop.eup %15061  ;;  %14109 = vmatpush1.bf16.msra.mxu0 %v16234_v10  ;;  %v16251_v55 = vpack.c.bf16 %v5466_v31, %v5462_v4  ;;  %v16254_v59 = vsub.f32 %v16219_v24, %v5466_v31  ;;  %v4825_v56 = vand.u32 4294901760, %v16241_v40  ;;  %v18396_v63 = vand.u32 4294901760, %v16126_v57 }
 0x43c   :  { %18391 = vst [vmem:[#allocation48_spill] sm:$0xff] %v16248_v21  ;;  %v16258_v12 = vpop.eup %15063  ;;  %v16261_v30 = vsub.f32 %v16231_v44, %v4821_v45  ;;  %v5468_v1 = vand.u32 4294901760, %v16248_v21  ;;  %v4900_v51 = vsub.f32 %v16116_v41, %v18163_v60  ;;  %v18187_v7 = vand.u32 4294901760, %v16142_v2 }
 0x43d   :  { %18392 = vst [vmem:[#allocation49_spill] sm:$0xff] %v16251_v55  ;;  %18393 = vst [vmem:[#allocation50_spill] sm:$0xff] %v16258_v12  ;;  %v16268_v10 = vpop.eup %15065  ;;  %14205 = vmatpush1.bf16.msra.mxu1 %v16251_v55  ;;  %v16271_v31 = vpack.c.bf16 %v4825_v56, %v4821_v45  ;;  %v16274_v16 = vsub.f32 %v16241_v40, %v4825_v56  ;;  %v5472_v39 = vand.u32 4294901760, %v16258_v12  ;;  %v18398_v45 = vand.u32 4294901760, %v16132_v26 }
 0x43e   :  { %18394 = vst [vmem:[#allocation51_spill] sm:$0xff] %v16268_v10  ;;  %v4912_v23 = vsub.f32 %v16126_v57, %v18396_v63  ;;  %v16280_v53 = vpop.eup %15067  ;;  %v16283_v60 = vsub.f32 %v16248_v21, %v5468_v1  ;;  %v4823_v4 = vand.u32 4294901760, %v16268_v10  ;;  %v4901_v5 = vand.u32 4294901760, %v4900_v51 }
 0x43f   :  { %18395 = vst [vmem:[#allocation52_spill] sm:$0xff] %v16271_v31  ;;  %18397 = vst [vmem:[#allocation53_spill] sm:$0xff] %v16280_v53  ;;  %v5547_v55 = vsub.f32 %v16132_v26, %v18398_v45  ;;  %v16289_v56 = vpop.eup %15069  ;;  %14111 = vmatprep.subr.bf16.mxu0 %v16271_v31  ;;  %v16292_v28 = vpack.c.bf16 %v5472_v39, %v5468_v1  ;;  %v16295_v63 = vsub.f32 %v16258_v12, %v5472_v39 }
 0x440   :  { %18399 = vst [vmem:[#allocation54_spill] sm:$0xff] %v16289_v56  ;;  %v4827_v37 = vand.u32 4294901760, %v16280_v53  ;;  %v4913_v40 = vand.u32 4294901760, %v4912_v23  ;;  %v16298_v21 = vpop.eup %15071  ;;  %v16301_v51 = vsub.f32 %v16268_v10, %v4823_v4  ;;  %v5470_v44 = vand.u32 4294901760, %v16289_v56 }
 0x441   :  { %18400 = vst [vmem:[#allocation55_spill] sm:$0xff] %v16292_v28  ;;  %18401 = vst [vmem:[#allocation56_spill] sm:$0xff] %v16298_v21  ;;  %v5548_v45 = vand.u32 4294901760, %v5547_v55  ;;  %v16305_v35 = vpop.eup %15073  ;;  %14207 = vmatprep.subr.bf16.mxu1 %v16292_v28  ;;  %v5474_v23 = vand.u32 4294901760, %v16298_v21  ;;  %v5559_v24 = vsub.f32 %v16142_v2, %v18187_v7  ;;  %v18408_v27 = vand.u32 4294901760, %v16071_v34 }
 0x442   :  { %18402 = vst [vmem:[#allocation57_spill] sm:$0xff] %v16305_v35  ;;  %v16308_v1 = vpack.c.bf16 %v4827_v37, %v4823_v4  ;;  %v16311_v39 = vsub.f32 %v16280_v53, %v4827_v37  ;;  %v14118_v31 = vpack.c.bf16 %v4913_v40, %v4901_v5  ;;  %v16314_v12 = vpop.eup %15075  ;;  %v16317_v10 = vsub.f32 %v16289_v56, %v5470_v44 }
 0x443   :  { %18404 = vst [vmem:[#allocation59_spill] sm:$0xff] %v16314_v12  ;;  %v4829_v55 = vand.u32 4294901760, %v16305_v35  ;;  %v16324_v28 = vpop.eup %15077  ;;  %v16327_v37 = vpack.c.bf16 %v5474_v23, %v5470_v44  ;;  %v16330_v40 = vsub.f32 %v16298_v21, %v5474_v23  ;;  %v5476_v5 = vand.u32 4294901760, %v16314_v12 }
 0x444   :  { %18403 = vst [vmem:[#allocation58_spill] sm:$0xff] %v16308_v1  ;;  %18405 = vst [vmem:[#allocation60_spill] sm:$0xff] %v16324_v28  ;;  %14113 = vmatpush1.bf16.msra.mxu0 %v16308_v1  ;;  %v16334_v56 = vpop.eup %15079  ;;  %v4831_v1 = vand.u32 4294901760, %v16324_v28  ;;  %v5560_v44 = vand.u32 4294901760, %v5559_v24  ;;  %v18411_v23 = vand.u32 4294901760, %v16079_v17  ;;  %v18418_v17 = vand.u32 4294901760, %v16162_v20 }
 0x445   :  { %18406 = vst [vmem:[#allocation61_spill] sm:$0xff] %v16327_v37  ;;  %18407 = vst [vmem:[#allocation62_spill] sm:$0xff] %v16334_v56  ;;  %v16338_v7 = vpack.c.bf16 %v18408_v27, %v4829_v55  ;;  %v16341_v4 = vsub.f32 %v16305_v35, %v4829_v55  ;;  %14209 = vmatpush1.bf16.msra.mxu1 %v16327_v37  ;;  %v16350_v53 = vsub.f32 %v16314_v12, %v5476_v5 }
 0x446   :  { %v16347_v21 = vpack.c.bf16 %v18411_v23, %v5476_v5  ;;  %v5478_v29 = vand.u32 4294901760, %v16334_v56  ;;  %v18414_v27 = vand.u32 4294901760, %v16148_v19  ;;  %v18415_v55 = vand.u32 4294901760, %v16057_v32 }
 0x447   :  { %18409 = vst [vmem:[#allocation63_spill] sm:$0xff] %v16338_v7  ;;  %18410 = vst [vmem:[#allocation64_spill] sm:$0xff] %v16341_v4  ;;  %14115 = vmatprep.subr.bf16.mxu0 %v16338_v7  ;;  %v16362_v37 = vsub.f32 %v16324_v28, %v4831_v1  ;;  %v14214_v23 = vpack.c.bf16 %v5560_v44, %v5548_v45  ;;  %v4918_v5 = vsub.f32 %v16162_v20, %v18418_v17  ;;  %v18425_v28 = vmov 0.0  }
 0x448   :  { %18412 = vst [vmem:[#allocation65_spill] sm:$0xff] %v16347_v21  ;;  %18413 = vst [vmem:[#allocation66_spill] sm:$0xff] %v16350_v53  ;;  %v4906_v34 = vsub.f32 %v16148_v19, %v18414_v27  ;;  %v16359_v24 = vpack.c.bf16 %v18415_v55, %v4831_v1  ;;  %14211 = vmatprep.subr.bf16.mxu1 %v16347_v21  ;;  %v18419_v12 = vand.u32 4294901760, %v16065_v33  ;;  %v18203_v55 = vand.u32 4294901760, %v16169_v22 }
 0x449   :  { %18417 = vst [vmem:[#allocation68_spill] sm:$0xff] %v16362_v37  ;;  %v16373_v27 = vsub.f32 %v16334_v56, %v5478_v29  ;;  %v4919_v1 = vand.u32 4294901760, %v4918_v5  ;;  %v18204_v45 = vand.u32 4294901760, %v16180_v25  ;;  %v18421_v17 = vand.u32 4294901760, %v16187_v62 }
 0x44a   :  { %18416 = vst [vmem:[#allocation67_spill] sm:$0xff] %v16359_v24  ;;  %v16370_v35 = vpack.c.bf16 %v18419_v12, %v5478_v29  ;;  %v4907_v32 = vand.u32 4294901760, %v4906_v34  ;;  %14117 = vmatpush1.bf16.msra.mxu0 %v16359_v24  ;;  %v5553_v12 = vsub.f32 %v16169_v22, %v18203_v55  ;;  %v18230_v24 = vand.u32 4294901760, %v16222_v61 }
 0x44b   :  { %14119 = vmatprep.subr.bf16.mxu0 %v14118_v31  ;;  %v5565_v44 = vsub.f32 %v16180_v25, %v18204_v45  ;;  %v4924_v31 = vsub.f32 %v16187_v62, %v18421_v17  ;;  %v18423_v29 = vand.u32 4294901760, %v16204_v14 }
 0x44c   :  { %18420 = vst [vmem:[#allocation69_spill] sm:$0xff] %v16370_v35  ;;  %14213 = vmatpush1.bf16.msra.mxu1 %v16370_v35  ;;  %v14120_v5 = vpack.c.bf16 %v4919_v1, %v4907_v32  ;;  %v18422_v35 = vand.u32 4294901760, %v16197_v6  ;;  %v5554_v34 = vand.u32 4294901760, %v5553_v12  ;;  %v18424_v32 = vand.u32 4294901760, %v16215_v36 }
 0x44d   :  { %14215 = vmatprep.subr.bf16.mxu1 %v14214_v23  ;;  %4891 = vmatmul.mubr.f32.vlgmr.msra.gmra.mrb[22].mxu0 %v16011_v3  ;;  %v5571_v23 = vsub.f32 %v16204_v14, %v18423_v29  ;;  %v4930_v45 = vsub.f32 %v16222_v61, %v18230_v24  ;;  %v5566_v17 = vand.u32 4294901760, %v5565_v44  ;;  %v18217_v12 = vand.u32 4294901760, %v16237_v42 }
 0x44e   :  { %v4936_v55 = vsub.f32 %v16197_v6, %v18422_v35  ;;  %v5583_v1 = vsub.f32 %v16215_v36, %v18424_v32  ;;  %14121 = vmatpush1.bf16.msra.mxu0 %v14120_v5  ;;  %v4925_v35 = vand.u32 4294901760, %v4924_v31  ;;  %v18216_v29 = vand.u32 4294901760, %v16244_v48  ;;  %5041 = vmatprep.mubr.f32.mxu0 %v18425_v28 }
 0x44f   :  { %5538 = vmatmul.mubr.f32.vlgmr.msra.gmra.mrb[22].mxu1 %v16011_v3  ;;  %v5572_v7 = vand.u32 4294901760, %v5571_v23  ;;  %v4931_v56 = vand.u32 4294901760, %v4930_v45  ;;  %v14216_v32 = vpack.c.bf16 %v5566_v17, %v5554_v34  ;;  %v4942_v3 = vsub.f32 %v16237_v42, %v18217_v12 }
 0x450   :  { %v4937_v21 = vand.u32 4294901760, %v4936_v55  ;;  %v5584_v33 = vand.u32 4294901760, %v5583_v1  ;;  %5688 = vmatprep.mubr.f32.mxu1 %v18425_v28  ;;  %v18213_v44 = vand.u32 4294901760, %v16254_v59  ;;  %v5577_v5 = vsub.f32 %v16244_v48, %v18216_v29 }
 0x451   :  { %v18214_v45 = vand.u32 4294901760, %v16261_v30  ;;  %v18215_v31 = vand.u32 4294901760, %v16274_v16  ;;  %14217 = vmatpush1.bf16.msra.mxu1 %v14216_v32  ;;  %v4943_v23 = vand.u32 4294901760, %v4942_v3  ;;  %v18218_v34 = vand.u32 4294901760, %v16283_v60 }
 0x452   :  { %v14122_v49 = vpack.c.bf16 %v4937_v21, %v4925_v35  ;;  %v14218_v55 = vpack.c.bf16 %v5584_v33, %v5572_v7  ;;  %v5589_v21 = vsub.f32 %v16254_v59, %v18213_v44  ;;  %v18219_v1 = vand.u32 4294901760, %v16295_v63 }
 0x453   :  { %v5578_v33 = vand.u32 4294901760, %v5577_v5  ;;  %v4948_v7 = vsub.f32 %v16261_v30, %v18214_v45  ;;  %v4960_v17 = vsub.f32 %v16274_v16, %v18215_v31  ;;  %v14124_v35 = vpack.c.bf16 %v4943_v23, %v4931_v56 }
 0x454   :  { %14123 = vmatprep.subr.bf16.mxu0 %v14122_v49  ;;  %14219 = vmatprep.subr.bf16.mxu1 %v14218_v55  ;;  %v18220_v49 = vand.u32 4294901760, %v16301_v51  ;;  %v5590_v32 = vand.u32 4294901760, %v5589_v21  ;;  %v5595_v3 = vsub.f32 %v16283_v60, %v18218_v34  ;;  %v5607_v55 = vsub.f32 %v16295_v63, %v18219_v1 }
 0x455   :  { %v4949_v5 = vand.u32 4294901760, %v4948_v7  ;;  %v4961_v44 = vand.u32 4294901760, %v4960_v17  ;;  %v18225_v31 = vand.u32 4294901760, %v16311_v39  ;;  %14125 = vmatpush1.bf16.msra.mxu0 %v14124_v35  ;;  %v18224_v21 = vand.u32 4294901760, %v16317_v10 }
 0x456   :  { %v4954_v45 = vsub.f32 %v16301_v51, %v18220_v49  ;;  %v14220_v29 = vpack.c.bf16 %v5590_v32, %v5578_v33  ;;  %v5596_v56 = vand.u32 4294901760, %v5595_v3  ;;  %v5608_v23 = vand.u32 4294901760, %v5607_v55 }
 0x457   :  { %v14126_v12 = vpack.c.bf16 %v4961_v44, %v4949_v5  ;;  %v4966_v1 = vsub.f32 %v16311_v39, %v18225_v31  ;;  %v18221_v7 = vand.u32 4294901760, %v16330_v40  ;;  %v5601_v49 = vsub.f32 %v16317_v10, %v18224_v21 }
 0x458   :  { %v4955_v34 = vand.u32 4294901760, %v4954_v45  ;;  %14221 = vmatpush1.bf16.msra.mxu1 %v14220_v29  ;;  %v14222_v17 = vpack.c.bf16 %v5608_v23, %v5596_v56  ;;  %v18222_v33 = vand.u32 4294901760, %v16341_v4  ;;  %v18223_v35 = vand.u32 4294901760, %v16099_v9 }
 0x459   :  { %14127 = vmatprep.subr.bf16.mxu0 %v14126_v12  ;;  %v4967_v32 = vand.u32 4294901760, %v4966_v1  ;;  %v5613_v44 = vsub.f32 %v16330_v40, %v18221_v7  ;;  %v18226_v45 = vand.u32 4294901760, %v16350_v53  ;;  %v18227_v3 = vand.u32 4294901760, %v16111_v38 }
 0x45a   :  { %14223 = vmatprep.subr.bf16.mxu1 %v14222_v17  ;;  %v5602_v29 = vand.u32 4294901760, %v5601_v49  ;;  %v4972_v55 = vsub.f32 %v16341_v4, %v18222_v33  ;;  %v4984_v5 = vsub.f32 %v16099_v9, %v18223_v35  ;;  %v18228_v12 = vand.u32 4294901760, %v16362_v37 }
 0x45b   :  { %v14128_v1 = vpack.c.bf16 %v4967_v32, %v4955_v34  ;;  %v5614_v56 = vand.u32 4294901760, %v5613_v44  ;;  %v5619_v23 = vsub.f32 %v16350_v53, %v18226_v45  ;;  %v5631_v49 = vsub.f32 %v16111_v38, %v18227_v3 }
 0x45c   :  { %v4973_v17 = vand.u32 4294901760, %v4972_v55  ;;  %v4985_v7 = vand.u32 4294901760, %v4984_v5  ;;  %v4978_v33 = vsub.f32 %v16362_v37, %v18228_v12  ;;  %v18229_v35 = vand.u32 4294901760, %v16154_v8 }
 0x45d   :  { %14129 = vmatpush1.bf16.msra.mxu0 %v14128_v1  ;;  %v14224_v21 = vpack.c.bf16 %v5614_v56, %v5602_v29  ;;  %v5620_v34 = vand.u32 4294901760, %v5619_v23  ;;  %v5632_v32 = vand.u32 4294901760, %v5631_v49  ;;  %v5624_v44 = vand.u32 4294901760, %v16373_v27 }
 0x45e   :  { %v14130_v31 = vpack.c.bf16 %v4985_v7, %v4973_v17  ;;  %v4979_v45 = vand.u32 4294901760, %v4978_v33  ;;  %v4990_v3 = vsub.f32 %v16154_v8, %v18229_v35  ;;  %v5636_v55 = vand.u32 4294901760, %v16229_v58 }
 0x45f   :  { %14225 = vmatpush1.bf16.msra.mxu1 %v14224_v21  ;;  %v14226_v5 = vpack.c.bf16 %v5632_v32, %v5620_v34  ;;  %v5625_v12 = vsub.f32 %v16373_v27, %v5624_v44  ;;  %v14134_v1 = vpack.c.bf16 %v16126_v57, %v16116_v41  ;;  %v14230_v29 = vpack.c.bf16 %v16142_v2, %v16132_v26 }
 0x460   :  { %14131 = vmatprep.subr.bf16.mxu0 %v14130_v31  ;;  %v4991_v56 = vand.u32 4294901760, %v4990_v3  ;;  %v5637_v7 = vsub.f32 %v16229_v58, %v5636_v55  ;;  %v14136_v33 = vpack.c.bf16 %v16162_v20, %v16148_v19  ;;  %v14232_v23 = vpack.c.bf16 %v16180_v25, %v16169_v22 }
 0x461   :  { %14227 = vmatprep.subr.bf16.mxu1 %v14226_v5  ;;  %v5626_v21 = vand.u32 4294901760, %v5625_v12  ;;  %v14138_v49 = vpack.c.bf16 %v16197_v6, %v16187_v62  ;;  %v14234_v17 = vpack.c.bf16 %v16215_v36, %v16204_v14  ;;  %v14140_v31 = vpack.c.bf16 %v16237_v42, %v16222_v61 }
 0x462   :  { %v14132_v3 = vpack.c.bf16 %v4991_v56, %v4979_v45  ;;  %v5638_v34 = vand.u32 4294901760, %v5637_v7  ;;  %v14236_v32 = vpack.c.bf16 %v16254_v59, %v16244_v48  ;;  %v14142_v35 = vpack.c.bf16 %v16274_v16, %v16261_v30 }
 0x463   :  { %v14238_v12 = vpack.c.bf16 %v16295_v63, %v16283_v60  ;;  %v14144_v5 = vpack.c.bf16 %v16311_v39, %v16301_v51  ;;  %v14240_v24 = vpack.c.bf16 %v16330_v40, %v16317_v10  ;;  %v14244_v45 = vpack.c.bf16 %v16229_v58, %v16373_v27 }
 0x464   :  { %14133 = vmatpush1.bf16.msra.mxu0 %v14132_v3  ;;  %v14228_v8 = vpack.c.bf16 %v5638_v34, %v5626_v21  ;;  %v18426_v56 = vand.u32 4294901760, %v16116_v41  ;;  %v18427_v7 = vand.u32 4294901760, %v16126_v57  ;;  %v18428_v38 = vand.u32 4294901760, %v16132_v26 }
 0x465   :  { %14135 = vmatprep.subr.bf16.mxu0 %v14134_v1  ;;  %v18429_v53 = vand.u32 4294901760, %v16142_v2  ;;  %v18430_v4 = vand.u32 4294901760, %v16148_v19  ;;  %v18431_v21 = vand.u32 4294901760, %v16162_v20  ;;  %v18432_v58 = vand.u32 4294901760, %v16169_v22 }
 0x466   :  { %v16511_v37 = vpack.c.bf16 %v18427_v7, %v18426_v56  ;;  %v18433_v41 = vand.u32 4294901760, %v16180_v25  ;;  %14229 = vmatpush1.bf16.msra.mxu1 %v14228_v8  ;;  %v18434_v57 = vand.u32 4294901760, %v16187_v62  ;;  %v18435_v26 = vand.u32 4294901760, %v16197_v6  ;;  %v18455_v56 = vld [vmem:[#allocation40_spill] sm:$0xff]  ;;  %v18459_v7 = vld [vmem:[#allocation54_spill] sm:$0xff] }
 0x467   :  { %v16517_v9 = vpack.c.bf16 %v18429_v53, %v18428_v38  ;;  %v16523_v3 = vpack.c.bf16 %v18431_v21, %v18430_v4  ;;  %v18436_v38 = vand.u32 4294901760, %v16204_v14  ;;  %v18437_v19 = vand.u32 4294901760, %v16215_v36  ;;  %14231 = vmatprep.subr.bf16.mxu1 %v14230_v29  ;;  %5043 = vmatmul.mubr.f32.vlgmr.msra.gmra.mrb[22].mxu0 %v15991_v13 }
 0x468   :  { %v16529_v27 = vpack.c.bf16 %v18433_v41, %v18432_v58  ;;  %v16535_v2 = vpack.c.bf16 %v18435_v26, %v18434_v57  ;;  %v18438_v20 = vand.u32 4294901760, %v16222_v61  ;;  %v18439_v22 = vand.u32 4294901760, %v16237_v42  ;;  %14137 = vmatpush1.bf16.msra.mxu0 %v14136_v33  ;;  %5145 = vmatprep.mubr.f32.mxu0 %v18425_v28  ;;  %v18460_v58 = vld [vmem:[#allocation45_spill] sm:$0xff]  ;;  %v18461_v41 = vld [vmem:[#allocation48_spill] sm:$0xff]  ;;  %v18463_v26 = vld [vmem:[#allocation31_spill] sm:$0xff] }
 0x469   :  { %v16541_v53 = vpack.c.bf16 %v18437_v19, %v18436_v38  ;;  %v18440_v8 = vand.u32 4294901760, %v16244_v48  ;;  %v18441_v62 = vand.u32 4294901760, %v16254_v59  ;;  %v18442_v6 = vand.u32 4294901760, %v16261_v30  ;;  %5690 = vmatmul.mubr.f32.vlgmr.msra.gmra.mrb[22].mxu1 %v15991_v13  ;;  %14139 = vmatprep.subr.bf16.mxu0 %v14138_v49  ;;  %v18464_v19 = vld [vmem:[#allocation53_spill] sm:$0xff] }
 0x46a   :  { %v16547_v25 = vpack.c.bf16 %v18439_v22, %v18438_v20  ;;  %v18443_v14 = vand.u32 4294901760, %v16274_v16  ;;  %v18444_v61 = vand.u32 4294901760, %v16283_v60  ;;  %v18445_v42 = vand.u32 4294901760, %v16295_v63  ;;  %14233 = vmatpush1.bf16.msra.mxu1 %v14232_v23  ;;  %5792 = vmatprep.mubr.f32.mxu1 %v18425_v28  ;;  %v18452_v23 = vld [vmem:[#allocation42_spill] sm:$0xff] }
 0x46b   :  { %v16553_v4 = vpack.c.bf16 %v18441_v62, %v18440_v8  ;;  %v18446_v48 = vand.u32 4294901760, %v16301_v51  ;;  %v18447_v59 = vand.u32 4294901760, %v16311_v39  ;;  %v18448_v30 = vand.u32 4294901760, %v16317_v10  ;;  %14235 = vmatprep.subr.bf16.mxu1 %v14234_v17  ;;  %v18466_v22 = vld [vmem:[#allocation34_spill] sm:$0xff]  ;;  %v18467_v62 = vld [vmem:[#allocation56_spill] sm:$0xff] }
 0x46c   :  { %v16560_v36 = vpack.c.bf16 %v18443_v14, %v18442_v6  ;;  %v16566_v1 = vpack.c.bf16 %v18445_v42, %v18444_v61  ;;  %v18449_v16 = vand.u32 4294901760, %v16330_v40  ;;  %v16582_v60 = vpack.c.bf16 %v5636_v55, %v5624_v44  ;;  %14141 = vmatpush1.bf16.msra.mxu0 %v14140_v31  ;;  %v18450_v55 = vld [vmem:[#allocation35_spill] sm:$0xff]  ;;  %v18469_v61 = vld [vmem:[#allocation50_spill] sm:$0xff] }
 0x46d   :  { %v16572_v34 = vpack.c.bf16 %v18447_v59, %v18446_v48  ;;  %v4749_v63 = vadd.f32 %v16129_v46, %v16121_v52  ;;  %v4775_v51 = vadd.f32 %v16145_v50, %v16136_v0  ;;  %v4762_v10 = vadd.f32 %v16093_v47, %v16086_v18  ;;  %v18451_v46 = vld [vmem:[#allocation38_spill] sm:$0xff]  ;;  %14143 = vmatprep.subr.bf16.mxu0 %v14142_v35  ;;  %v18453_v0 = vld [vmem:[#allocation44_spill] sm:$0xff]  ;;  %v18454_v18 = vld [vmem:[#allocation37_spill] sm:$0xff] }
 0x46e   :  { %v16579_v29 = vpack.c.bf16 %v18449_v16, %v18448_v30  ;;  %v4788_v39 = vadd.f32 %v16113_v15, %v16103_v43  ;;  %14237 = vmatpush1.bf16.msra.mxu1 %v14236_v32  ;;  %v18456_v15 = vld [vmem:[#allocation64_spill] sm:$0xff]  ;;  %v18458_v31 = vld [vmem:[#allocation51_spill] sm:$0xff]  ;;  %v18462_v32 = vld [vmem:[#allocation66_spill] sm:$0xff] }
 0x46f   :  { %v4750_v40 = vadd.f32 %v16191_v11, %v4749_v63  ;;  %v4776_v44 = vadd.f32 %v16209_v54, %v4775_v51  ;;  %v4763_v52 = vadd.f32 %v18450_v55, %v4762_v10  ;;  %14239 = vmatprep.subr.bf16.mxu1 %v14238_v12  ;;  %v18457_v11 = vld [vmem:[#allocation30_spill] sm:$0xff]  ;;  %v14242_v38 = vpack.c.bf16 %v18463_v26, %v18462_v32  ;;  %v18465_v12 = vld [vmem:[#allocation68_spill] sm:$0xff]  ;;  %v18468_v14 = vld [vmem:[#allocation47_spill] sm:$0xff] }
 0x470   :  { %v4789_v33 = vadd.f32 %v18451_v46, %v4788_v39  ;;  %v14146_v17 = vpack.c.bf16 %v18457_v11, %v18456_v15  ;;  %14145 = vmatpush1.bf16.msra.mxu0 %v14144_v5  ;;  %v14148_v8 = vpack.c.bf16 %v18466_v22, %v18465_v12  ;;  %v18470_v48 = vld [vmem:[#allocation60_spill] sm:$0xff]  ;;  %v18471_v30 = vld [vmem:[#allocation62_spill] sm:$0xff]  ;;  %v18472_v63 = vld [vmem:[#allocation57_spill] sm:$0xff] }
 0x471   :  { %v4751_v49 = vadd.f32 %v18452_v23, %v4750_v40  ;;  %v4777_v50 = vadd.f32 %v18453_v0, %v4776_v44  ;;  %v4764_v47 = vadd.f32 %v18454_v18, %v4763_v52  ;;  %v18474_v39 = vld [vmem:[#allocation32_spill] sm:$0xff]  ;;  %v18475_v40 = vld [vmem:[#allocation27_spill] sm:$0xff]  ;;  %v18476_v55 = vld [vmem:[#allocation33_spill] sm:$0xff] }
 0x472   :  { %v4790_v43 = vadd.f32 %v18455_v56, %v4789_v33  ;;  %14147 = vmatprep.subr.bf16.mxu0 %v14146_v17  ;;  %14241 = vmatpush1.bf16.msra.mxu1 %v14240_v24  ;;  %v18473_v24 = vld [vmem:[#allocation59_spill] sm:$0xff]  ;;  %v18477_v52 = vld [vmem:[#allocation24_spill] sm:$0xff]  ;;  %v18479_v33 = vld [vmem:[#allocation41_spill] sm:$0xff] }
 0x473   :  { %v4752_v54 = vadd.f32 %v18458_v31, %v4751_v49  ;;  %v4778_v21 = vadd.f32 %v18459_v7, %v4777_v50  ;;  %v4765_v35 = vadd.f32 %v18460_v58, %v4764_v47  ;;  %14243 = vmatprep.subr.bf16.mxu1 %v14242_v38  ;;  %v18478_v46 = vld [vmem:[#allocation36_spill] sm:$0xff]  ;;  %v18480_v23 = vld [vmem:[#allocation39_spill] sm:$0xff]  ;;  %v18482_v49 = vld [vmem:[#allocation46_spill] sm:$0xff] }
 0x474   :  { %v4791_v57 = vadd.f32 %v18461_v41, %v4790_v43  ;;  %14149 = vmatpush1.bf16.msra.mxu0 %v14148_v8  ;;  %v18483_v0 = vld [vmem:[#allocation52_spill] sm:$0xff]  ;;  %v18484_v50 = vld [vmem:[#allocation49_spill] sm:$0xff]  ;;  %v18485_v18 = vld [vmem:[#allocation55_spill] sm:$0xff] }
 0x475   :  { %v4753_v20 = vadd.f32 %v18464_v19, %v4752_v54  ;;  %v4779_v6 = vadd.f32 %v18467_v62, %v4778_v21  ;;  %v4766_v5 = vadd.f32 %v18468_v14, %v4765_v35  ;;  %14151 = vmatprep.subr.bf16.mxu0 %v18474_v39  ;;  %v18486_v47 = vld [vmem:[#allocation58_spill] sm:$0xff]  ;;  %v18487_v56 = vld [vmem:[#allocation63_spill] sm:$0xff]  ;;  %v18488_v43 = vld [vmem:[#allocation61_spill] sm:$0xff] }
 0x476   :  { %v4792_v42 = vadd.f32 %v18469_v61, %v4791_v57  ;;  %14245 = vmatpush1.bf16.msra.mxu1 %v14244_v45  ;;  %v18481_v45 = vld [vmem:[#allocation43_spill] sm:$0xff]  ;;  %v18489_v17 = vld [vmem:[#allocation65_spill] sm:$0xff] }
 0x477   :  { %v16616_v59 = vadd.f32 %v18470_v48, %v4753_v20  ;;  %v4780_v16 = vadd.f32 %v18471_v30, %v4779_v6  ;;  %v16620_v51 = vadd.f32 %v18472_v63, %v4766_v5  ;;  %14247 = vmatprep.subr.bf16.mxu1 %v18476_v55  ;;  %5148 = vmatmul.mubr.f32.vlgmr.msra.gmra.mrb[22].mxu0 %v18477_v52  ;;  %v18490_v31 = vld [vmem:[#allocation67_spill] sm:$0xff]  ;;  %v18491_v54 = vld [vmem:[#allocation69_spill] sm:$0xff]  ;;  %v70_v5 = vld [vmem:[%s18118_s4] sm:$0xff] }
 0x478   :  { %v16623_v10 = vadd.f32 %v18473_v24, %v4792_v42  ;;  %14153 = vmatpush1.bf16.msra.mxu0 %v18478_v46  ;;  %5234 = vmatprep.mubr.f32.mxu0 %v18425_v28  ;;  %v18492_v7 = vld [vmem:[#allocation25_spill] sm:$0xff] }
 0x479   :  { %v16627_v44 = vadd.f32 %v18475_v40, %v4780_v16  ;;  %5795 = vmatmul.mubr.f32.vlgmr.msra.gmra.mrb[22].mxu1 %v18477_v52  ;;  %14155 = vmatprep.subr.bf16.mxu0 %v18479_v33 }
 0x47a   :  { %14249 = vmatpush1.bf16.msra.mxu1 %v18480_v23  ;;  %5881 = vmatprep.mubr.f32.mxu1 %v18425_v28 }
 0x47b   :  { %14251 = vmatprep.subr.bf16.mxu1 %v18481_v45  ;;  %v4782_v35 = vrot.slane %v16627_v44, 4 }
 0x47c   :  { %14157 = vmatpush1.bf16.msra.mxu0 %v18482_v49 }
 0x47d   :  { %14159 = vmatprep.subr.bf16.mxu0 %v18483_v0 }
 0x47e   :  { %14253 = vmatpush1.bf16.msra.mxu1 %v18484_v50 }
 0x47f   :  { %14255 = vmatprep.subr.bf16.mxu1 %v18485_v18 }
 0x480   :  { %14161 = vmatpush1.bf16.msra.mxu0 %v18486_v47 }
 0x481   :  { %14163 = vmatprep.subr.bf16.mxu0 %v18487_v56 }
 0x482   :  { %14257 = vmatpush1.bf16.msra.mxu1 %v18488_v43 }
 0x483   :  { %14259 = vmatprep.subr.bf16.mxu1 %v18489_v17 }
 0x484   :  { %14165 = vmatpush1.bf16.msra.mxu0 %v18490_v31 }
 0x485   :  { %14167 = vmatprep.subr.bf16.mxu0 %v16511_v37  ;;  %v18494_v37 = vand.u32 4294901760, %v18457_v11 }
 0x486   :  { %14261 = vmatpush1.bf16.msra.mxu1 %v18491_v54 }
 0x487   :  { %14263 = vmatprep.subr.bf16.mxu1 %v16517_v9  ;;  %5238 = vmatmul.mubr.f32.vlgmr.msra.gmra.mrb[22].mxu0 %v18492_v7  ;;  %v18493_v9 = vand.u32 4294901760, %v18456_v15  ;;  %v18501_v15 = vld [vmem:[#allocation29_spill] sm:$0xff] }
 0x488   :  { %14169 = vmatpush1.bf16.msra.mxu0 %v16523_v3  ;;  %5356 = vmatprep.mubr.f32.mxu0 %v18425_v28  ;;  %v4794_v11 = vadd.f32 %v18501_v15, %v16623_v10 }
 0x489   :  { %5885 = vmatmul.mubr.f32.vlgmr.msra.gmra.mrb[22].mxu1 %v18492_v7  ;;  %14171 = vmatprep.subr.bf16.mxu0 %v16535_v2  ;;  %v14178_v3 = vpack.c.bf16 %v18494_v37, %v18493_v9  ;;  %v18496_v2 = vand.u32 4294901760, %v18463_v26 }
 0x48a   :  { %14265 = vmatpush1.bf16.msra.mxu1 %v16529_v27  ;;  %6003 = vmatprep.mubr.f32.mxu1 %v18425_v28  ;;  %v18495_v27 = vand.u32 4294901760, %v18462_v32  ;;  %v4795_v41 = vrot.slane %v4794_v11, 4 }
 0x48b   :  { %14267 = vmatprep.subr.bf16.mxu1 %v16541_v53 }
 0x48c   :  { %14173 = vmatpush1.bf16.msra.mxu0 %v16547_v25  ;;  %v14274_v53 = vpack.c.bf16 %v18496_v2, %v18495_v27  ;;  %v18497_v25 = vand.u32 4294901760, %v18465_v12  ;;  %v4796_v26 = vadd.f32 %v4795_v41, %v4794_v11  ;;  %v7041_v41 = vld [vmem:[#allocation2 + $0x20] sm:$0xff] }
 0x48d   :  { %14175 = vmatprep.subr.bf16.mxu0 %v16560_v36 }
 0x48e   :  { %14269 = vmatpush1.bf16.msra.mxu1 %v16553_v4  ;;  %v18498_v4 = vand.u32 4294901760, %v18466_v22  ;;  %v4797_v12 = vrot.slane %v4796_v26, 2 }
 0x48f   :  { %14271 = vmatprep.subr.bf16.mxu1 %v16566_v1  ;;  %v18499_v1 = vld [vmem:[#allocation26_spill] sm:$0xff] }
 0x490   :  { %14177 = vmatpush1.bf16.msra.mxu0 %v16572_v34  ;;  %v14180_v36 = vpack.c.bf16 %v18498_v4, %v18497_v25  ;;  %v4755_v34 = vadd.f32 %v18499_v1, %v16616_v59  ;;  %v4798_v6 = vadd.f32 %v4797_v12, %v4796_v26  ;;  %v6108_v59 = vsel %vm83_vm0, %v70_v5, 0 }
 0x491   :  { %14179 = vmatprep.subr.bf16.mxu0 %v14178_v3 }
 0x492   :  { %14273 = vmatpush1.bf16.msra.mxu1 %v16579_v29  ;;  %v18500_v29 = vld [vmem:[#allocation28_spill] sm:$0xff]  ;;  %v4756_v21 = vrot.slane %v4755_v34, 4  ;;  %v4799_v48 = vrot.slane %v4798_v6, 1 }
 0x493   :  { %14275 = vmatprep.subr.bf16.mxu1 %v14274_v53 }
 0x494   :  { %14181 = vmatpush1.bf16.msra.mxu0 %v14180_v36  ;;  %v4757_v57 = vadd.f32 %v4756_v21, %v4755_v34  ;;  %v4800_v24 = vadd.f32 %v4799_v48, %v4798_v6  ;;  %v7042_v21 = vld [vmem:[#allocation2 + $0x28] sm:$0xff] }
 0x495   :  { %14183 = vmatprep.subr.bf16.mxu0 %v18474_v39 }
 0x496   :  { %14277 = vmatpush1.bf16.msra.mxu1 %v16582_v60  ;;  %v4768_v60 = vadd.f32 %v18500_v29, %v16620_v51  ;;  %v4758_v38 = vrot.slane %v4757_v57, 2  ;;  %v16713_v51 = vand.u32 4294901760, %v6108_v59 }
 0x497   :  { %14279 = vmatprep.subr.bf16.mxu1 %v18476_v55  ;;  %5358 = vmatmul.mubr.f32.vlgmr.msra.gmra.mrb[22].mxu0 %v15991_v13 }
 0x498   :  { %14185 = vmatpush1.bf16.msra.mxu0 %v18478_v46  ;;  %5444 = vmatprep.mubr.f32.mxu0 %v18425_v28  ;;  %v4769_v58 = vrot.slane %v4768_v60, 4  ;;  %v4759_v22 = vadd.f32 %v4758_v38, %v4757_v57  ;;  %18502 = vst [vmem:[#allocation35_spill] sm:$0xff] %v16713_v51  ;;  %v16716_v10 = vsub.f32 %v6108_v59, %v16713_v51 }
 0x499   :  { %6005 = vmatmul.mubr.f32.vlgmr.msra.gmra.mrb[22].mxu1 %v15991_v13  ;;  %14187 = vmatprep.subr.bf16.mxu0 %v18479_v33 }
 0x49a   :  { %14281 = vmatpush1.bf16.msra.mxu1 %v18480_v23  ;;  %6091 = vmatprep.mubr.f32.mxu1 %v18425_v28  ;;  %v4770_v32 = vadd.f32 %v4769_v58, %v4768_v60  ;;  %v4760_v14 = vrot.slane %v4759_v22, 1  ;;  %18503 = vst [vmem:[#allocation38_spill] sm:$0xff] %v16716_v10  ;;  %v16719_v39 = vand.u32 4294901760, %v16716_v10  ;;  %v7044_v58 = vld [vmem:[#allocation2 + $0x38] sm:$0xff] }
 0x49b   :  { %14283 = vmatprep.subr.bf16.mxu1 %v18481_v45  ;;  %v16750_v57 = vand.u32 4294901760, %v7044_v58 }
 0x49c   :  { %14189 = vmatpush1.bf16.msra.mxu0 %v18482_v49  ;;  %v4771_v19 = vrot.slane %v4770_v32, 2  ;;  %v4761_v30 = vadd.f32 %v4760_v14, %v4759_v22  ;;  %18504 = vst [vmem:[#allocation42_spill] sm:$0xff] %v16719_v39  ;;  %v6180_v55 = vsub.f32 %v16716_v10, %v16719_v39 }
 0x49d   :  { %14191 = vmatprep.subr.bf16.mxu0 %v18483_v0 }
 0x49e   :  { %14285 = vmatpush1.bf16.msra.mxu1 %v18484_v50  ;;  %v4772_v8 = vadd.f32 %v4771_v19, %v4770_v32  ;;  %15081 = vrcp.f32 %v4761_v30  ;;  %v7043_v32 = vld [vmem:[#allocation2 + $0x30] sm:$0xff]  ;;  %v7599_v19 = vsub.f32 %v7044_v58, %v16750_v57 }
 0x49f   :  { %14287 = vmatprep.subr.bf16.mxu1 %v18485_v18  ;;  %v16758_v38 = vand.u32 4294901760, %v7043_v32 }
 0x4a0   :  { %14193 = vmatpush1.bf16.msra.mxu0 %v18486_v47  ;;  %v4773_v61 = vrot.slane %v4772_v8, 1 }
 0x4a1   :  { %14195 = vmatprep.subr.bf16.mxu0 %v18487_v56  ;;  %v16763_v22 = vsub.f32 %v7043_v32, %v16758_v38 }
 0x4a2   :  { %14289 = vmatpush1.bf16.msra.mxu1 %v18488_v43  ;;  %v4774_v16 = vadd.f32 %v4773_v61, %v4772_v8  ;;  %v7600_v8 = vand.u32 4294901760, %v7599_v19 }
 0x4a3   :  { %14291 = vmatprep.subr.bf16.mxu1 %v18489_v17  ;;  %v16725_v17 = vand.u32 4294901760, %v6180_v55  ;;  %v7606_v14 = vand.u32 4294901760, %v16763_v22  ;;  %v7049_v55 = vld [vmem:[#allocation5 + $0x38] sm:$0xff] }
 0x4a4   :  { %14197 = vmatpush1.bf16.msra.mxu0 %v18490_v31  ;;  %15083 = vrcp.f32 %v4774_v16  ;;  %v7601_v5 = vsub.f32 %v7599_v19, %v7600_v8 }
 0x4a5   :  { %18505 = vst [vmem:[#allocation44_spill] sm:$0xff] %v16725_v17  ;;  %v7607_v48 = vsub.f32 %v16763_v22, %v7606_v14 }
 0x4a6   :  { %14293 = vmatpush1.bf16.msra.mxu1 %v18491_v54  ;;  %v7602_v59 = vand.u32 4294901760, %v7601_v5 }
 0x4a7   :  { %5446 = vmatmul.mubr.f32.vlgmr.msra.gmra.mrb[22].mxu0 %v15991_v13  ;;  %v7608_v16 = vand.u32 4294901760, %v7607_v48 }
 0x4a8   :  { %6176 = vmatprep.mubr.f32.mxu0 %v18425_v28  ;;  %v15082_v40 = vpop.eup %15081 }
 0x4a9   :  { %6093 = vmatmul.mubr.f32.vlgmr.msra.gmra.mrb[22].mxu1 %v15991_v13  ;;  %v4783_v13 = vadd.f32 %v4782_v35, %v16627_v44  ;;  %v16747_v35 = vand.u32 4294901760, %v7042_v21 }
 0x4aa   :  { %6641 = vmatprep.mubr.f32.mxu1 %v18425_v28 }
 0x4ab   :  { %v4784_v20 = vrot.slane %v4783_v13, 2  ;;  %v7134_v26 = vsub.f32 %v7042_v21, %v16747_v35  ;;  %v18513_v21 = vld [vmem:[#allocation18_spill] sm:$0xff] }
 0x4ad   :  { %v4785_v62 = vadd.f32 %v4784_v20, %v4783_v13  ;;  %v16753_v13 = vand.u32 4294901760, %v7041_v41  ;;  %v7135_v12 = vand.u32 4294901760, %v7134_v26 }
 0x4ae   :  { %v15084_v52 = vpop.eup %15083 }
 0x4af   :  { %v4786_v42 = vrot.slane %v4785_v62, 1  ;;  %v7140_v20 = vsub.f32 %v7041_v41, %v16753_v13  ;;  %v7136_v6 = vsub.f32 %v7134_v26, %v7135_v12 }
 0x4b1   :  { %v4787_v63 = vadd.f32 %v4786_v42, %v4785_v62  ;;  %v7141_v62 = vand.u32 4294901760, %v7140_v20  ;;  %v7137_v42 = vand.u32 4294901760, %v7136_v6 }
 0x4b3   :  { %15085 = vrcp.f32 %v4787_v63  ;;  %v7142_v61 = vsub.f32 %v7140_v20, %v7141_v62  ;;  %v18506_v63 = vld [vmem:[#allocation15_spill] sm:$0xff] }
 0x4b4   :  { %15087 = vrcp.f32 %v4800_v24  ;;  %v18507_v24 = vld [vmem:[#allocation12_spill] sm:$0xff] }
 0x4b5   :  { %v7143_v30 = vand.u32 4294901760, %v7142_v61 }
 0x4bd   :  { %v15086_v23 = vpop.eup %15085 }
 0x4be   :  { %v15088_v0 = vpop.eup %15087 }
 0x57a   :  { %v5447_v44 = vpop.f32.mrb[22].mxu0 }
 0x57b   :  { %v6100_v46 = vmul.f32 %v15082_v40, %v5447_v44  ;;  %v5449_v33 = vpop.f32.mrb[23].mxu0  ;;  %v18508_v40 = vld [vmem:[#allocation13_spill] sm:$0xff] }
 0x57c   :  { %v6094_v45 = vpop.f32.mrb[22].mxu1  ;;  %v6102_v49 = vmul.f32 %v15084_v52, %v5449_v33  ;;  %v7047_v44 = vld [vmem:[#allocation5 + $0x28] sm:$0xff]  ;;  %v18509_v33 = vld [vmem:[#allocation14_spill] sm:$0xff] }
 0x57d   :  { %v16723_v50 = vand.u32 4294901760, %v6100_v46  ;;  %v6104_v18 = vmul.f32 %v15086_v23, %v6094_v45  ;;  %v6096_v47 = vpop.f32.mrb[23].mxu1  ;;  %v16798_v52 = vand.u32 4294901760, %v7047_v44  ;;  %v16801_v23 = vand.u32 4294901760, %v7049_v55  ;;  %v7048_v45 = vld [vmem:[#allocation5 + $0x30] sm:$0xff] }
 0x57e   :  { %v6110_v56 = vand.u32 4294901760, %v6102_v49  ;;  %v6106_v43 = vmul.f32 %v15088_v0, %v6096_v47 }
 0x57f   :  { %v6195_v31 = vsub.f32 %v6100_v46, %v16723_v50  ;;  %v16728_v54 = vand.u32 4294901760, %v6104_v18  ;;  %v7046_v46 = vld [vmem:[#allocation5 + $0x20] sm:$0xff]  ;;  %v8064_v0 = vsub.f32 %v7047_v44, %v16798_v52 }
 0x580   :  { %v6189_v7 = vsub.f32 %v6102_v49, %v6110_v56  ;;  %v6575_v9 = vand.u32 4294901760, %v6106_v43  ;;  %6111 = vmatprep.subr.mxu0 %v6110_v56  ;;  %v16804_v49 = vand.u32 4294901760, %v7046_v46 }
 0x581   :  { %v6196_v37 = vand.u32 4294901760, %v6195_v31  ;;  %v6660_v3 = vsub.f32 %v6104_v18, %v16728_v54  ;;  %6113 = vmatpush1.msra.mxu0 %v16723_v50  ;;  %v8529_v18 = vsub.f32 %v7049_v55, %v16801_v23 }
 0x582   :  { %v6654_v27 = vsub.f32 %v6106_v43, %v6575_v9  ;;  %6576 = vmatprep.subr.mxu1 %v6575_v9  ;;  %6182 = vmatmul.mubr.f32.vlgmr.msra.gmra.mrb[24].mxu0 %v16725_v17  ;;  %v6190_v2 = vand.u32 4294901760, %v6189_v7  ;;  %v8070_v47 = vsub.f32 %v7046_v46, %v16804_v49 }
 0x583   :  { %v6197_v53 = vsub.f32 %v6195_v31, %v6196_v37  ;;  %v6661_v25 = vand.u32 4294901760, %v6660_v3  ;;  %6578 = vmatpush1.msra.mxu1 %v16728_v54  ;;  %6262 = vmatprep.mubr.f32.mxu0 %v18425_v28 }
 0x584   :  { %6647 = vmatmul.mubr.f32.vlgmr.msra.gmra.mrb[24].mxu1 %v16725_v17  ;;  %v6191_v4 = vsub.f32 %v6189_v7, %v6190_v2  ;;  %v6655_v36 = vand.u32 4294901760, %v6654_v27 }
 0x585   :  { %v6662_v1 = vsub.f32 %v6660_v3, %v6661_v25  ;;  %6727 = vmatprep.mubr.f32.mxu1 %v18425_v28  ;;  %v6198_v60 = vand.u32 4294901760, %v6197_v53 }
 0x586   :  { %v6192_v34 = vand.u32 4294901760, %v6191_v4  ;;  %v6656_v29 = vsub.f32 %v6654_v27, %v6655_v36 }
 0x587   :  { %v6663_v11 = vand.u32 4294901760, %v6662_v1  ;;  %v18511_v1 = vld [vmem:[#allocation16_spill] sm:$0xff] }
 0x588   :  { %6193 = vmatprep.subr.mxu0 %v6192_v34  ;;  %v6657_v15 = vand.u32 4294901760, %v6656_v29  ;;  %v18512_v34 = vld [vmem:[#allocation17_spill] sm:$0xff] }
 0x589   :  { %6199 = vmatpush1.msra.mxu0 %v6198_v60  ;;  %v7052_v29 = vld [vmem:[#allocation7 + $0x28] sm:$0xff]  ;;  %v7054_v60 = vld [vmem:[#allocation7 + $0x38] sm:$0xff] }
 0x58a   :  { %6658 = vmatprep.subr.mxu1 %v6657_v15  ;;  %6264 = vmatmul.mubr.f32.vlgmr.msra.gmra.mrb[24].mxu0 %v16713_v51  ;;  %v16851_v15 = vand.u32 4294901760, %v7052_v29  ;;  %v16854_v58 = vand.u32 4294901760, %v7054_v60 }
 0x58b   :  { %6664 = vmatpush1.msra.mxu1 %v6663_v11  ;;  %6272 = vmatprep.subr.mxu0 %v6189_v7  ;;  %v7051_v11 = vld [vmem:[#allocation7 + $0x20] sm:$0xff] }
 0x58c   :  { %6729 = vmatmul.mubr.f32.vlgmr.msra.gmra.mrb[24].mxu1 %v16713_v51  ;;  %6737 = vmatprep.subr.mxu1 %v6654_v27  ;;  %v16857_v41 = vand.u32 4294901760, %v7051_v11 }
 0x58d   :  { %6275 = vmatpush1.msra.mxu0 %v6195_v31  ;;  %6740 = vmatpush1.msra.mxu1 %v6660_v3  ;;  %v8530_v31 = vand.u32 4294901760, %v8529_v18 }
 0x58e   :  { %6348 = vmatprep.subr.mxu0 %v6110_v56  ;;  %6813 = vmatprep.subr.mxu1 %v6575_v9 }
 0x58f   :  { %6338 = vmatprep.mubr.f32.mxu0 %v18425_v28  ;;  %6803 = vmatprep.mubr.f32.mxu1 %v18425_v28 }
 0x592   :  { %6341 = vmatmul.mubr.f32.vlgmr.msra.gmra.mrb[24].mxu0 %v16716_v10 }
 0x593   :  { %6350 = vmatpush1.msra.mxu0 %v16723_v50  ;;  %6413 = vmatprep.mubr.f32.mxu0 %v18425_v28 }
 0x594   :  { %6806 = vmatmul.mubr.f32.vlgmr.msra.gmra.mrb[24].mxu1 %v16716_v10  ;;  %6426 = vmatprep.subr.mxu0 %v6190_v2 }
 0x595   :  { %6815 = vmatpush1.msra.mxu1 %v16728_v54  ;;  %6878 = vmatprep.mubr.f32.mxu1 %v18425_v28 }
 0x596   :  { %6891 = vmatprep.subr.mxu1 %v6655_v36  ;;  %v18510_v36 = vld [vmem:[#allocation19_spill] sm:$0xff] }
 0x59a   :  { %6417 = vmatmul.mubr.f32.vlgmr.msra.gmra.mrb[24].mxu0 %v16719_v39 }
 0x59b   :  { %6430 = vmatpush1.msra.mxu0 %v6196_v37  ;;  %6493 = vmatprep.mubr.f32.mxu0 %v18425_v28  ;;  %v8531_v37 = vsub.f32 %v8529_v18, %v8530_v31 }
 0x59c   :  { %6882 = vmatmul.mubr.f32.vlgmr.msra.gmra.mrb[24].mxu1 %v16719_v39  ;;  %6502 = vmatprep.subr.mxu0 %v6110_v56  ;;  %v8065_v56 = vand.u32 4294901760, %v8064_v0 }
 0x59d   :  { %6895 = vmatpush1.msra.mxu1 %v6661_v25  ;;  %6958 = vmatprep.mubr.f32.mxu1 %v18425_v28  ;;  %v8532_v53 = vand.u32 4294901760, %v8531_v37 }
 0x59e   :  { %6967 = vmatprep.subr.mxu1 %v6575_v9  ;;  %v8066_v7 = vsub.f32 %v8064_v0, %v8065_v56 }
 0x5a0   :  { %v8067_v27 = vand.u32 4294901760, %v8066_v7 }
 0x5a2   :  { %6495 = vmatmul.mubr.f32.vlgmr.msra.gmra.mrb[24].mxu0 %v16713_v51 }
 0x5a3   :  { %6504 = vmatpush1.msra.mxu0 %v16723_v50  ;;  %6567 = vmatprep.mubr.f32.mxu0 %v18425_v28  ;;  %v16810_v50 = vand.u32 4294901760, %v7048_v45 }
 0x5a4   :  { %6960 = vmatmul.mubr.f32.vlgmr.msra.gmra.mrb[24].mxu1 %v16713_v51  ;;  %7056 = vmatprep.subr.mxu0 %v16747_v35 }
 0x5a5   :  { %6969 = vmatpush1.msra.mxu1 %v16728_v54  ;;  %7032 = vmatprep.mubr.f32.mxu1 %v18425_v28  ;;  %v16816_v43 = vsub.f32 %v7048_v45, %v16810_v50  ;;  %v8071_v54 = vand.u32 4294901760, %v8070_v47 }
 0x5a6   :  { %7521 = vmatprep.subr.mxu1 %v16750_v57 }
 0x5a7   :  { %v8536_v9 = vand.u32 4294901760, %v16816_v43  ;;  %v8072_v3 = vsub.f32 %v8070_v47, %v8071_v54 }
 0x5a9   :  { %v8537_v2 = vsub.f32 %v16816_v43, %v8536_v9  ;;  %v8073_v25 = vand.u32 4294901760, %v8072_v3 }
 0x5aa   :  { %6569 = vmatmul.mubr.f32.vlgmr.msra.gmra.mrb[24].mxu0 %v16713_v51 }
 0x5ab   :  { %7058 = vmatpush1.msra.mxu0 %v16753_v13  ;;  %7121 = vmatprep.mubr.f32.mxu0 %v18425_v28  ;;  %v8538_v4 = vand.u32 4294901760, %v8537_v2 }
 0x5ac   :  { %7034 = vmatmul.mubr.f32.vlgmr.msra.gmra.mrb[24].mxu1 %v16713_v51  ;;  %7138 = vmatprep.subr.mxu0 %v7137_v42 }
 0x5ad   :  { %7523 = vmatpush1.msra.mxu1 %v16758_v38  ;;  %7586 = vmatprep.mubr.f32.mxu1 %v18425_v28 }
 0x5ae   :  { %7127 = vmatmul.mubr.f32.vlgmr.msra.gmra.mrb[26].mxu0 %v18506_v63  ;;  %7603 = vmatprep.subr.mxu1 %v7602_v59  ;;  %v18514_v59 = vld [vmem:[#allocation23_spill] sm:$0xff] }
 0x5af   :  { %7144 = vmatpush1.msra.mxu0 %v7143_v30  ;;  %7207 = vmatprep.mubr.f32.mxu0 %v18425_v28  ;;  %v18515_v30 = vld [vmem:[#allocation20_spill] sm:$0xff] }
 0x5b0   :  { %7592 = vmatmul.mubr.f32.vlgmr.msra.gmra.mrb[26].mxu1 %v18506_v63  ;;  %7217 = vmatprep.subr.mxu0 %v7134_v26  ;;  %v9023_v26 = vsub.f32 %v7051_v11, %v16857_v41  ;;  %v18517_v63 = vld [vmem:[#allocation22_spill] sm:$0xff] }
 0x5b1   :  { %7609 = vmatpush1.msra.mxu1 %v7608_v16  ;;  %7672 = vmatprep.mubr.f32.mxu1 %v18425_v28  ;;  %v18516_v16 = vld [vmem:[#allocation21_spill] sm:$0xff] }
 0x5b2   :  { %7682 = vmatprep.subr.mxu1 %v7599_v19 }
 0x5b6   :  { %7209 = vmatmul.mubr.f32.vlgmr.msra.gmra.mrb[26].mxu0 %v18507_v24 }
 0x5b7   :  { %7220 = vmatpush1.msra.mxu0 %v7140_v20  ;;  %7283 = vmatprep.mubr.f32.mxu0 %v18425_v28 }
 0x5b8   :  { %7674 = vmatmul.mubr.f32.vlgmr.msra.gmra.mrb[26].mxu1 %v18507_v24  ;;  %7293 = vmatprep.subr.mxu0 %v16747_v35 }
 0x5b9   :  { %7685 = vmatpush1.msra.mxu1 %v16763_v22  ;;  %7748 = vmatprep.mubr.f32.mxu1 %v18425_v28 }
 0x5ba   :  { %7758 = vmatprep.subr.mxu1 %v16750_v57 }
 0x5be   :  { %7286 = vmatmul.mubr.f32.vlgmr.msra.gmra.mrb[26].mxu0 %v18508_v40 }
 0x5bf   :  { %7295 = vmatpush1.msra.mxu0 %v16753_v13  ;;  %7358 = vmatprep.mubr.f32.mxu0 %v18425_v28 }
 0x5c0   :  { %7751 = vmatmul.mubr.f32.vlgmr.msra.gmra.mrb[26].mxu1 %v18508_v40  ;;  %7371 = vmatprep.subr.mxu0 %v7135_v12  ;;  %v9024_v12 = vand.u32 4294901760, %v9023_v26 }
 0x5c1   :  { %7760 = vmatpush1.msra.mxu1 %v16758_v38  ;;  %7823 = vmatprep.mubr.f32.mxu1 %v18425_v28 }
 0x5c2   :  { %7836 = vmatprep.subr.mxu1 %v7600_v8  ;;  %v9025_v6 = vsub.f32 %v9023_v26, %v9024_v12 }
 0x5c4   :  { %v9026_v42 = vand.u32 4294901760, %v9025_v6 }
 0x5c6   :  { %7362 = vmatmul.mubr.f32.vlgmr.msra.gmra.mrb[26].mxu0 %v18509_v33 }
 0x5c7   :  { %7375 = vmatpush1.msra.mxu0 %v7141_v62  ;;  %7438 = vmatprep.mubr.f32.mxu0 %v18425_v28 }
 0x5c8   :  { %7827 = vmatmul.mubr.f32.vlgmr.msra.gmra.mrb[26].mxu1 %v18509_v33  ;;  %7447 = vmatprep.subr.mxu0 %v16747_v35  ;;  %v7053_v35 = vld [vmem:[#allocation7 + $0x30] sm:$0xff] }
 0x5c9   :  { %7840 = vmatpush1.msra.mxu1 %v7606_v14  ;;  %7903 = vmatprep.mubr.f32.mxu1 %v18425_v28  ;;  %v16863_v32 = vand.u32 4294901760, %v7053_v35 }
 0x5ca   :  { %7912 = vmatprep.subr.mxu1 %v16750_v57  ;;  %v9017_v57 = vsub.f32 %v7052_v29, %v16851_v15 }
 0x5cb   :  { %v9488_v19 = vsub.f32 %v7053_v35, %v16863_v32 }
 0x5cd   :  { %v9489_v8 = vand.u32 4294901760, %v9488_v19 }
 0x5ce   :  { %7440 = vmatmul.mubr.f32.vlgmr.msra.gmra.mrb[26].mxu0 %v18507_v24 }
 0x5cf   :  { %7449 = vmatpush1.msra.mxu0 %v16753_v13  ;;  %7512 = vmatprep.mubr.f32.mxu0 %v18425_v28  ;;  %v9482_v13 = vsub.f32 %v7054_v60, %v16854_v58  ;;  %v9490_v5 = vsub.f32 %v9488_v19, %v9489_v8 }
 0x5d0   :  { %7905 = vmatmul.mubr.f32.vlgmr.msra.gmra.mrb[26].mxu1 %v18507_v24  ;;  %7986 = vmatprep.subr.mxu0 %v16798_v52 }
 0x5d1   :  { %7914 = vmatpush1.msra.mxu1 %v16758_v38  ;;  %7977 = vmatprep.mubr.f32.mxu1 %v18425_v28  ;;  %v9018_v38 = vand.u32 4294901760, %v9017_v57  ;;  %v9483_v20 = vand.u32 4294901760, %v9482_v13  ;;  %v9491_v48 = vand.u32 4294901760, %v9490_v5 }
 0x5d2   :  { %8451 = vmatprep.subr.mxu1 %v16801_v23 }
 0x5d3   :  { %v9019_v22 = vsub.f32 %v9017_v57, %v9018_v38  ;;  %v9484_v62 = vsub.f32 %v9482_v13, %v9483_v20 }
 0x5d5   :  { %v9020_v14 = vand.u32 4294901760, %v9019_v22  ;;  %v9485_v61 = vand.u32 4294901760, %v9484_v62 }
 0x5d6   :  { %7514 = vmatmul.mubr.f32.vlgmr.msra.gmra.mrb[26].mxu0 %v18507_v24 }
 0x5d7   :  { %7988 = vmatpush1.msra.mxu0 %v16804_v49  ;;  %8051 = vmatprep.mubr.f32.mxu0 %v18425_v28 }
 0x5d8   :  { %7979 = vmatmul.mubr.f32.vlgmr.msra.gmra.mrb[26].mxu1 %v18507_v24  ;;  %8068 = vmatprep.subr.mxu0 %v8067_v27 }
 0x5d9   :  { %8453 = vmatpush1.msra.mxu1 %v16810_v50  ;;  %8516 = vmatprep.mubr.f32.mxu1 %v18425_v28 }
 0x5da   :  { %8057 = vmatmul.mubr.f32.vlgmr.msra.gmra.mrb[28].mxu0 %v18510_v36  ;;  %8533 = vmatprep.subr.mxu1 %v8532_v53 }
 0x5db   :  { %8074 = vmatpush1.msra.mxu0 %v8073_v25  ;;  %8137 = vmatprep.mubr.f32.mxu0 %v18425_v28 }
 0x5dc   :  { %8522 = vmatmul.mubr.f32.vlgmr.msra.gmra.mrb[28].mxu1 %v18510_v36  ;;  %8147 = vmatprep.subr.mxu0 %v8064_v0 }
 0x5dd   :  { %8539 = vmatpush1.msra.mxu1 %v8538_v4  ;;  %8602 = vmatprep.mubr.f32.mxu1 %v18425_v28 }
 0x5de   :  { %8612 = vmatprep.subr.mxu1 %v8529_v18 }
 0x5e2   :  { %8139 = vmatmul.mubr.f32.vlgmr.msra.gmra.mrb[28].mxu0 %v18511_v1 }
 0x5e3   :  { %8150 = vmatpush1.msra.mxu0 %v8070_v47  ;;  %8213 = vmatprep.mubr.f32.mxu0 %v18425_v28 }
 0x5e4   :  { %8604 = vmatmul.mubr.f32.vlgmr.msra.gmra.mrb[28].mxu1 %v18511_v1  ;;  %8223 = vmatprep.subr.mxu0 %v16798_v52 }
 0x5e5   :  { %8615 = vmatpush1.msra.mxu1 %v16816_v43  ;;  %8678 = vmatprep.mubr.f32.mxu1 %v18425_v28 }
 0x5e6   :  { %8688 = vmatprep.subr.mxu1 %v16801_v23 }
 0x5ea   :  { %8216 = vmatmul.mubr.f32.vlgmr.msra.gmra.mrb[28].mxu0 %v18512_v34 }
 0x5eb   :  { %8225 = vmatpush1.msra.mxu0 %v16804_v49  ;;  %8288 = vmatprep.mubr.f32.mxu0 %v18425_v28 }
 0x5ec   :  { %8681 = vmatmul.mubr.f32.vlgmr.msra.gmra.mrb[28].mxu1 %v18512_v34  ;;  %8301 = vmatprep.subr.mxu0 %v8065_v56 }
 0x5ed   :  { %8690 = vmatpush1.msra.mxu1 %v16810_v50  ;;  %8753 = vmatprep.mubr.f32.mxu1 %v18425_v28 }
 0x5ee   :  { %8766 = vmatprep.subr.mxu1 %v8530_v31 }
 0x5f2   :  { %8292 = vmatmul.mubr.f32.vlgmr.msra.gmra.mrb[28].mxu0 %v18513_v21 }
 0x5f3   :  { %8305 = vmatpush1.msra.mxu0 %v8071_v54  ;;  %8368 = vmatprep.mubr.f32.mxu0 %v18425_v28 }
 0x5f4   :  { %8757 = vmatmul.mubr.f32.vlgmr.msra.gmra.mrb[28].mxu1 %v18513_v21  ;;  %8377 = vmatprep.subr.mxu0 %v16798_v52 }
 0x5f5   :  { %8770 = vmatpush1.msra.mxu1 %v8536_v9  ;;  %8833 = vmatprep.mubr.f32.mxu1 %v18425_v28 }
 0x5f6   :  { %8842 = vmatprep.subr.mxu1 %v16801_v23 }
 0x5fa   :  { %8370 = vmatmul.mubr.f32.vlgmr.msra.gmra.mrb[28].mxu0 %v18511_v1 }
 0x5fb   :  { %8379 = vmatpush1.msra.mxu0 %v16804_v49  ;;  %8442 = vmatprep.mubr.f32.mxu0 %v18425_v28 }
 0x5fc   :  { %8835 = vmatmul.mubr.f32.vlgmr.msra.gmra.mrb[28].mxu1 %v18511_v1  ;;  %8939 = vmatprep.subr.mxu0 %v16851_v15 }
 0x5fd   :  { %8844 = vmatpush1.msra.mxu1 %v16810_v50  ;;  %8907 = vmatprep.mubr.f32.mxu1 %v18425_v28 }
 0x5fe   :  { %9404 = vmatprep.subr.mxu1 %v16854_v58 }
 0x602   :  { %8444 = vmatmul.mubr.f32.vlgmr.msra.gmra.mrb[28].mxu0 %v18511_v1 }
 0x603   :  { %8941 = vmatpush1.msra.mxu0 %v16857_v41  ;;  %9004 = vmatprep.mubr.f32.mxu0 %v18425_v28 }
 0x604   :  { %8909 = vmatmul.mubr.f32.vlgmr.msra.gmra.mrb[28].mxu1 %v18511_v1  ;;  %9021 = vmatprep.subr.mxu0 %v9020_v14 }
 0x605   :  { %9406 = vmatpush1.msra.mxu1 %v16863_v32  ;;  %9469 = vmatprep.mubr.f32.mxu1 %v18425_v28 }
 0x606   :  { %9010 = vmatmul.mubr.f32.vlgmr.msra.gmra.mrb[30].mxu0 %v18514_v59  ;;  %9486 = vmatprep.subr.mxu1 %v9485_v61 }
 0x607   :  { %9027 = vmatpush1.msra.mxu0 %v9026_v42  ;;  %9090 = vmatprep.mubr.f32.mxu0 %v18425_v28 }
 0x608   :  { %9475 = vmatmul.mubr.f32.vlgmr.msra.gmra.mrb[30].mxu1 %v18514_v59  ;;  %9100 = vmatprep.subr.mxu0 %v9017_v57 }
 0x609   :  { %9492 = vmatpush1.msra.mxu1 %v9491_v48  ;;  %9555 = vmatprep.mubr.f32.mxu1 %v18425_v28 }
 0x60a   :  { %9565 = vmatprep.subr.mxu1 %v9482_v13 }
 0x60e   :  { %9092 = vmatmul.mubr.f32.vlgmr.msra.gmra.mrb[30].mxu0 %v18515_v30 }
 0x60f   :  { %9103 = vmatpush1.msra.mxu0 %v9023_v26  ;;  %9166 = vmatprep.mubr.f32.mxu0 %v18425_v28 }
 0x610   :  { %9557 = vmatmul.mubr.f32.vlgmr.msra.gmra.mrb[30].mxu1 %v18515_v30  ;;  %9176 = vmatprep.subr.mxu0 %v16851_v15 }
 0x611   :  { %9568 = vmatpush1.msra.mxu1 %v9488_v19  ;;  %9631 = vmatprep.mubr.f32.mxu1 %v18425_v28 }
 0x612   :  { %9641 = vmatprep.subr.mxu1 %v16854_v58 }
 0x616   :  { %9169 = vmatmul.mubr.f32.vlgmr.msra.gmra.mrb[30].mxu0 %v18516_v16 }
 0x617   :  { %9178 = vmatpush1.msra.mxu0 %v16857_v41  ;;  %9241 = vmatprep.mubr.f32.mxu0 %v18425_v28 }
 0x618   :  { %9634 = vmatmul.mubr.f32.vlgmr.msra.gmra.mrb[30].mxu1 %v18516_v16  ;;  %9254 = vmatprep.subr.mxu0 %v9018_v38 }
 0x619   :  { %9643 = vmatpush1.msra.mxu1 %v16863_v32  ;;  %9706 = vmatprep.mubr.f32.mxu1 %v18425_v28 }
 0x61a   :  { %9719 = vmatprep.subr.mxu1 %v9483_v20 }
 0x61e   :  { %9245 = vmatmul.mubr.f32.vlgmr.msra.gmra.mrb[30].mxu0 %v18517_v63 }
 0x61f   :  { %9258 = vmatpush1.msra.mxu0 %v9024_v12  ;;  %9321 = vmatprep.mubr.f32.mxu0 %v18425_v28 }
 0x620   :  { %9710 = vmatmul.mubr.f32.vlgmr.msra.gmra.mrb[30].mxu1 %v18517_v63  ;;  %9330 = vmatprep.subr.mxu0 %v16851_v15 }
 0x621   :  { %9723 = vmatpush1.msra.mxu1 %v9489_v8  ;;  %9786 = vmatprep.mubr.f32.mxu1 %v18425_v28 }
 0x622   :  { %9795 = vmatprep.subr.mxu1 %v16854_v58 }
 0x626   :  { %9323 = vmatmul.mubr.f32.vlgmr.msra.gmra.mrb[30].mxu0 %v18515_v30 }
 0x627   :  { %9332 = vmatpush1.msra.mxu0 %v16857_v41  ;;  %9395 = vmatprep.mubr.f32.mxu0 %v18425_v28 }
 0x628   :  { %9788 = vmatmul.mubr.f32.vlgmr.msra.gmra.mrb[30].mxu1 %v18515_v30 }
 0x629   :  { %9797 = vmatpush1.msra.mxu1 %v16863_v32  ;;  %9860 = vmatprep.mubr.f32.mxu1 %v18425_v28 }
 0x62e   :  { %9397 = vmatmul.mubr.f32.vlgmr.msra.gmra.mrb[30].mxu0 %v18515_v30 }
 0x62f   :  { %10013 = vmatprep.mubr.f32.mxu0 %v18425_v28 }
 0x630   :  { %9862 = vmatmul.mubr.f32.vlgmr.msra.gmra.mrb[30].mxu1 %v18515_v30 }
 0x631   :  { %10821 = vmatprep.mubr.f32.mxu1 %v18425_v28 }
 0x67d   :  { %v16915_v24 = vpop.f32.mrb[24].mxu0 }
 0x67e   :  { %18518 = vst [vmem:[#allocation37_spill] sm:$0xff] %v16915_v24  ;;  %v16917_v40 = vpop.f32.mrb[25].mxu0 }
 0x67f   :  { %18519 = vst [vmem:[#allocation40_spill] sm:$0xff] %v16917_v40  ;;  %v16919_v44 = vpop.f32.mrb[24].mxu1  ;;  %v13998_v55 = vadd.f32 %v16917_v40, %v16915_v24 }
 0x680   :  { %18520 = vst [vmem:[#allocation64_spill] sm:$0xff] %v16919_v44  ;;  %v16923_v52 = vpop.f32.mrb[25].mxu1 }
 0x681   :  { %18521 = vst [vmem:[#allocation30_spill] sm:$0xff] %v16923_v52  ;;  %v13999_v46 = vadd.f32 %v13998_v55, %v16919_v44 }
 0x683   :  { %v14000_v33 = vadd.f32 %v13999_v46, %v16923_v52 }
 0x6a9   :  { %v7515_v23 = vpop.f32.mrb[26].mxu0 }
 0x6aa   :  { %v7517_v45 = vpop.f32.mrb[27].mxu0  ;;  %v16929_v50 = vand.u32 4294901760, %v7515_v23 }
 0x6ab   :  { %v7980_v49 = vpop.f32.mrb[26].mxu1  ;;  %v16927_v0 = vand.u32 4294901760, %v7517_v45 }
 0x6ac   :  { %v7982_v18 = vpop.f32.mrb[27].mxu1  ;;  %v16937_v43 = vand.u32 4294901760, %v7980_v49  ;;  %v16964_v5 = vsub.f32 %v7515_v23, %v16929_v50 }
 0x6ad   :  { %v16932_v47 = vsub.f32 %v7517_v45, %v16927_v0  ;;  %v16934_v56 = vand.u32 4294901760, %v7982_v18  ;;  %9948 = vmatprep.subr.mxu0 %v16927_v0 }
 0x6ae   :  { %9950 = vmatpush1.msra.mxu0 %v16929_v50  ;;  %v16967_v61 = vsub.f32 %v7980_v49, %v16937_v43  ;;  %v10110_v30 = vand.u32 4294901760, %v16964_v5 }
 0x6af   :  { %v10104_v31 = vand.u32 4294901760, %v16932_v47  ;;  %v16942_v54 = vsub.f32 %v7982_v18, %v16934_v56  ;;  %10756 = vmatprep.subr.mxu1 %v16934_v56 }
 0x6b0   :  { %10758 = vmatpush1.msra.mxu1 %v16937_v43  ;;  %v10918_v16 = vand.u32 4294901760, %v16967_v61  ;;  %v10111_v45 = vsub.f32 %v16964_v5, %v10110_v30 }
 0x6b1   :  { %v10912_v7 = vand.u32 4294901760, %v16942_v54  ;;  %v10105_v9 = vsub.f32 %v16932_v47, %v10104_v31 }
 0x6b2   :  { %v10919_v49 = vsub.f32 %v16967_v61, %v10918_v16 }
 0x6b3   :  { %v10106_v37 = vand.u32 4294901760, %v10105_v9  ;;  %v10913_v3 = vsub.f32 %v16942_v54, %v10912_v7 }
 0x6b5   :  { %10107 = vmatprep.subr.mxu0 %v10106_v37  ;;  %v10914_v27 = vand.u32 4294901760, %v10913_v3 }
 0x6b7   :  { %10915 = vmatprep.subr.mxu1 %v10914_v27 }
 0x6d5   :  { %v8445_v2 = vpop.f32.mrb[28].mxu0 }
 0x6d6   :  { %8916 = vrot.lane.b32.xlu1 %v8445_v2, %s15263_s3  ;;  %v8447_v53 = vpop.f32.mrb[29].mxu0 }
 0x6d7   :  { %v8910_v25 = vpop.f32.mrb[28].mxu1 }
 0x6d8   :  { %v8912_v4 = vpop.f32.mrb[29].mxu1 }
 0x6da   :  { %8922 = vrot.lane.b32.xlu1 %v8447_v53, %s15263_s3 }
 0x6de   :  { %8928 = vrot.lane.b32.xlu1 %v8910_v25, %s15263_s3 }
 0x6e2   :  { %8934 = vrot.lane.b32.xlu1 %v8912_v4, %s15263_s3 }
 0x701   :  { %v9398_v36 = vpop.f32.mrb[30].mxu0 }
 0x702   :  { %9869 = vrot.lane.b32.xlu1 %v9398_v36, %s15263_s3  ;;  %v9400_v1 = vpop.f32.mrb[31].mxu0 }
 0x703   :  { %v9863_v34 = vpop.f32.mrb[30].mxu1 }
 0x704   :  { %v9865_v29 = vpop.f32.mrb[31].mxu1 }
 0x706   :  { %9875 = vrot.lane.b32.xlu1 %v9400_v1, %s15263_s3 }
 0x70a   :  { %9881 = vrot.lane.b32.xlu1 %v9863_v34, %s15263_s3 }
 0x70e   :  { %9887 = vrot.lane.b32.xlu1 %v9865_v29, %s15263_s3 }
 0x732   :  { %14001 = vadd.xlane.f32.xlu1 %v14000_v33 }
 0x748   :  { %v8917_v60 = vpop.permute.xlu1 %8916 }
 0x749   :  { %v8919_v15 = vmax.f32 %v8445_v2, %v8917_v60 }
 0x74b   :  { %v8920_v11 = vmax.f32 %v8919_v15, %v8447_v53 }
 0x74c   :  { %v8923_v21 = vpop.permute.xlu1 %8922 }
 0x74d   :  { %v8925_v58 = vmax.f32 %v8920_v11, %v8923_v21 }
 0x74f   :  { %v8926_v35 = vmax.f32 %v8925_v58, %v8910_v25  ;;  %v10112_v25 = vand.u32 4294901760, %v10111_v45 }
 0x750   :  { %v8929_v41 = vpop.permute.xlu1 %8928 }
 0x751   :  { %v8931_v57 = vmax.f32 %v8926_v35, %v8929_v41 }
 0x753   :  { %v8932_v32 = vmax.f32 %v8931_v57, %v8912_v4  ;;  %v10920_v4 = vand.u32 4294901760, %v10919_v49 }
 0x754   :  { %v8935_v13 = vpop.permute.xlu1 %8934 }
 0x755   :  { %v8937_v26 = vmax.f32 %v8932_v32, %v8935_v13 }
 0x757   :  { %9891 = vxpose.xlu0.b32.start.end [1/1] (short) (narrow) %v8937_v26, 64 }
 0x774   :  { %v9870_v38 = vpop.permute.xlu1 %9869 }
 0x775   :  { %v9872_v19 = vmax.f32 %v9398_v36, %v9870_v38 }
 0x777   :  { %v9873_v20 = vmax.f32 %v9872_v19, %v9400_v1 }
 0x778   :  { %v9876_v12 = vpop.permute.xlu1 %9875 }
 0x779   :  { %v9878_v22 = vmax.f32 %v9873_v20, %v9876_v12 }
 0x77b   :  { %v9879_v8 = vmax.f32 %v9878_v22, %v9863_v34 }
 0x77c   :  { %v9882_v62 = vpop.permute.xlu1 %9881 }
 0x77d   :  { %v9884_v6 = vmax.f32 %v9879_v8, %v9882_v62 }
 0x77f   :  { %v16961_v14 = vmax.f32 %v9884_v6, %v9865_v29 }
 0x7d7   :  { %v9907_v42 = vpop.trf.xlu0 }
 0x7d8   :  { %v9924_v48 = vsel %vm83_vm0, %v9907_v42, 0 }
 0x7d9   :  { %v16970_v59 = vand.u32 4294901760, %v9924_v48 }
 0x7db   :  { %v16975_v63 = vsub.f32 %v9924_v48, %v16970_v59  ;;  %v9908_v55 = vpop.trf.xlu0 }
 0x7dc   :  { %v9927_v46 = vsel %vm83_vm0, %v9908_v55, 0 }
 0x7dd   :  { %v16979_v33 = vand.u32 4294901760, %v16975_v63  ;;  %v16981_v23 = vand.u32 4294901760, %v9927_v46 }
 0x7df   :  { %v16990_v18 = vsub.f32 %v9927_v46, %v16981_v23  ;;  %v9909_v9 = vpop.trf.xlu0  ;;  %v10017_v37 = vsub.f32 %v16975_v63, %v16979_v33 }
 0x7e0   :  { %v9930_v3 = vsel %vm83_vm0, %v9909_v9, 0 }
 0x7e1   :  { %v16995_v27 = vand.u32 4294901760, %v9930_v3  ;;  %v10018_v2 = vand.u32 4294901760, %v10017_v37  ;;  %v16998_v53 = vand.u32 4294901760, %v16990_v18 }
 0x7e3   :  { %v17001_v36 = vsub.f32 %v9930_v3, %v16995_v27  ;;  %10019 = vmatmul.mubr.f32.vlgmr.msra.gmra.mrb[32].mxu0 %v10018_v2  ;;  %10827 = vmatmul.mubr.f32.vlgmr.msra.gmra.mrb[32].mxu1 %v10018_v2  ;;  %v9910_v1 = vpop.trf.xlu0  ;;  %v10028_v34 = vsub.f32 %v16990_v18, %v16998_v53 }
 0x7e4   :  { %10113 = vmatpush1.msra.mxu0 %v10112_v25  ;;  %10921 = vmatpush1.msra.mxu1 %v10920_v4  ;;  %v9933_v29 = vsel %vm83_vm0, %v9910_v1, 0 }
 0x7e5   :  { %v17006_v60 = vand.u32 4294901760, %v9933_v29  ;;  %10235 = vmatprep.subr.mxu0 %v16932_v47  ;;  %11043 = vmatprep.subr.mxu1 %v16942_v54  ;;  %v10029_v15 = vand.u32 4294901760, %v10028_v34  ;;  %v17011_v11 = vand.u32 4294901760, %v17001_v36 }
 0x7e6   :  { %10024 = vmatprep.mubr.f32.mxu0 %v18425_v28  ;;  %10832 = vmatprep.mubr.f32.mxu1 %v18425_v28 }
 0x7e7   :  { %v17016_v21 = vsub.f32 %v9933_v29, %v17006_v60  ;;  %10030 = vmatmul.mubr.f32.gmra.mrb[34].mxu0 %v10029_v15  ;;  %10838 = vmatmul.mubr.f32.gmra.mrb[34].mxu1 %v10029_v15  ;;  %v9911_v58 = vpop.trf.xlu0  ;;  %v10039_v35 = vsub.f32 %v17001_v36, %v17011_v11 }
 0x7e8   :  { %v9936_v41 = vsel %vm83_vm0, %v9911_v58, 0  ;;  %10035 = vmatprep.mubr.f32.mxu0 %v18425_v28  ;;  %10843 = vmatprep.mubr.f32.mxu1 %v18425_v28 }
 0x7e9   :  { %v17023_v57 = vand.u32 4294901760, %v9936_v41  ;;  %v10040_v32 = vand.u32 4294901760, %v10039_v35  ;;  %v17026_v13 = vand.u32 4294901760, %v17016_v21 }
 0x7eb   :  { %v17029_v26 = vsub.f32 %v9936_v41, %v17023_v57  ;;  %10041 = vmatmul.mubr.f32.gmra.mrb[36].mxu0 %v10040_v32  ;;  %10849 = vmatmul.mubr.f32.gmra.mrb[36].mxu1 %v10040_v32  ;;  %v9912_v38 = vpop.trf.xlu0  ;;  %v10050_v19 = vsub.f32 %v17016_v21, %v17026_v13 }
 0x7ec   :  { %v9939_v20 = vsel %vm83_vm0, %v9912_v38, 0  ;;  %10046 = vmatprep.mubr.f32.mxu0 %v18425_v28  ;;  %10854 = vmatprep.mubr.f32.mxu1 %v18425_v28 }
 0x7ed   :  { %v17036_v12 = vand.u32 4294901760, %v9939_v20  ;;  %v10051_v22 = vand.u32 4294901760, %v10050_v19  ;;  %v17039_v8 = vand.u32 4294901760, %v17029_v26 }
 0x7ef   :  { %v17042_v62 = vsub.f32 %v9939_v20, %v17036_v12  ;;  %10052 = vmatmul.mubr.f32.gmra.mrb[38].mxu0 %v10051_v22  ;;  %10860 = vmatmul.mubr.f32.gmra.mrb[38].mxu1 %v10051_v22  ;;  %v9913_v6 = vpop.trf.xlu0  ;;  %v10061_v42 = vsub.f32 %v17029_v26, %v17039_v8 }
 0x7f0   :  { %v9942_v48 = vsel %vm83_vm0, %v9913_v6, 0  ;;  %10057 = vmatprep.mubr.f32.mxu0 %v18425_v28  ;;  %10865 = vmatprep.mubr.f32.mxu1 %v18425_v28 }
 0x7f1   :  { %v17049_v55 = vand.u32 4294901760, %v9942_v48  ;;  %v10062_v46 = vand.u32 4294901760, %v10061_v42  ;;  %v17052_v45 = vand.u32 4294901760, %v17042_v62 }
 0x7f3   :  { %v17055_v49 = vsub.f32 %v9942_v48, %v17049_v55  ;;  %10063 = vmatmul.mubr.f32.gmra.mrb[40].mxu0 %v10062_v46  ;;  %10871 = vmatmul.mubr.f32.gmra.mrb[40].mxu1 %v10062_v46  ;;  %v9914_v9 = vpop.trf.xlu0  ;;  %v10072_v37 = vsub.f32 %v17042_v62, %v17052_v45 }
 0x7f4   :  { %v9945_v3 = vsel %vm83_vm0, %v9914_v9, 0  ;;  %10068 = vmatprep.mubr.f32.mxu0 %v18425_v28  ;;  %10876 = vmatprep.mubr.f32.mxu1 %v18425_v28 }
 0x7f5   :  { %v17062_v2 = vand.u32 4294901760, %v9945_v3  ;;  %v10073_v25 = vand.u32 4294901760, %v10072_v37  ;;  %v17065_v4 = vand.u32 4294901760, %v17055_v49 }
 0x7f7   :  { %v17068_v1 = vsub.f32 %v9945_v3, %v17062_v2  ;;  %10074 = vmatmul.mubr.f32.gmra.mrb[42].mxu0 %v10073_v25  ;;  %10882 = vmatmul.mubr.f32.gmra.mrb[42].mxu1 %v10073_v25  ;;  %v10083_v34 = vsub.f32 %v17055_v49, %v17065_v4 }
 0x7f8   :  { %10079 = vmatprep.mubr.f32.mxu0 %v18425_v28  ;;  %10887 = vmatprep.mubr.f32.mxu1 %v18425_v28 }
 0x7f9   :  { %v10084_v29 = vand.u32 4294901760, %v10083_v34  ;;  %v17075_v15 = vand.u32 4294901760, %v17068_v1 }
 0x7fb   :  { %10085 = vmatmul.mubr.f32.gmra.mrb[44].mxu0 %v10084_v29  ;;  %10893 = vmatmul.mubr.f32.gmra.mrb[44].mxu1 %v10084_v29  ;;  %v10094_v58 = vsub.f32 %v17068_v1, %v17075_v15 }
 0x7fc   :  { %10090 = vmatprep.mubr.f32.mxu0 %v18425_v28  ;;  %10898 = vmatprep.mubr.f32.mxu1 %v18425_v28 }
 0x7fd   :  { %v10095_v35 = vand.u32 4294901760, %v10094_v58 }
 0x7ff   :  { %10096 = vmatmul.mubr.f32.gmra.mrb[46].mxu0 %v10095_v35  ;;  %10904 = vmatmul.mubr.f32.gmra.mrb[46].mxu1 %v10095_v35 }
 0x800   :  { %10176 = vmatprep.mubr.f32.mxu0 %v18425_v28  ;;  %10984 = vmatprep.mubr.f32.mxu1 %v18425_v28 }
 0x803   :  { %10178 = vmatmul.mubr.f32.vlgmr.msra.gmra.mrb[32].mxu0 %v16970_v59  ;;  %10986 = vmatmul.mubr.f32.vlgmr.msra.gmra.mrb[32].mxu1 %v16970_v59 }
 0x804   :  { %10238 = vmatpush1.msra.mxu0 %v16964_v5  ;;  %11046 = vmatpush1.msra.mxu1 %v16967_v61 }
 0x805   :  { %10367 = vmatprep.subr.mxu0 %v16927_v0  ;;  %11175 = vmatprep.subr.mxu1 %v16934_v56 }
 0x806   :  { %10183 = vmatprep.mubr.f32.mxu0 %v18425_v28  ;;  %10991 = vmatprep.mubr.f32.mxu1 %v18425_v28 }
 0x807   :  { %10185 = vmatmul.mubr.f32.gmra.mrb[34].mxu0 %v16981_v23  ;;  %10993 = vmatmul.mubr.f32.gmra.mrb[34].mxu1 %v16981_v23 }
 0x808   :  { %10190 = vmatprep.mubr.f32.mxu0 %v18425_v28  ;;  %10998 = vmatprep.mubr.f32.mxu1 %v18425_v28 }
 0x80b   :  { %10192 = vmatmul.mubr.f32.gmra.mrb[36].mxu0 %v16995_v27  ;;  %11000 = vmatmul.mubr.f32.gmra.mrb[36].mxu1 %v16995_v27 }
 0x80c   :  { %10197 = vmatprep.mubr.f32.mxu0 %v18425_v28  ;;  %11005 = vmatprep.mubr.f32.mxu1 %v18425_v28 }
 0x80f   :  { %10199 = vmatmul.mubr.f32.gmra.mrb[38].mxu0 %v17006_v60  ;;  %11007 = vmatmul.mubr.f32.gmra.mrb[38].mxu1 %v17006_v60 }
 0x810   :  { %10204 = vmatprep.mubr.f32.mxu0 %v18425_v28  ;;  %11012 = vmatprep.mubr.f32.mxu1 %v18425_v28 }
 0x813   :  { %10206 = vmatmul.mubr.f32.gmra.mrb[40].mxu0 %v17023_v57  ;;  %11014 = vmatmul.mubr.f32.gmra.mrb[40].mxu1 %v17023_v57 }
 0x814   :  { %10211 = vmatprep.mubr.f32.mxu0 %v18425_v28  ;;  %11019 = vmatprep.mubr.f32.mxu1 %v18425_v28 }
 0x817   :  { %10213 = vmatmul.mubr.f32.gmra.mrb[42].mxu0 %v17036_v12  ;;  %11021 = vmatmul.mubr.f32.gmra.mrb[42].mxu1 %v17036_v12 }
 0x818   :  { %10218 = vmatprep.mubr.f32.mxu0 %v18425_v28  ;;  %11026 = vmatprep.mubr.f32.mxu1 %v18425_v28 }
 0x81b   :  { %10220 = vmatmul.mubr.f32.gmra.mrb[44].mxu0 %v17049_v55  ;;  %11028 = vmatmul.mubr.f32.gmra.mrb[44].mxu1 %v17049_v55 }
 0x81c   :  { %10225 = vmatprep.mubr.f32.mxu0 %v18425_v28  ;;  %11033 = vmatprep.mubr.f32.mxu1 %v18425_v28 }
 0x81f   :  { %10227 = vmatmul.mubr.f32.gmra.mrb[46].mxu0 %v17062_v2  ;;  %11035 = vmatmul.mubr.f32.gmra.mrb[46].mxu1 %v17062_v2 }
 0x820   :  { %10301 = vmatprep.mubr.f32.mxu0 %v18425_v28  ;;  %11109 = vmatprep.mubr.f32.mxu1 %v18425_v28 }
 0x823   :  { %10304 = vmatmul.mubr.f32.vlgmr.msra.gmra.mrb[32].mxu0 %v16975_v63  ;;  %11112 = vmatmul.mubr.f32.vlgmr.msra.gmra.mrb[32].mxu1 %v16975_v63 }
 0x824   :  { %10369 = vmatpush1.msra.mxu0 %v16929_v50  ;;  %11177 = vmatpush1.msra.mxu1 %v16937_v43 }
 0x825   :  { %10508 = vmatprep.subr.mxu0 %v10104_v31  ;;  %11316 = vmatprep.subr.mxu1 %v10912_v7 }
 0x826   :  { %10309 = vmatprep.mubr.f32.mxu0 %v18425_v28  ;;  %11117 = vmatprep.mubr.f32.mxu1 %v18425_v28 }
 0x827   :  { %10312 = vmatmul.mubr.f32.gmra.mrb[34].mxu0 %v16990_v18  ;;  %11120 = vmatmul.mubr.f32.gmra.mrb[34].mxu1 %v16990_v18 }
 0x828   :  { %10317 = vmatprep.mubr.f32.mxu0 %v18425_v28  ;;  %11125 = vmatprep.mubr.f32.mxu1 %v18425_v28 }
 0x82b   :  { %10320 = vmatmul.mubr.f32.gmra.mrb[36].mxu0 %v17001_v36  ;;  %11128 = vmatmul.mubr.f32.gmra.mrb[36].mxu1 %v17001_v36 }
 0x82c   :  { %10325 = vmatprep.mubr.f32.mxu0 %v18425_v28  ;;  %11133 = vmatprep.mubr.f32.mxu1 %v18425_v28 }
 0x82f   :  { %10328 = vmatmul.mubr.f32.gmra.mrb[38].mxu0 %v17016_v21  ;;  %11136 = vmatmul.mubr.f32.gmra.mrb[38].mxu1 %v17016_v21 }
 0x830   :  { %10333 = vmatprep.mubr.f32.mxu0 %v18425_v28  ;;  %11141 = vmatprep.mubr.f32.mxu1 %v18425_v28 }
 0x833   :  { %10336 = vmatmul.mubr.f32.gmra.mrb[40].mxu0 %v17029_v26  ;;  %11144 = vmatmul.mubr.f32.gmra.mrb[40].mxu1 %v17029_v26 }
 0x834   :  { %10341 = vmatprep.mubr.f32.mxu0 %v18425_v28  ;;  %11149 = vmatprep.mubr.f32.mxu1 %v18425_v28 }
 0x837   :  { %10344 = vmatmul.mubr.f32.gmra.mrb[42].mxu0 %v17042_v62  ;;  %11152 = vmatmul.mubr.f32.gmra.mrb[42].mxu1 %v17042_v62  ;;  %v9888_v62 = vpop.permute.xlu1 %9887 }
 0x838   :  { %10349 = vmatprep.mubr.f32.mxu0 %v18425_v28  ;;  %11157 = vmatprep.mubr.f32.mxu1 %v18425_v28  ;;  %v9890_v48 = vmax.f32 %v16961_v14, %v9888_v62 }
 0x83a   :  { %v11764_v25 = vsel %vm4801_vm1, %v9890_v48, 0 }
 0x83b   :  { %10352 = vmatmul.mubr.f32.gmra.mrb[44].mxu0 %v17055_v49  ;;  %11160 = vmatmul.mubr.f32.gmra.mrb[44].mxu1 %v17055_v49  ;;  %v17345_v58 = vand.u32 4294901760, %v11764_v25 }
 0x83c   :  { %10357 = vmatprep.mubr.f32.mxu0 %v18425_v28  ;;  %11165 = vmatprep.mubr.f32.mxu1 %v18425_v28 }
 0x83f   :  { %10360 = vmatmul.mubr.f32.gmra.mrb[46].mxu0 %v17068_v1  ;;  %11168 = vmatmul.mubr.f32.gmra.mrb[46].mxu1 %v17068_v1 }
 0x840   :  { %10432 = vmatprep.mubr.f32.mxu0 %v18425_v28  ;;  %11240 = vmatprep.mubr.f32.mxu1 %v18425_v28 }
 0x843   :  { %10436 = vmatmul.mubr.f32.vlgmr.msra.gmra.mrb[32].mxu0 %v16979_v33  ;;  %11244 = vmatmul.mubr.f32.vlgmr.msra.gmra.mrb[32].mxu1 %v16979_v33 }
 0x844   :  { %10512 = vmatpush1.msra.mxu0 %v10110_v30  ;;  %11320 = vmatpush1.msra.mxu1 %v10918_v16 }
 0x845   :  { %10633 = vmatprep.subr.mxu0 %v16927_v0  ;;  %11441 = vmatprep.subr.mxu1 %v16934_v56 }
 0x846   :  { %10441 = vmatprep.mubr.f32.mxu0 %v18425_v28  ;;  %11249 = vmatprep.mubr.f32.mxu1 %v18425_v28 }
 0x847   :  { %10445 = vmatmul.mubr.f32.gmra.mrb[34].mxu0 %v16998_v53  ;;  %11253 = vmatmul.mubr.f32.gmra.mrb[34].mxu1 %v16998_v53 }
 0x848   :  { %10450 = vmatprep.mubr.f32.mxu0 %v18425_v28  ;;  %11258 = vmatprep.mubr.f32.mxu1 %v18425_v28 }
 0x84b   :  { %10454 = vmatmul.mubr.f32.gmra.mrb[36].mxu0 %v17011_v11  ;;  %11262 = vmatmul.mubr.f32.gmra.mrb[36].mxu1 %v17011_v11 }
 0x84c   :  { %10459 = vmatprep.mubr.f32.mxu0 %v18425_v28  ;;  %11267 = vmatprep.mubr.f32.mxu1 %v18425_v28 }
 0x84f   :  { %10463 = vmatmul.mubr.f32.gmra.mrb[38].mxu0 %v17026_v13  ;;  %11271 = vmatmul.mubr.f32.gmra.mrb[38].mxu1 %v17026_v13 }
 0x850   :  { %10468 = vmatprep.mubr.f32.mxu0 %v18425_v28  ;;  %11276 = vmatprep.mubr.f32.mxu1 %v18425_v28 }
 0x853   :  { %10472 = vmatmul.mubr.f32.gmra.mrb[40].mxu0 %v17039_v8  ;;  %11280 = vmatmul.mubr.f32.gmra.mrb[40].mxu1 %v17039_v8 }
 0x854   :  { %10477 = vmatprep.mubr.f32.mxu0 %v18425_v28  ;;  %11285 = vmatprep.mubr.f32.mxu1 %v18425_v28 }
 0x857   :  { %10481 = vmatmul.mubr.f32.gmra.mrb[42].mxu0 %v17052_v45  ;;  %11289 = vmatmul.mubr.f32.gmra.mrb[42].mxu1 %v17052_v45 }
 0x858   :  { %10486 = vmatprep.mubr.f32.mxu0 %v18425_v28  ;;  %11294 = vmatprep.mubr.f32.mxu1 %v18425_v28 }
 0x85b   :  { %10490 = vmatmul.mubr.f32.gmra.mrb[44].mxu0 %v17065_v4  ;;  %11298 = vmatmul.mubr.f32.gmra.mrb[44].mxu1 %v17065_v4 }
 0x85c   :  { %10495 = vmatprep.mubr.f32.mxu0 %v18425_v28  ;;  %11303 = vmatprep.mubr.f32.mxu1 %v18425_v28 }
 0x85f   :  { %10499 = vmatmul.mubr.f32.gmra.mrb[46].mxu0 %v17075_v15  ;;  %11307 = vmatmul.mubr.f32.gmra.mrb[46].mxu1 %v17075_v15 }
 0x860   :  { %10575 = vmatprep.mubr.f32.mxu0 %v18425_v28  ;;  %11383 = vmatprep.mubr.f32.mxu1 %v18425_v28 }
 0x863   :  { %10577 = vmatmul.mubr.f32.vlgmr.msra.gmra.mrb[32].mxu0 %v16970_v59  ;;  %11385 = vmatmul.mubr.f32.vlgmr.msra.gmra.mrb[32].mxu1 %v16970_v59 }
 0x864   :  { %10635 = vmatpush1.msra.mxu0 %v16929_v50  ;;  %11443 = vmatpush1.msra.mxu1 %v16937_v43 }
 0x865   :  { %10582 = vmatprep.mubr.f32.mxu0 %v18425_v28  ;;  %11390 = vmatprep.mubr.f32.mxu1 %v18425_v28 }
 0x867   :  { %10584 = vmatmul.mubr.f32.gmra.mrb[34].mxu0 %v16981_v23  ;;  %11392 = vmatmul.mubr.f32.gmra.mrb[34].mxu1 %v16981_v23 }
 0x868   :  { %10589 = vmatprep.mubr.f32.mxu0 %v18425_v28  ;;  %11397 = vmatprep.mubr.f32.mxu1 %v18425_v28 }
 0x86b   :  { %10591 = vmatmul.mubr.f32.gmra.mrb[36].mxu0 %v16995_v27  ;;  %11399 = vmatmul.mubr.f32.gmra.mrb[36].mxu1 %v16995_v27 }
 0x86c   :  { %10596 = vmatprep.mubr.f32.mxu0 %v18425_v28  ;;  %11404 = vmatprep.mubr.f32.mxu1 %v18425_v28 }
 0x86f   :  { %10598 = vmatmul.mubr.f32.gmra.mrb[38].mxu0 %v17006_v60  ;;  %11406 = vmatmul.mubr.f32.gmra.mrb[38].mxu1 %v17006_v60 }
 0x870   :  { %10603 = vmatprep.mubr.f32.mxu0 %v18425_v28  ;;  %11411 = vmatprep.mubr.f32.mxu1 %v18425_v28 }
 0x873   :  { %10605 = vmatmul.mubr.f32.gmra.mrb[40].mxu0 %v17023_v57  ;;  %11413 = vmatmul.mubr.f32.gmra.mrb[40].mxu1 %v17023_v57 }
 0x874   :  { %10610 = vmatprep.mubr.f32.mxu0 %v18425_v28  ;;  %11418 = vmatprep.mubr.f32.mxu1 %v18425_v28 }
 0x877   :  { %10612 = vmatmul.mubr.f32.gmra.mrb[42].mxu0 %v17036_v12  ;;  %11420 = vmatmul.mubr.f32.gmra.mrb[42].mxu1 %v17036_v12 }
 0x878   :  { %10617 = vmatprep.mubr.f32.mxu0 %v18425_v28  ;;  %11425 = vmatprep.mubr.f32.mxu1 %v18425_v28 }
 0x87b   :  { %10619 = vmatmul.mubr.f32.gmra.mrb[44].mxu0 %v17049_v55  ;;  %11427 = vmatmul.mubr.f32.gmra.mrb[44].mxu1 %v17049_v55 }
 0x87c   :  { %10624 = vmatprep.mubr.f32.mxu0 %v18425_v28  ;;  %11432 = vmatprep.mubr.f32.mxu1 %v18425_v28 }
 0x87f   :  { %10626 = vmatmul.mubr.f32.gmra.mrb[46].mxu0 %v17062_v2  ;;  %11434 = vmatmul.mubr.f32.gmra.mrb[46].mxu1 %v17062_v2 }
 0x880   :  { %10698 = vmatprep.mubr.f32.mxu0 %v18425_v28  ;;  %11506 = vmatprep.mubr.f32.mxu1 %v18425_v28 }
 0x883   :  { %10700 = vmatmul.mubr.f32.vlgmr.msra.gmra.mrb[32].mxu0 %v16970_v59  ;;  %11508 = vmatmul.mubr.f32.vlgmr.msra.gmra.mrb[32].mxu1 %v16970_v59 }
 0x884   :  { %10705 = vmatprep.mubr.f32.mxu0 %v18425_v28  ;;  %11513 = vmatprep.mubr.f32.mxu1 %v18425_v28 }
 0x887   :  { %10707 = vmatmul.mubr.f32.gmra.mrb[34].mxu0 %v16981_v23  ;;  %11515 = vmatmul.mubr.f32.gmra.mrb[34].mxu1 %v16981_v23 }
 0x888   :  { %10712 = vmatprep.mubr.f32.mxu0 %v18425_v28  ;;  %11520 = vmatprep.mubr.f32.mxu1 %v18425_v28 }
 0x88b   :  { %10714 = vmatmul.mubr.f32.gmra.mrb[36].mxu0 %v16995_v27  ;;  %11522 = vmatmul.mubr.f32.gmra.mrb[36].mxu1 %v16995_v27 }
 0x88c   :  { %10719 = vmatprep.mubr.f32.mxu0 %v18425_v28  ;;  %11527 = vmatprep.mubr.f32.mxu1 %v18425_v28 }
 0x88f   :  { %10721 = vmatmul.mubr.f32.gmra.mrb[38].mxu0 %v17006_v60  ;;  %11529 = vmatmul.mubr.f32.gmra.mrb[38].mxu1 %v17006_v60 }
 0x890   :  { %10726 = vmatprep.mubr.f32.mxu0 %v18425_v28  ;;  %11534 = vmatprep.mubr.f32.mxu1 %v18425_v28 }
 0x893   :  { %10728 = vmatmul.mubr.f32.gmra.mrb[40].mxu0 %v17023_v57  ;;  %11536 = vmatmul.mubr.f32.gmra.mrb[40].mxu1 %v17023_v57 }
 0x894   :  { %10733 = vmatprep.mubr.f32.mxu0 %v18425_v28  ;;  %11541 = vmatprep.mubr.f32.mxu1 %v18425_v28 }
 0x897   :  { %10735 = vmatmul.mubr.f32.gmra.mrb[42].mxu0 %v17036_v12  ;;  %11543 = vmatmul.mubr.f32.gmra.mrb[42].mxu1 %v17036_v12 }
 0x898   :  { %10740 = vmatprep.mubr.f32.mxu0 %v18425_v28  ;;  %11548 = vmatprep.mubr.f32.mxu1 %v18425_v28 }
 0x89b   :  { %10742 = vmatmul.mubr.f32.gmra.mrb[44].mxu0 %v17049_v55  ;;  %11550 = vmatmul.mubr.f32.gmra.mrb[44].mxu1 %v17049_v55 }
 0x89c   :  { %10747 = vmatprep.mubr.f32.mxu0 %v18425_v28  ;;  %11555 = vmatprep.mubr.f32.mxu1 %v18425_v28 }
 0x89f   :  { %10749 = vmatmul.mubr.f32.gmra.mrb[46].mxu0 %v17062_v2  ;;  %11557 = vmatmul.mubr.f32.gmra.mrb[46].mxu1 %v17062_v2 }
 0x8a0   :  { %11846 = vmatprep.mubr.f32.mxu0 %v18425_v28  ;;  %12493 = vmatprep.mubr.f32.mxu1 %v18425_v28 }
 0x956   :  { %v17261_v0 = vpop.f32.mrb[32].mxu0  ;;  %v17263_v50 = vpop.f32.mrb[32].mxu1 }
 0x957   :  { %v17265_v47 = vpop.f32.mrb[33].mxu0  ;;  %v17267_v56 = vpop.f32.mrb[33].mxu1 }
 0x95a   :  { %v17269_v43 = vpop.f32.mrb[34].mxu0  ;;  %v17271_v31 = vpop.f32.mrb[34].mxu1 }
 0x95b   :  { %v11563_v54 = vmax.f32 %v17261_v0, %v17269_v43  ;;  %v11589_v7 = vmax.f32 %v17263_v50, %v17271_v31  ;;  %v17277_v5 = vpop.f32.mrb[35].mxu0  ;;  %v17279_v61 = vpop.f32.mrb[35].mxu1 }
 0x95c   :  { %v11576_v59 = vmax.f32 %v17265_v47, %v17277_v5  ;;  %v11602_v30 = vmax.f32 %v17267_v56, %v17279_v61 }
 0x95e   :  { %v17285_v16 = vpop.f32.mrb[36].mxu0  ;;  %v17287_v63 = vpop.f32.mrb[36].mxu1 }
 0x95f   :  { %v11564_v33 = vmax.f32 %v11563_v54, %v17285_v16  ;;  %v11590_v23 = vmax.f32 %v11589_v7, %v17287_v63  ;;  %v17291_v18 = vpop.f32.mrb[37].mxu0  ;;  %v17293_v27 = vpop.f32.mrb[37].mxu1 }
 0x960   :  { %v11577_v53 = vmax.f32 %v11576_v59, %v17291_v18  ;;  %v11603_v36 = vmax.f32 %v11602_v30, %v17293_v27 }
 0x962   :  { %v17297_v60 = vpop.f32.mrb[38].mxu0  ;;  %v17299_v11 = vpop.f32.mrb[38].mxu1 }
 0x963   :  { %v11565_v21 = vmax.f32 %v11564_v33, %v17297_v60  ;;  %v11591_v41 = vmax.f32 %v11590_v23, %v17299_v11  ;;  %v17303_v57 = vpop.f32.mrb[39].mxu0  ;;  %v17305_v32 = vpop.f32.mrb[39].mxu1 }
 0x964   :  { %v11578_v13 = vmax.f32 %v11577_v53, %v17303_v57  ;;  %v11604_v26 = vmax.f32 %v11603_v36, %v17305_v32  ;;  %v17350_v36 = vsub.f32 %v11764_v25, %v17345_v58 }
 0x966   :  { %v17309_v38 = vpop.f32.mrb[40].mxu0  ;;  %v17311_v19 = vpop.f32.mrb[40].mxu1  ;;  %18522 = vst [vmem:[#allocation51_spill] sm:$0xff] %v17350_v36 }
 0x967   :  { %v11566_v20 = vmax.f32 %v11565_v21, %v17309_v38  ;;  %v11592_v12 = vmax.f32 %v11591_v41, %v17311_v19  ;;  %v17315_v22 = vpop.f32.mrb[41].mxu0  ;;  %v17317_v8 = vpop.f32.mrb[41].mxu1 }
 0x968   :  { %v11579_v6 = vmax.f32 %v11578_v13, %v17315_v22  ;;  %v11605_v42 = vmax.f32 %v11604_v26, %v17317_v8 }
 0x96a   :  { %v17322_v55 = vpop.f32.mrb[42].mxu0  ;;  %v17324_v46 = vpop.f32.mrb[42].mxu1 }
 0x96b   :  { %v11567_v45 = vmax.f32 %v11566_v20, %v17322_v55  ;;  %v11593_v49 = vmax.f32 %v11592_v12, %v17324_v46  ;;  %v17328_v9 = vpop.f32.mrb[43].mxu0  ;;  %v17330_v37 = vpop.f32.mrb[43].mxu1 }
 0x96c   :  { %v11580_v3 = vmax.f32 %v11579_v6, %v17328_v9  ;;  %v11606_v2 = vmax.f32 %v11605_v42, %v17330_v37  ;;  %v17353_v42 = vand.u32 4294901760, %v17350_v36 }
 0x96e   :  { %v17335_v4 = vpop.f32.mrb[44].mxu0  ;;  %v17337_v14 = vpop.f32.mrb[44].mxu1  ;;  %18523 = vst [vmem:[#allocation54_spill] sm:$0xff] %v17353_v42 }
 0x96f   :  { %v11568_v1 = vmax.f32 %v11567_v45, %v17335_v4  ;;  %v11594_v34 = vmax.f32 %v11593_v49, %v17337_v14  ;;  %v17341_v29 = vpop.f32.mrb[45].mxu0  ;;  %v17343_v15 = vpop.f32.mrb[45].mxu1 }
 0x970   :  { %v11581_v35 = vmax.f32 %v11580_v3, %v17341_v29  ;;  %v11607_v54 = vmax.f32 %v11606_v2, %v17343_v15 }
 0x972   :  { %v10750_v7 = vpop.f32.mrb[46].mxu0  ;;  %v11558_v59 = vpop.f32.mrb[46].mxu1 }
 0x973   :  { %v11569_v30 = vmax.f32 %v11568_v1, %v10750_v7  ;;  %v11595_v33 = vmax.f32 %v11594_v34, %v11558_v59  ;;  %v10752_v23 = vpop.f32.mrb[47].mxu0  ;;  %v11560_v53 = vpop.f32.mrb[47].mxu1 }
 0x974   :  { %v11582_v21 = vmax.f32 %v11581_v35, %v10752_v23  ;;  %v11608_v41 = vmax.f32 %v11607_v54, %v11560_v53  ;;  %v11850_v35 = vsub.f32 %v17350_v36, %v17353_v42 }
 0x975   :  { %v11570_v13 = vrot.slane %v11569_v30, 4  ;;  %v11596_v26 = vrot.slane %v11595_v33, 4 }
 0x976   :  { %v11583_v20 = vrot.slane %v11582_v21, 4  ;;  %v11609_v12 = vrot.slane %v11608_v41, 4 }
 0x977   :  { %v11571_v62 = vmax.f32 %v11569_v30, %v11570_v13  ;;  %v11597_v6 = vmax.f32 %v11595_v33, %v11596_v26 }
 0x978   :  { %v11584_v48 = vmax.f32 %v11582_v21, %v11583_v20  ;;  %v11610_v45 = vmax.f32 %v11608_v41, %v11609_v12  ;;  %v17365_v20 = vand.u32 4294901760, %v11850_v35 }
 0x979   :  { %v11572_v49 = vrot.slane %v11571_v62, 2  ;;  %v11598_v3 = vrot.slane %v11597_v6, 2 }
 0x97a   :  { %v11585_v2 = vrot.slane %v11584_v48, 2  ;;  %v11611_v1 = vrot.slane %v11610_v45, 2 }
 0x97b   :  { %v11573_v34 = vmax.f32 %v11571_v62, %v11572_v49  ;;  %v11599_v25 = vmax.f32 %v11597_v6, %v11598_v3 }
 0x97c   :  { %v11586_v54 = vmax.f32 %v11584_v48, %v11585_v2  ;;  %v11612_v52 = vmax.f32 %v11610_v45, %v11611_v1 }
 0x97d   :  { %v11574_v44 = vrot.slane %v11573_v34, 1  ;;  %v11600_v40 = vrot.slane %v11599_v25, 1 }
 0x97e   :  { %v11587_v30 = vrot.slane %v11586_v54, 1  ;;  %v11613_v33 = vrot.slane %v11612_v52, 1 }
 0x97f   :  { %v17357_v13 = vmax.f32 %v11573_v34, %v11574_v44  ;;  %v17359_v26 = vmax.f32 %v11599_v25, %v11600_v40 }
 0x980   :  { %v17361_v21 = vmax.f32 %v11586_v54, %v11587_v30  ;;  %v17363_v41 = vmax.f32 %v11612_v52, %v11613_v33 }
 0x981   :  { %v11643_v12 = vsub.f32 %v10750_v7, %v17357_v13  ;;  %v11645_v62 = vsub.f32 %v11558_v59, %v17359_v26  ;;  %v11615_v6 = vsub.f32 %v17261_v0, %v17357_v13  ;;  %v11619_v48 = vsub.f32 %v17269_v43, %v17357_v13 }
 0x982   :  { %v11644_v44 = vsub.f32 %v10752_v23, %v17361_v21  ;;  %v11646_v40 = vsub.f32 %v11560_v53, %v17363_v41  ;;  %v11616_v52 = vsub.f32 %v17265_v47, %v17361_v21  ;;  %v11620_v45 = vsub.f32 %v17277_v5, %v17361_v21 }
 0x983   :  { %v11703_v49 = vmul.f32 1.442695, %v11643_v12  ;;  %v11707_v7 = vmul.f32 1.442695, %v11645_v62  ;;  %v11618_v59 = vsub.f32 %v17267_v56, %v17363_v41  ;;  %v11622_v0 = vsub.f32 %v17279_v61, %v17363_v41 }
 0x984   :  { %v11705_v3 = vmul.f32 1.442695, %v11644_v44  ;;  %v11709_v43 = vmul.f32 1.442695, %v11646_v40  ;;  %v11649_v2 = vmul.f32 1.442695, %v11616_v52  ;;  %v11617_v23 = vsub.f32 %v17263_v50, %v17359_v26 }
 0x985   :  { %15089 = vpow2.f32 %v11703_v49  ;;  %v11657_v53 = vmul.f32 1.442695, %v11620_v45  ;;  %v11653_v47 = vmul.f32 1.442695, %v11618_v59  ;;  %v11661_v1 = vmul.f32 1.442695, %v11622_v0 }
 0x986   :  { %15091 = vpow2.f32 %v11707_v7  ;;  %v11647_v5 = vmul.f32 1.442695, %v11615_v6  ;;  %v11655_v34 = vmul.f32 1.442695, %v11619_v48  ;;  %v11621_v25 = vsub.f32 %v17271_v31, %v17359_v26 }
 0x987   :  { %15093 = vpow2.f32 %v11705_v3  ;;  %v11651_v56 = vmul.f32 1.442695, %v11617_v23  ;;  %v11624_v61 = vsub.f32 %v17291_v18, %v17361_v21  ;;  %v11628_v35 = vsub.f32 %v17303_v57, %v17361_v21 }
 0x988   :  { %15095 = vpow2.f32 %v11709_v43  ;;  %v11659_v50 = vmul.f32 1.442695, %v11621_v25  ;;  %v11626_v54 = vsub.f32 %v17293_v27, %v17363_v41  ;;  %v11630_v30 = vsub.f32 %v17305_v32, %v17363_v41 }
 0x989   :  { %15097 = vpow2.f32 %v11649_v2  ;;  %v11665_v33 = vmul.f32 1.442695, %v11624_v61  ;;  %v11673_v12 = vmul.f32 1.442695, %v11628_v35  ;;  %v11623_v31 = vsub.f32 %v17285_v16, %v17357_v13 }
 0x98a   :  { %15099 = vpow2.f32 %v11657_v53  ;;  %v11669_v62 = vmul.f32 1.442695, %v11626_v54  ;;  %v11677_v18 = vmul.f32 1.442695, %v11630_v30  ;;  %v11627_v57 = vsub.f32 %v17297_v60, %v17357_v13 }
 0x98b   :  { %15101 = vpow2.f32 %v11653_v47  ;;  %v11663_v6 = vmul.f32 1.442695, %v11623_v31  ;;  %v11625_v27 = vsub.f32 %v17287_v63, %v17359_v26  ;;  %v11629_v32 = vsub.f32 %v17299_v11, %v17359_v26 }
 0x98c   :  { %15103 = vpow2.f32 %v11661_v1  ;;  %v11671_v48 = vmul.f32 1.442695, %v11627_v57  ;;  %v11632_v44 = vsub.f32 %v17315_v22, %v17361_v21  ;;  %v11636_v16 = vsub.f32 %v17328_v9, %v17361_v21 }
 0x98d   :  { %15105 = vpow2.f32 %v11647_v5  ;;  %v11667_v40 = vmul.f32 1.442695, %v11625_v27  ;;  %v11675_v52 = vmul.f32 1.442695, %v11629_v32  ;;  %v11634_v60 = vsub.f32 %v17317_v8, %v17363_v41 }
 0x98e   :  { %15107 = vpow2.f32 %v11655_v34  ;;  %v11681_v45 = vmul.f32 1.442695, %v11632_v44  ;;  %v11689_v63 = vmul.f32 1.442695, %v11636_v16  ;;  %v11638_v11 = vsub.f32 %v17330_v37, %v17363_v41 }
 0x98f   :  { %v17411_v49 = vpop.eup %15089  ;;  %15109 = vpow2.f32 %v11651_v56  ;;  %v17413_v7 = vmul.f32 1.442695, %v11634_v60  ;;  %v11631_v22 = vsub.f32 %v17309_v38, %v17357_v13  ;;  %v11635_v9 = vsub.f32 %v17322_v55, %v17357_v13 }
 0x990   :  { %18524 = vst [vmem:[#allocation45_spill] sm:$0xff] %v17411_v49  ;;  %v17419_v59 = vpop.eup %15091  ;;  %15111 = vpow2.f32 %v11659_v50  ;;  %v11693_v8 = vmul.f32 1.442695, %v11638_v11  ;;  %v11633_v0 = vsub.f32 %v17311_v19, %v17359_v26  ;;  %v11637_v37 = vsub.f32 %v17324_v46, %v17359_v26 }
 0x991   :  { %18525 = vst [vmem:[#allocation48_spill] sm:$0xff] %v17419_v59  ;;  %v17425_v3 = vpop.eup %15093  ;;  %15113 = vpow2.f32 %v11665_v33  ;;  %v17427_v43 = vmul.f32 1.442695, %v11631_v22  ;;  %v17429_v2 = vmul.f32 1.442695, %v11635_v9  ;;  %v11640_v38 = vsub.f32 %v17341_v29, %v17361_v21 }
 0x992   :  { %18526 = vst [vmem:[#allocation66_spill] sm:$0xff] %v17425_v3  ;;  %v17433_v55 = vpop.eup %15095  ;;  %15115 = vpow2.f32 %v11673_v12  ;;  %v17435_v23 = vmul.f32 1.442695, %v11633_v0  ;;  %v17437_v53 = vmul.f32 1.442695, %v11637_v37  ;;  %v18251_v19 = vand.u32 4294901760, %v17425_v3 }
 0x993   :  { %18527 = vst [vmem:[#allocation31_spill] sm:$0xff] %v17433_v55  ;;  %v17440_v46 = vpop.eup %15097  ;;  %15117 = vpow2.f32 %v11669_v62  ;;  %v17442_v47 = vmul.f32 1.442695, %v11640_v38  ;;  %v11642_v1 = vsub.f32 %v17343_v15, %v17363_v41  ;;  %v18250_v5 = vand.u32 4294901760, %v17433_v55 }
 0x994   :  { %v17447_v29 = vpop.eup %15099  ;;  %v11766_v21 = vand.u32 4294901760, %v17440_v46  ;;  %15119 = vpow2.f32 %v11677_v18  ;;  %v17453_v34 = vsub.f32 %v17425_v3, %v18251_v19  ;;  %v11639_v25 = vsub.f32 %v17335_v4, %v17357_v13 }
 0x995   :  { %v17457_v56 = vpop.eup %15101  ;;  %v11770_v61 = vand.u32 4294901760, %v17447_v29  ;;  %15121 = vpow2.f32 %v11663_v6  ;;  %v17460_v15 = vmul.f32 1.442695, %v11642_v1  ;;  %v17465_v41 = vsub.f32 %v17433_v55, %v18250_v5 }
 0x996   :  { %18528 = vst [vmem:[#allocation53_spill] sm:$0xff] %v17453_v34  ;;  %v17467_v35 = vpop.eup %15103  ;;  %v17470_v50 = vsub.f32 %v17440_v46, %v11766_v21  ;;  %v12413_v54 = vand.u32 4294901760, %v17457_v56  ;;  %15123 = vpow2.f32 %v11671_v48  ;;  %v17473_v4 = vmul.f32 1.442695, %v11639_v25 }
 0x997   :  { %18529 = vst [vmem:[#allocation68_spill] sm:$0xff] %v17465_v41  ;;  %v17475_v13 = vpop.eup %15105  ;;  %v17477_v30 = vpack.c.bf16 %v11770_v61, %v11766_v21  ;;  %v17480_v33 = vsub.f32 %v17447_v29, %v11770_v61  ;;  %v12417_v12 = vand.u32 4294901760, %v17467_v35  ;;  %15125 = vpow2.f32 %v11667_v40 }
 0x998   :  { %v17483_v31 = vpop.eup %15107  ;;  %v17486_v62 = vsub.f32 %v17457_v56, %v12413_v54  ;;  %v11768_v18 = vand.u32 4294901760, %v17475_v13  ;;  %15127 = vpow2.f32 %v11675_v52  ;;  %v18249_v57 = vand.u32 4294901760, %v17411_v49 }
 0x999   :  { %18530 = vst [vmem:[#allocation34_spill] sm:$0xff] %v17477_v30  ;;  %v17490_v6 = vpop.eup %15109  ;;  %14295 = vmatprep.subr.bf16.mxu0 %v17477_v30  ;;  %v17493_v27 = vpack.c.bf16 %v12417_v12, %v12413_v54  ;;  %v17496_v32 = vsub.f32 %v17467_v35, %v12417_v12  ;;  %v11772_v48 = vand.u32 4294901760, %v17483_v31  ;;  %15129 = vpow2.f32 %v11681_v45 }
 0x99a   :  { %v17499_v44 = vpop.eup %15111  ;;  %v17502_v16 = vsub.f32 %v17475_v13, %v11768_v18  ;;  %v12415_v40 = vand.u32 4294901760, %v17490_v6  ;;  %15131 = vpow2.f32 %v11689_v63  ;;  %v17508_v52 = vsub.f32 %v17411_v49, %v18249_v57 }
 0x99b   :  { %18531 = vst [vmem:[#allocation56_spill] sm:$0xff] %v17493_v27  ;;  %v17510_v60 = vpop.eup %15113  ;;  %14391 = vmatprep.subr.bf16.mxu1 %v17493_v27  ;;  %v17513_v11 = vpack.c.bf16 %v11772_v48, %v11768_v18  ;;  %v17516_v45 = vsub.f32 %v17483_v31, %v11772_v48  ;;  %v12419_v22 = vand.u32 4294901760, %v17499_v44  ;;  %15133 = vpow2.f32 %v17413_v7 }
 0x99c   :  { %18532 = vst [vmem:[#allocation47_spill] sm:$0xff] %v17508_v52  ;;  %18533 = vst [vmem:[#allocation50_spill] sm:$0xff] %v17510_v60  ;;  %v17520_v9 = vpop.eup %15115  ;;  %v17523_v63 = vsub.f32 %v17490_v6, %v12415_v40  ;;  %v11774_v0 = vand.u32 4294901760, %v17510_v60  ;;  %15135 = vpow2.f32 %v11693_v8  ;;  %v11641_v37 = vsub.f32 %v17337_v14, %v17359_v26 }
 0x99d   :  { %18534 = vst [vmem:[#allocation60_spill] sm:$0xff] %v17513_v11  ;;  %18535 = vst [vmem:[#allocation62_spill] sm:$0xff] %v17520_v9  ;;  %v17528_v38 = vpop.eup %15117  ;;  %14297 = vmatpush1.bf16.msra.mxu0 %v17513_v11  ;;  %v17531_v1 = vpack.c.bf16 %v12419_v22, %v12415_v40  ;;  %v17534_v21 = vsub.f32 %v17499_v44, %v12419_v22  ;;  %v11778_v7 = vand.u32 4294901760, %v17520_v9  ;;  %15137 = vpow2.f32 %v17427_v43 }
 0x99e   :  { %18536 = vst [vmem:[#allocation57_spill] sm:$0xff] %v17528_v38  ;;  %v17538_v25 = vpop.eup %15119  ;;  %v17541_v8 = vsub.f32 %v17510_v60, %v11774_v0  ;;  %v12421_v14 = vand.u32 4294901760, %v17528_v38  ;;  %15139 = vpow2.f32 %v17429_v2  ;;  %v11699_v26 = vmul.f32 1.442695, %v11641_v37 }
 0x99f   :  { %18537 = vst [vmem:[#allocation59_spill] sm:$0xff] %v17531_v1  ;;  %18538 = vst [vmem:[#allocation32_spill] sm:$0xff] %v17538_v25  ;;  %v17545_v61 = vpop.eup %15121  ;;  %14393 = vmatpush1.bf16.msra.mxu1 %v17531_v1  ;;  %v17548_v54 = vpack.c.bf16 %v11778_v7, %v11774_v0  ;;  %v17551_v12 = vsub.f32 %v17520_v9, %v11778_v7  ;;  %v12425_v43 = vand.u32 4294901760, %v17538_v25  ;;  %15141 = vpow2.f32 %v17435_v23 }
 0x9a0   :  { %v17555_v18 = vpop.eup %15123  ;;  %v17558_v48 = vsub.f32 %v17528_v38, %v12421_v14  ;;  %v11776_v2 = vand.u32 4294901760, %v17545_v61  ;;  %15143 = vpow2.f32 %v17437_v53  ;;  %v18254_v40 = vand.u32 4294901760, %v17419_v59 }
 0x9a1   :  { %18539 = vst [vmem:[#allocation27_spill] sm:$0xff] %v17548_v54  ;;  %18540 = vst [vmem:[#allocation33_spill] sm:$0xff] %v17555_v18  ;;  %v17563_v22 = vpop.eup %15125  ;;  %14299 = vmatprep.subr.bf16.mxu0 %v17548_v54  ;;  %v17566_v0 = vpack.c.bf16 %v12425_v43, %v12421_v14  ;;  %v17569_v37 = vsub.f32 %v17538_v25, %v12425_v43  ;;  %v11780_v23 = vand.u32 4294901760, %v17555_v18  ;;  %15145 = vpow2.f32 %v17442_v47 }
 0x9a2   :  { %v17573_v7 = vpop.eup %15127  ;;  %v17576_v57 = vsub.f32 %v17545_v61, %v11776_v2  ;;  %v12423_v53 = vand.u32 4294901760, %v17563_v22  ;;  %15147 = vpow2.f32 %v17460_v15  ;;  %v17583_v14 = vsub.f32 %v17419_v59, %v18254_v40 }
 0x9a3   :  { %18541 = vst [vmem:[#allocation24_spill] sm:$0xff] %v17566_v0  ;;  %18542 = vst [vmem:[#allocation36_spill] sm:$0xff] %v17573_v7  ;;  %v17585_v43 = vpop.eup %15129  ;;  %14395 = vmatprep.subr.bf16.mxu1 %v17566_v0  ;;  %v17588_v5 = vpack.c.bf16 %v11780_v23, %v11776_v2  ;;  %v17591_v47 = vsub.f32 %v17555_v18, %v11780_v23  ;;  %v12427_v19 = vand.u32 4294901760, %v17573_v7  ;;  %15149 = vpow2.f32 %v17473_v4 }
 0x9a4   :  { %18543 = vst [vmem:[#allocation41_spill] sm:$0xff] %v17585_v43  ;;  %v17595_v24 = vpop.eup %15131  ;;  %v17598_v15 = vsub.f32 %v17563_v22, %v12423_v53  ;;  %v11782_v40 = vand.u32 4294901760, %v17585_v43  ;;  %15151 = vpow2.f32 %v11699_v26  ;;  %v18277_v39 = vand.u32 4294901760, %v17470_v50 }
 0x9a5   :  { %18544 = vst [vmem:[#allocation39_spill] sm:$0xff] %v17588_v5  ;;  %18545 = vst [vmem:[#allocation43_spill] sm:$0xff] %v17595_v24  ;;  %v17602_v10 = vpop.eup %15133  ;;  %14301 = vmatpush1.bf16.msra.mxu0 %v17588_v5  ;;  %v17605_v2 = vpack.c.bf16 %v12427_v19, %v12423_v53  ;;  %v17608_v23 = vsub.f32 %v17573_v7, %v12427_v19  ;;  %v11786_v4 = vand.u32 4294901760, %v17595_v24  ;;  %v18551_v54 = vand.u32 4294901760, %v17480_v33 }
 0x9a6   :  { %18546 = vst [vmem:[#allocation46_spill] sm:$0xff] %v17602_v10  ;;  %v17612_v17 = vpop.eup %15135  ;;  %v17615_v42 = vsub.f32 %v17585_v43, %v11782_v40  ;;  %v12429_v26 = vand.u32 4294901760, %v17602_v10  ;;  %v11861_v5 = vsub.f32 %v17470_v50, %v18277_v39  ;;  %v18300_v9 = vand.u32 4294901760, %v17496_v32 }
 0x9a7   :  { %18547 = vst [vmem:[#allocation52_spill] sm:$0xff] %v17605_v2  ;;  %18548 = vst [vmem:[#allocation49_spill] sm:$0xff] %v17612_v17  ;;  %v17622_v0 = vpop.eup %15137  ;;  %14397 = vmatpush1.bf16.msra.mxu1 %v17605_v2  ;;  %v17625_v19 = vpack.c.bf16 %v11786_v4, %v11782_v40  ;;  %v17628_v51 = vsub.f32 %v17595_v24, %v11786_v4  ;;  %v12433_v1 = vand.u32 4294901760, %v17612_v17  ;;  %v18553_v40 = vand.u32 4294901760, %v17486_v62 }
 0x9a8   :  { %18549 = vst [vmem:[#allocation55_spill] sm:$0xff] %v17622_v0  ;;  %v11873_v11 = vsub.f32 %v17480_v33, %v18551_v54  ;;  %v17634_v36 = vpop.eup %15139  ;;  %v17637_v39 = vsub.f32 %v17602_v10, %v12429_v26  ;;  %v11784_v53 = vand.u32 4294901760, %v17622_v0  ;;  %v11862_v27 = vand.u32 4294901760, %v11861_v5 }
 0x9a9   :  { %18550 = vst [vmem:[#allocation58_spill] sm:$0xff] %v17625_v19  ;;  %18552 = vst [vmem:[#allocation63_spill] sm:$0xff] %v17634_v36  ;;  %v12508_v2 = vsub.f32 %v17486_v62, %v18553_v40  ;;  %v17643_v4 = vpop.eup %15141  ;;  %14303 = vmatprep.subr.bf16.mxu0 %v17625_v19  ;;  %v17646_v30 = vpack.c.bf16 %v12433_v1, %v12429_v26  ;;  %v17649_v54 = vsub.f32 %v17612_v17, %v12433_v1 }
 0x9aa   :  { %18554 = vst [vmem:[#allocation61_spill] sm:$0xff] %v17643_v4  ;;  %v11788_v24 = vand.u32 4294901760, %v17634_v36  ;;  %v11874_v10 = vand.u32 4294901760, %v11873_v11  ;;  %v17652_v43 = vpop.eup %15143  ;;  %v17655_v5 = vsub.f32 %v17622_v0, %v11784_v53  ;;  %v12431_v25 = vand.u32 4294901760, %v17643_v4 }
 0x9ab   :  { %18555 = vst [vmem:[#allocation65_spill] sm:$0xff] %v17646_v30  ;;  %18556 = vst [vmem:[#allocation67_spill] sm:$0xff] %v17652_v43  ;;  %v12509_v40 = vand.u32 4294901760, %v12508_v2  ;;  %v17659_v7 = vpop.eup %15145  ;;  %14399 = vmatprep.subr.bf16.mxu1 %v17646_v30  ;;  %v12435_v11 = vand.u32 4294901760, %v17652_v43  ;;  %v12520_v18 = vsub.f32 %v17496_v32, %v18300_v9  ;;  %v18563_v38 = vand.u32 4294901760, %v17425_v3 }
 0x9ac   :  { %18557 = vst [vmem:[#allocation69_spill] sm:$0xff] %v17659_v7  ;;  %v17662_v26 = vpack.c.bf16 %v11788_v24, %v11784_v53  ;;  %v17665_v1 = vsub.f32 %v17634_v36, %v11788_v24  ;;  %v14310_v19 = vpack.c.bf16 %v11874_v10, %v11862_v27  ;;  %v17668_v17 = vpop.eup %15147  ;;  %v17671_v0 = vsub.f32 %v17643_v4, %v12431_v25 }
 0x9ad   :  { %18559 = vst [vmem:[#allocation26_spill] sm:$0xff] %v17668_v17  ;;  %v11790_v2 = vand.u32 4294901760, %v17659_v7  ;;  %v17678_v30 = vpop.eup %15149  ;;  %v17681_v24 = vpack.c.bf16 %v12435_v11, %v12431_v25  ;;  %v17684_v10 = vsub.f32 %v17652_v43, %v12435_v11  ;;  %v12437_v27 = vand.u32 4294901760, %v17668_v17 }
 0x9ae   :  { %18558 = vst [vmem:[#allocation25_spill] sm:$0xff] %v17662_v26  ;;  %18560 = vst [vmem:[#allocation28_spill] sm:$0xff] %v17678_v30  ;;  %14305 = vmatpush1.bf16.msra.mxu0 %v17662_v26  ;;  %v17688_v4 = vpop.eup %15151  ;;  %v11792_v26 = vand.u32 4294901760, %v17678_v30  ;;  %v12521_v25 = vand.u32 4294901760, %v12520_v18  ;;  %v18566_v11 = vand.u32 4294901760, %v17433_v55  ;;  %v18573_v55 = vand.u32 4294901760, %v17516_v45 }
 0x9af   :  { %18561 = vst [vmem:[#allocation29_spill] sm:$0xff] %v17681_v24  ;;  %18562 = vst [vmem:[#allocation15_spill] sm:$0xff] %v17688_v4  ;;  %v17692_v9 = vpack.c.bf16 %v18563_v38, %v11790_v2  ;;  %v17695_v53 = vsub.f32 %v17659_v7, %v11790_v2  ;;  %14401 = vmatpush1.bf16.msra.mxu1 %v17681_v24  ;;  %v17704_v36 = vsub.f32 %v17668_v17, %v12437_v27 }
 0x9b0   :  { %v17701_v43 = vpack.c.bf16 %v18566_v11, %v12437_v27  ;;  %v12439_v60 = vand.u32 4294901760, %v17688_v4  ;;  %v18569_v38 = vand.u32 4294901760, %v17502_v16  ;;  %v18570_v2 = vand.u32 4294901760, %v17411_v49 }
 0x9b1   :  { %18564 = vst [vmem:[#allocation12_spill] sm:$0xff] %v17692_v9  ;;  %18565 = vst [vmem:[#allocation13_spill] sm:$0xff] %v17695_v53  ;;  %14307 = vmatprep.subr.bf16.mxu0 %v17692_v9  ;;  %v17716_v24 = vsub.f32 %v17678_v30, %v11792_v26  ;;  %v14406_v11 = vpack.c.bf16 %v12521_v25, %v12509_v40  ;;  %v11879_v27 = vsub.f32 %v17516_v45, %v18573_v55 }
 0x9b2   :  { %18567 = vst [vmem:[#allocation14_spill] sm:$0xff] %v17701_v43  ;;  %18568 = vst [vmem:[#allocation19_spill] sm:$0xff] %v17704_v36  ;;  %v11867_v3 = vsub.f32 %v17502_v16, %v18569_v38  ;;  %v17713_v18 = vpack.c.bf16 %v18570_v2, %v11792_v26  ;;  %14403 = vmatprep.subr.bf16.mxu1 %v17701_v43  ;;  %v18574_v17 = vand.u32 4294901760, %v17419_v59  ;;  %v18316_v2 = vand.u32 4294901760, %v17523_v63 }
 0x9b3   :  { %18572 = vst [vmem:[#allocation17_spill] sm:$0xff] %v17716_v24  ;;  %v17727_v38 = vsub.f32 %v17688_v4, %v12439_v60  ;;  %v11880_v26 = vand.u32 4294901760, %v11879_v27  ;;  %v18317_v40 = vand.u32 4294901760, %v17534_v21  ;;  %v18576_v55 = vand.u32 4294901760, %v17541_v8 }
 0x9b4   :  { %18571 = vst [vmem:[#allocation16_spill] sm:$0xff] %v17713_v18  ;;  %v17724_v7 = vpack.c.bf16 %v18574_v17, %v12439_v60  ;;  %v11868_v49 = vand.u32 4294901760, %v11867_v3  ;;  %14309 = vmatpush1.bf16.msra.mxu0 %v17713_v18  ;;  %v12514_v17 = vsub.f32 %v17523_v63, %v18316_v2  ;;  %v18342_v18 = vand.u32 4294901760, %v17576_v57 }
 0x9b5   :  { %14311 = vmatprep.subr.bf16.mxu0 %v14310_v19  ;;  %v12526_v25 = vsub.f32 %v17534_v21, %v18317_v40  ;;  %v11885_v19 = vsub.f32 %v17541_v8, %v18576_v55  ;;  %v18578_v60 = vand.u32 4294901760, %v17558_v48 }
 0x9b6   :  { %18575 = vst [vmem:[#allocation18_spill] sm:$0xff] %v17724_v7  ;;  %14405 = vmatpush1.bf16.msra.mxu1 %v17724_v7  ;;  %v14312_v27 = vpack.c.bf16 %v11880_v26, %v11868_v49  ;;  %v18577_v7 = vand.u32 4294901760, %v17551_v12  ;;  %v12515_v3 = vand.u32 4294901760, %v12514_v17  ;;  %v18579_v49 = vand.u32 4294901760, %v17569_v37 }
 0x9b7   :  { %14407 = vmatprep.subr.bf16.mxu1 %v14406_v11  ;;  %11852 = vmatmul.mubr.f32.vlgmr.msra.gmra.mrb[48].mxu0 %v17365_v20  ;;  %v12532_v11 = vsub.f32 %v17558_v48, %v18578_v60  ;;  %v11891_v40 = vsub.f32 %v17576_v57, %v18342_v18  ;;  %v12527_v55 = vand.u32 4294901760, %v12526_v25  ;;  %v18329_v17 = vand.u32 4294901760, %v17591_v47 }
 0x9b8   :  { %v11897_v2 = vsub.f32 %v17551_v12, %v18577_v7  ;;  %v12544_v26 = vsub.f32 %v17569_v37, %v18579_v49  ;;  %14313 = vmatpush1.bf16.msra.mxu0 %v14312_v27  ;;  %v11886_v7 = vand.u32 4294901760, %v11885_v19  ;;  %v18328_v60 = vand.u32 4294901760, %v17598_v15  ;;  %12002 = vmatprep.mubr.f32.mxu0 %v18425_v28 }
 0x9b9   :  { %12499 = vmatmul.mubr.f32.vlgmr.msra.gmra.mrb[48].mxu1 %v17365_v20  ;;  %v12533_v9 = vand.u32 4294901760, %v12532_v11  ;;  %v11892_v4 = vand.u32 4294901760, %v11891_v40  ;;  %v14408_v49 = vpack.c.bf16 %v12527_v55, %v12515_v3  ;;  %v11903_v20 = vsub.f32 %v17591_v47, %v18329_v17 }
 0x9ba   :  { %v11898_v43 = vand.u32 4294901760, %v11897_v2  ;;  %v12545_v59 = vand.u32 4294901760, %v12544_v26  ;;  %12649 = vmatprep.mubr.f32.mxu1 %v18425_v28  ;;  %v18325_v25 = vand.u32 4294901760, %v17608_v23  ;;  %v12538_v27 = vsub.f32 %v17598_v15, %v18328_v60 }
 0x9bb   :  { %v18326_v40 = vand.u32 4294901760, %v17615_v42  ;;  %v18327_v19 = vand.u32 4294901760, %v17628_v51  ;;  %14409 = vmatpush1.bf16.msra.mxu1 %v14408_v49  ;;  %v11904_v11 = vand.u32 4294901760, %v11903_v20  ;;  %v18330_v3 = vand.u32 4294901760, %v17637_v39 }
 0x9bc   :  { %v14314_v30 = vpack.c.bf16 %v11898_v43, %v11886_v7  ;;  %v14410_v2 = vpack.c.bf16 %v12545_v59, %v12533_v9  ;;  %v12550_v43 = vsub.f32 %v17608_v23, %v18325_v25  ;;  %v18331_v26 = vand.u32 4294901760, %v17649_v54 }
 0x9bd   :  { %v12539_v59 = vand.u32 4294901760, %v12538_v27  ;;  %v11909_v9 = vsub.f32 %v17615_v42, %v18326_v40  ;;  %v11921_v55 = vsub.f32 %v17628_v51, %v18327_v19  ;;  %v14316_v7 = vpack.c.bf16 %v11904_v11, %v11892_v4 }
 0x9be   :  { %14315 = vmatprep.subr.bf16.mxu0 %v14314_v30  ;;  %14411 = vmatprep.subr.bf16.mxu1 %v14410_v2  ;;  %v18332_v30 = vand.u32 4294901760, %v17655_v5  ;;  %v12551_v49 = vand.u32 4294901760, %v12550_v43  ;;  %v12556_v20 = vsub.f32 %v17637_v39, %v18330_v3  ;;  %v12568_v2 = vsub.f32 %v17649_v54, %v18331_v26 }
 0x9bf   :  { %v11910_v27 = vand.u32 4294901760, %v11909_v9  ;;  %v11922_v25 = vand.u32 4294901760, %v11921_v55  ;;  %v18337_v19 = vand.u32 4294901760, %v17665_v1  ;;  %14317 = vmatpush1.bf16.msra.mxu0 %v14316_v7  ;;  %v18336_v43 = vand.u32 4294901760, %v17671_v0 }
 0x9c0   :  { %v11915_v40 = vsub.f32 %v17655_v5, %v18332_v30  ;;  %v14412_v60 = vpack.c.bf16 %v12551_v49, %v12539_v59  ;;  %v12557_v4 = vand.u32 4294901760, %v12556_v20  ;;  %v12569_v11 = vand.u32 4294901760, %v12568_v2 }
 0x9c1   :  { %v14318_v17 = vpack.c.bf16 %v11922_v25, %v11910_v27  ;;  %v11927_v26 = vsub.f32 %v17665_v1, %v18337_v19  ;;  %v18333_v9 = vand.u32 4294901760, %v17684_v10  ;;  %v12562_v30 = vsub.f32 %v17671_v0, %v18336_v43 }
 0x9c2   :  { %v11916_v3 = vand.u32 4294901760, %v11915_v40  ;;  %14413 = vmatpush1.bf16.msra.mxu1 %v14412_v60  ;;  %v14414_v55 = vpack.c.bf16 %v12569_v11, %v12557_v4  ;;  %v18334_v59 = vand.u32 4294901760, %v17695_v53  ;;  %v18335_v7 = vand.u32 4294901760, %v17453_v34 }
 0x9c3   :  { %14319 = vmatprep.subr.bf16.mxu0 %v14318_v17  ;;  %v11928_v49 = vand.u32 4294901760, %v11927_v26  ;;  %v12574_v25 = vsub.f32 %v17684_v10, %v18333_v9  ;;  %v18338_v40 = vand.u32 4294901760, %v17704_v36  ;;  %v18339_v20 = vand.u32 4294901760, %v17465_v41 }
 0x9c4   :  { %14415 = vmatprep.subr.bf16.mxu1 %v14414_v55  ;;  %v12563_v60 = vand.u32 4294901760, %v12562_v30  ;;  %v11933_v2 = vsub.f32 %v17695_v53, %v18334_v59  ;;  %v11945_v27 = vsub.f32 %v17453_v34, %v18335_v7  ;;  %v18340_v17 = vand.u32 4294901760, %v17716_v24 }
 0x9c5   :  { %v14320_v26 = vpack.c.bf16 %v11928_v49, %v11916_v3  ;;  %v12575_v4 = vand.u32 4294901760, %v12574_v25  ;;  %v12580_v11 = vsub.f32 %v17704_v36, %v18338_v40  ;;  %v12592_v30 = vsub.f32 %v17465_v41, %v18339_v20 }
 0x9c6   :  { %v11934_v55 = vand.u32 4294901760, %v11933_v2  ;;  %v11946_v9 = vand.u32 4294901760, %v11945_v27  ;;  %v11939_v59 = vsub.f32 %v17716_v24, %v18340_v17  ;;  %v18341_v7 = vand.u32 4294901760, %v17508_v52 }
 0x9c7   :  { %14321 = vmatpush1.bf16.msra.mxu0 %v14320_v26  ;;  %v14416_v43 = vpack.c.bf16 %v12575_v4, %v12563_v60  ;;  %v12581_v3 = vand.u32 4294901760, %v12580_v11  ;;  %v12593_v49 = vand.u32 4294901760, %v12592_v30  ;;  %v12585_v25 = vand.u32 4294901760, %v17727_v38 }
 0x9c8   :  { %v14322_v19 = vpack.c.bf16 %v11946_v9, %v11934_v55  ;;  %v11940_v40 = vand.u32 4294901760, %v11939_v59  ;;  %v11951_v20 = vsub.f32 %v17508_v52, %v18341_v7  ;;  %v12597_v2 = vand.u32 4294901760, %v17583_v14 }
 0x9c9   :  { %14417 = vmatpush1.bf16.msra.mxu1 %v14416_v43  ;;  %v14418_v27 = vpack.c.bf16 %v12593_v49, %v12581_v3  ;;  %v12586_v17 = vsub.f32 %v17727_v38, %v12585_v25  ;;  %v14326_v26 = vpack.c.bf16 %v17480_v33, %v17470_v50  ;;  %v14422_v60 = vpack.c.bf16 %v17496_v32, %v17486_v62 }
 0x9ca   :  { %14323 = vmatprep.subr.bf16.mxu0 %v14322_v19  ;;  %v11952_v4 = vand.u32 4294901760, %v11951_v20  ;;  %v12598_v9 = vsub.f32 %v17583_v14, %v12597_v2  ;;  %v14328_v59 = vpack.c.bf16 %v17516_v45, %v17502_v16  ;;  %v14424_v11 = vpack.c.bf16 %v17534_v21, %v17523_v63 }
 0x9cb   :  { %14419 = vmatprep.subr.bf16.mxu1 %v14418_v27  ;;  %v12587_v43 = vand.u32 4294901760, %v12586_v17  ;;  %v14330_v30 = vpack.c.bf16 %v17551_v12, %v17541_v8  ;;  %v14426_v55 = vpack.c.bf16 %v17569_v37, %v17558_v48  ;;  %v14332_v19 = vpack.c.bf16 %v17591_v47, %v17576_v57 }
 0x9cc   :  { %v14324_v20 = vpack.c.bf16 %v11952_v4, %v11940_v40  ;;  %v12599_v3 = vand.u32 4294901760, %v12598_v9  ;;  %v14428_v49 = vpack.c.bf16 %v17608_v23, %v17598_v15  ;;  %v14334_v7 = vpack.c.bf16 %v17628_v51, %v17615_v42 }
 0x9cd   :  { %v14430_v17 = vpack.c.bf16 %v17649_v54, %v17637_v39  ;;  %v14336_v27 = vpack.c.bf16 %v17665_v1, %v17655_v5  ;;  %v14432_v18 = vpack.c.bf16 %v17684_v10, %v17671_v0  ;;  %v14436_v40 = vpack.c.bf16 %v17583_v14, %v17727_v38 }
 0x9ce   :  { %14325 = vmatpush1.bf16.msra.mxu0 %v14324_v20  ;;  %v14420_v52 = vpack.c.bf16 %v12599_v3, %v12587_v43  ;;  %v18580_v4 = vand.u32 4294901760, %v17470_v50  ;;  %v18581_v9 = vand.u32 4294901760, %v17480_v33  ;;  %v18582_v41 = vand.u32 4294901760, %v17486_v62 }
 0x9cf   :  { %14327 = vmatprep.subr.bf16.mxu0 %v14326_v26  ;;  %v18583_v36 = vand.u32 4294901760, %v17496_v32  ;;  %v18584_v53 = vand.u32 4294901760, %v17502_v16  ;;  %v18585_v43 = vand.u32 4294901760, %v17516_v45  ;;  %v18586_v14 = vand.u32 4294901760, %v17523_v63 }
 0x9d0   :  { %v17865_v24 = vpack.c.bf16 %v18581_v9, %v18580_v4  ;;  %v18587_v50 = vand.u32 4294901760, %v17534_v21  ;;  %14421 = vmatpush1.bf16.msra.mxu1 %v14420_v52  ;;  %v18588_v33 = vand.u32 4294901760, %v17541_v8  ;;  %v18589_v62 = vand.u32 4294901760, %v17551_v12  ;;  %v18609_v4 = vld [vmem:[#allocation32_spill] sm:$0xff]  ;;  %v18613_v9 = vld [vmem:[#allocation61_spill] sm:$0xff] }
 0x9d1   :  { %v17871_v34 = vpack.c.bf16 %v18583_v36, %v18582_v41  ;;  %v17877_v20 = vpack.c.bf16 %v18585_v43, %v18584_v53  ;;  %v18590_v36 = vand.u32 4294901760, %v17558_v48  ;;  %v18591_v41 = vand.u32 4294901760, %v17569_v37  ;;  %14423 = vmatprep.subr.bf16.mxu1 %v14422_v60  ;;  %12004 = vmatmul.mubr.f32.vlgmr.msra.gmra.mrb[48].mxu0 %v17345_v58 }
 0x9d2   :  { %v17883_v38 = vpack.c.bf16 %v18587_v50, %v18586_v14  ;;  %v17889_v32 = vpack.c.bf16 %v18589_v62, %v18588_v33  ;;  %v18592_v45 = vand.u32 4294901760, %v17576_v57  ;;  %v18593_v63 = vand.u32 4294901760, %v17591_v47  ;;  %14329 = vmatpush1.bf16.msra.mxu0 %v14328_v59  ;;  %12106 = vmatprep.mubr.f32.mxu0 %v18425_v28  ;;  %v18614_v14 = vld [vmem:[#allocation41_spill] sm:$0xff]  ;;  %v18615_v50 = vld [vmem:[#allocation46_spill] sm:$0xff]  ;;  %v18617_v62 = vld [vmem:[#allocation68_spill] sm:$0xff] }
 0x9d3   :  { %v17895_v16 = vpack.c.bf16 %v18591_v41, %v18590_v36  ;;  %v18594_v52 = vand.u32 4294901760, %v17598_v15  ;;  %v18595_v8 = vand.u32 4294901760, %v17608_v23  ;;  %v18596_v12 = vand.u32 4294901760, %v17615_v42  ;;  %12651 = vmatmul.mubr.f32.vlgmr.msra.gmra.mrb[48].mxu1 %v17345_v58  ;;  %14331 = vmatprep.subr.bf16.mxu0 %v14330_v30  ;;  %v18618_v41 = vld [vmem:[#allocation63_spill] sm:$0xff] }
 0x9d4   :  { %v17901_v21 = vpack.c.bf16 %v18593_v63, %v18592_v45  ;;  %v18597_v48 = vand.u32 4294901760, %v17628_v51  ;;  %v18598_v57 = vand.u32 4294901760, %v17637_v39  ;;  %v18599_v47 = vand.u32 4294901760, %v17649_v54  ;;  %14425 = vmatpush1.bf16.msra.mxu1 %v14424_v11  ;;  %12753 = vmatprep.mubr.f32.mxu1 %v18425_v28  ;;  %v18606_v11 = vld [vmem:[#allocation33_spill] sm:$0xff]  ;;  %v18620_v63 = vld [vmem:[#allocation47_spill] sm:$0xff] }
 0x9d5   :  { %v17907_v53 = vpack.c.bf16 %v18595_v8, %v18594_v52  ;;  %v18600_v15 = vand.u32 4294901760, %v17655_v5  ;;  %v18601_v23 = vand.u32 4294901760, %v17665_v1  ;;  %v18602_v42 = vand.u32 4294901760, %v17671_v0  ;;  %14427 = vmatprep.subr.bf16.mxu1 %v14426_v55  ;;  %v18621_v8 = vld [vmem:[#allocation67_spill] sm:$0xff] }
 0x9d6   :  { %v17914_v37 = vpack.c.bf16 %v18597_v48, %v18596_v12  ;;  %v17920_v26 = vpack.c.bf16 %v18599_v47, %v18598_v57  ;;  %v18603_v51 = vand.u32 4294901760, %v17684_v10  ;;  %v17936_v39 = vpack.c.bf16 %v12597_v2, %v12585_v25  ;;  %14333 = vmatpush1.bf16.msra.mxu0 %v14332_v19  ;;  %v18604_v2 = vld [vmem:[#allocation50_spill] sm:$0xff]  ;;  %v18612_v19 = vld [vmem:[#allocation55_spill] sm:$0xff]  ;;  %v18623_v57 = vld [vmem:[#allocation49_spill] sm:$0xff] }
 0x9d7   :  { %v17926_v3 = vpack.c.bf16 %v18601_v23, %v18600_v15  ;;  %v11711_v54 = vadd.f32 %v17483_v31, %v17475_v13  ;;  %v11737_v5 = vadd.f32 %v17499_v44, %v17490_v6  ;;  %v11724_v0 = vadd.f32 %v17447_v29, %v17440_v46  ;;  %v18605_v31 = vld [vmem:[#allocation57_spill] sm:$0xff]  ;;  %14335 = vmatprep.subr.bf16.mxu0 %v14334_v7  ;;  %v18607_v6 = vld [vmem:[#allocation36_spill] sm:$0xff]  ;;  %v18608_v46 = vld [vmem:[#allocation62_spill] sm:$0xff] }
 0x9d8   :  { %v17933_v60 = vpack.c.bf16 %v18603_v51, %v18602_v42  ;;  %v11750_v1 = vadd.f32 %v17467_v35, %v17457_v56  ;;  %14429 = vmatpush1.bf16.msra.mxu1 %v14428_v49  ;;  %v18610_v35 = vld [vmem:[#allocation13_spill] sm:$0xff]  ;;  %v18616_v49 = vld [vmem:[#allocation19_spill] sm:$0xff]  ;;  %v18624_v15 = vld [vmem:[#allocation28_spill] sm:$0xff] }
 0x9d9   :  { %v11712_v10 = vadd.f32 %v17545_v61, %v11711_v54  ;;  %v11738_v25 = vadd.f32 %v17563_v22, %v11737_v5  ;;  %v11725_v13 = vadd.f32 %v18604_v2, %v11724_v0  ;;  %14431 = vmatprep.subr.bf16.mxu1 %v14430_v17  ;;  %v18611_v61 = vld [vmem:[#allocation53_spill] sm:$0xff]  ;;  %v14434_v36 = vpack.c.bf16 %v18617_v62, %v18616_v49  ;;  %v18622_v48 = vld [vmem:[#allocation43_spill] sm:$0xff]  ;;  %v18630_v2 = vld [vmem:[#allocation56_spill] sm:$0xff] }
 0x9da   :  { %v11751_v59 = vadd.f32 %v18605_v31, %v11750_v1  ;;  %v14338_v55 = vpack.c.bf16 %v18611_v61, %v18610_v35  ;;  %14337 = vmatpush1.bf16.msra.mxu0 %v14336_v27  ;;  %v18619_v17 = vld [vmem:[#allocation17_spill] sm:$0xff]  ;;  %v18625_v42 = vld [vmem:[#allocation15_spill] sm:$0xff]  ;;  %v18628_v1 = vld [vmem:[#allocation34_spill] sm:$0xff] }
 0x9db   :  { %v11713_v30 = vadd.f32 %v18606_v11, %v11712_v10  ;;  %v11739_v44 = vadd.f32 %v18607_v6, %v11738_v25  ;;  %v11726_v29 = vadd.f32 %v18608_v46, %v11725_v13  ;;  %v14340_v52 = vpack.c.bf16 %v18620_v63, %v18619_v17  ;;  %v18626_v54 = vld [vmem:[#allocation69_spill] sm:$0xff]  ;;  %v18629_v10 = vld [vmem:[#allocation48_spill] sm:$0xff]  ;;  %v18631_v13 = vld [vmem:[#allocation51_spill] sm:$0xff] }
 0x9dc   :  { %v11752_v56 = vadd.f32 %v18609_v4, %v11751_v59  ;;  %14339 = vmatprep.subr.bf16.mxu0 %v14338_v55  ;;  %14433 = vmatpush1.bf16.msra.mxu1 %v14432_v18  ;;  %v18627_v18 = vld [vmem:[#allocation26_spill] sm:$0xff]  ;;  %v18632_v31 = vld [vmem:[#allocation60_spill] sm:$0xff]  ;;  %v18633_v59 = vld [vmem:[#allocation27_spill] sm:$0xff] }
 0x9dd   :  { %v11714_v22 = vadd.f32 %v18612_v19, %v11713_v30  ;;  %v11740_v43 = vadd.f32 %v18613_v9, %v11739_v44  ;;  %v11727_v7 = vadd.f32 %v18614_v14, %v11726_v29  ;;  %14435 = vmatprep.subr.bf16.mxu1 %v14434_v36  ;;  %v18634_v11 = vld [vmem:[#allocation59_spill] sm:$0xff]  ;;  %v18637_v6 = vld [vmem:[#allocation58_spill] sm:$0xff]  ;;  %v18638_v44 = vld [vmem:[#allocation52_spill] sm:$0xff] }
 0x9de   :  { %v11753_v33 = vadd.f32 %v18615_v50, %v11752_v56  ;;  %14341 = vmatpush1.bf16.msra.mxu0 %v14340_v52  ;;  %v18636_v30 = vld [vmem:[#allocation39_spill] sm:$0xff]  ;;  %v18639_v46 = vld [vmem:[#allocation65_spill] sm:$0xff]  ;;  %v18641_v4 = vld [vmem:[#allocation12_spill] sm:$0xff] }
 0x9df   :  { %v11715_v45 = vadd.f32 %v18618_v41, %v11714_v22  ;;  %v11741_v12 = vadd.f32 %v18621_v8, %v11740_v43  ;;  %v11728_v27 = vadd.f32 %v18622_v48, %v11727_v7  ;;  %14343 = vmatprep.subr.bf16.mxu0 %v18628_v1  ;;  %v18640_v29 = vld [vmem:[#allocation25_spill] sm:$0xff]  ;;  %v18643_v55 = vld [vmem:[#allocation14_spill] sm:$0xff]  ;;  %v18644_v19 = vld [vmem:[#allocation16_spill] sm:$0xff] }
 0x9e0   :  { %v11754_v47 = vadd.f32 %v18623_v57, %v11753_v33  ;;  %14437 = vmatpush1.bf16.msra.mxu1 %v14436_v40  ;;  %v18635_v40 = vld [vmem:[#allocation24_spill] sm:$0xff]  ;;  %v18642_v56 = vld [vmem:[#allocation29_spill] sm:$0xff]  ;;  %v18645_v22 = vld [vmem:[#allocation18_spill] sm:$0xff] }
 0x9e1   :  { %v17970_v23 = vadd.f32 %v18624_v15, %v11715_v45  ;;  %v11742_v51 = vadd.f32 %v18625_v42, %v11741_v12  ;;  %v17974_v5 = vadd.f32 %v18626_v54, %v11728_v27  ;;  %14439 = vmatprep.subr.bf16.mxu1 %v18630_v2  ;;  %12109 = vmatmul.mubr.f32.vlgmr.msra.gmra.mrb[48].mxu0 %v18631_v13  ;;  %v18646_v9 = vld [vmem:[#allocation54_spill] sm:$0xff] }
 0x9e2   :  { %v17977_v0 = vadd.f32 %v18627_v18, %v11754_v47  ;;  %14345 = vmatpush1.bf16.msra.mxu0 %v18632_v31  ;;  %12195 = vmatprep.mubr.f32.mxu0 %v18425_v28 }
 0x9e3   :  { %v17981_v25 = vadd.f32 %v18629_v10, %v11742_v51  ;;  %12756 = vmatmul.mubr.f32.vlgmr.msra.gmra.mrb[48].mxu1 %v18631_v13  ;;  %14347 = vmatprep.subr.bf16.mxu0 %v18633_v59 }
 0x9e4   :  { %14441 = vmatpush1.bf16.msra.mxu1 %v18634_v11  ;;  %12842 = vmatprep.mubr.f32.mxu1 %v18425_v28 }
 0x9e5   :  { %14443 = vmatprep.subr.bf16.mxu1 %v18635_v40  ;;  %v11744_v7 = vrot.slane %v17981_v25, 4 }
 0x9e6   :  { %14349 = vmatpush1.bf16.msra.mxu0 %v18636_v30 }
 0x9e7   :  { %14351 = vmatprep.subr.bf16.mxu0 %v18637_v6 }
 0x9e8   :  { %14445 = vmatpush1.bf16.msra.mxu1 %v18638_v44 }
 0x9e9   :  { %14447 = vmatprep.subr.bf16.mxu1 %v18639_v46 }
 0x9ea   :  { %14353 = vmatpush1.bf16.msra.mxu0 %v18640_v29 }
 0x9eb   :  { %14355 = vmatprep.subr.bf16.mxu0 %v18641_v4 }
 0x9ec   :  { %14449 = vmatpush1.bf16.msra.mxu1 %v18642_v56 }
 0x9ed   :  { %14451 = vmatprep.subr.bf16.mxu1 %v18643_v55 }
 0x9ee   :  { %14357 = vmatpush1.bf16.msra.mxu0 %v18644_v19 }
 0x9ef   :  { %14359 = vmatprep.subr.bf16.mxu0 %v17865_v24  ;;  %v18648_v24 = vand.u32 4294901760, %v18611_v61 }
 0x9f0   :  { %14453 = vmatpush1.bf16.msra.mxu1 %v18645_v22 }
 0x9f1   :  { %14455 = vmatprep.subr.bf16.mxu1 %v17871_v34  ;;  %12199 = vmatmul.mubr.f32.vlgmr.msra.gmra.mrb[48].mxu0 %v18646_v9  ;;  %v18647_v34 = vand.u32 4294901760, %v18610_v35  ;;  %v18655_v35 = vld [vmem:[#allocation31_spill] sm:$0xff] }
 0x9f2   :  { %14361 = vmatpush1.bf16.msra.mxu0 %v17877_v20  ;;  %12317 = vmatprep.mubr.f32.mxu0 %v18425_v28  ;;  %v11756_v61 = vadd.f32 %v18655_v35, %v17977_v0 }
 0x9f3   :  { %12846 = vmatmul.mubr.f32.vlgmr.msra.gmra.mrb[48].mxu1 %v18646_v9  ;;  %14363 = vmatprep.subr.bf16.mxu0 %v17889_v32  ;;  %v14370_v20 = vpack.c.bf16 %v18648_v24, %v18647_v34  ;;  %v18650_v32 = vand.u32 4294901760, %v18617_v62 }
 0x9f4   :  { %14457 = vmatpush1.bf16.msra.mxu1 %v17883_v38  ;;  %12964 = vmatprep.mubr.f32.mxu1 %v18425_v28  ;;  %v18649_v38 = vand.u32 4294901760, %v18616_v49  ;;  %v11757_v50 = vrot.slane %v11756_v61, 4 }
 0x9f5   :  { %14459 = vmatprep.subr.bf16.mxu1 %v17895_v16 }
 0x9f6   :  { %14365 = vmatpush1.bf16.msra.mxu0 %v17901_v21  ;;  %v14466_v16 = vpack.c.bf16 %v18650_v32, %v18649_v38  ;;  %v18651_v21 = vand.u32 4294901760, %v18619_v17  ;;  %v11758_v62 = vadd.f32 %v11757_v50, %v11756_v61 }
 0x9f7   :  { %14367 = vmatprep.subr.bf16.mxu0 %v17914_v37 }
 0x9f8   :  { %14461 = vmatpush1.bf16.msra.mxu1 %v17907_v53  ;;  %v18652_v53 = vand.u32 4294901760, %v18620_v63  ;;  %v11759_v17 = vrot.slane %v11758_v62, 2 }
 0x9f9   :  { %14463 = vmatprep.subr.bf16.mxu1 %v17920_v26  ;;  %v18653_v26 = vld [vmem:[#allocation45_spill] sm:$0xff] }
 0x9fa   :  { %14369 = vmatpush1.bf16.msra.mxu0 %v17926_v3  ;;  %v14372_v37 = vpack.c.bf16 %v18652_v53, %v18651_v21  ;;  %v11717_v3 = vadd.f32 %v18653_v26, %v17970_v23  ;;  %v11760_v12 = vadd.f32 %v11759_v17, %v11758_v62  ;;  %v18657_v26 = vld [vmem:[#allocation35_spill] sm:$0xff]  ;;  %v18662_v17 = vld [vmem:[#allocation64_spill] sm:$0xff] }
 0x9fb   :  { %14371 = vmatprep.subr.bf16.mxu0 %v14370_v20 }
 0x9fc   :  { %14465 = vmatpush1.bf16.msra.mxu1 %v17933_v60  ;;  %v18654_v60 = vld [vmem:[#allocation66_spill] sm:$0xff]  ;;  %v11718_v43 = vrot.slane %v11717_v3, 4  ;;  %v11761_v47 = vrot.slane %v11760_v12, 1 }
 0x9fd   :  { %14467 = vmatprep.subr.bf16.mxu1 %v14466_v16 }
 0x9fe   :  { %14373 = vmatpush1.bf16.msra.mxu0 %v14372_v37  ;;  %v11719_v33 = vadd.f32 %v11718_v43, %v11717_v3  ;;  %v11762_v51 = vadd.f32 %v11761_v47, %v11760_v12  ;;  %v18658_v3 = vld [vmem:[#allocation38_spill] sm:$0xff] }
 0x9ff   :  { %14375 = vmatprep.subr.bf16.mxu0 %v18628_v1 }
 0xa00   :  { %14469 = vmatpush1.bf16.msra.mxu1 %v17936_v39  ;;  %v11730_v39 = vadd.f32 %v18654_v60, %v17974_v5  ;;  %v11720_v36 = vrot.slane %v11719_v33, 2  ;;  %v18659_v60 = vld [vmem:[#allocation42_spill] sm:$0xff] }
 0xa01   :  { %14471 = vmatprep.subr.bf16.mxu1 %v18630_v2  ;;  %12319 = vmatmul.mubr.f32.vlgmr.msra.gmra.mrb[48].mxu0 %v17345_v58 }
 0xa02   :  { %14377 = vmatpush1.bf16.msra.mxu0 %v18632_v31  ;;  %12405 = vmatprep.mubr.f32.mxu0 %v18425_v28  ;;  %v11731_v14 = vrot.slane %v11730_v39, 4  ;;  %v11721_v63 = vadd.f32 %v11720_v36, %v11719_v33  ;;  %v14002_v33 = vpop.xlane.xlu1 %14001  ;;  %v18660_v36 = vld [vmem:[#allocation37_spill] sm:$0xff] }
 0xa03   :  { %12966 = vmatmul.mubr.f32.vlgmr.msra.gmra.mrb[48].mxu1 %v17345_v58  ;;  %14379 = vmatprep.subr.bf16.mxu0 %v18633_v59 }
 0xa04   :  { %14473 = vmatpush1.bf16.msra.mxu1 %v18634_v11  ;;  %13052 = vmatprep.mubr.f32.mxu1 %v18425_v28  ;;  %v11732_v49 = vadd.f32 %v11731_v14, %v11730_v39  ;;  %v11722_v48 = vrot.slane %v11721_v63, 1 }
 0xa05   :  { %14475 = vmatprep.subr.bf16.mxu1 %v18635_v40 }
 0xa06   :  { %14381 = vmatpush1.bf16.msra.mxu0 %v18636_v30  ;;  %v11733_v41 = vrot.slane %v11732_v49, 2  ;;  %v11723_v15 = vadd.f32 %v11722_v48, %v11721_v63  ;;  %v18663_v48 = vld [vmem:[#allocation30_spill] sm:$0xff] }
 0xa07   :  { %14383 = vmatprep.subr.bf16.mxu0 %v18637_v6 }
 0xa08   :  { %14477 = vmatpush1.bf16.msra.mxu1 %v18638_v44  ;;  %v11734_v52 = vadd.f32 %v11733_v41, %v11732_v49  ;;  %15153 = vrcp.f32 %v11723_v15 }
 0xa09   :  { %14479 = vmatprep.subr.bf16.mxu1 %v18639_v46 }
 0xa0a   :  { %14385 = vmatpush1.bf16.msra.mxu0 %v18640_v29  ;;  %v11735_v27 = vrot.slane %v11734_v52, 1 }
 0xa0b   :  { %14387 = vmatprep.subr.bf16.mxu0 %v18641_v4 }
 0xa0c   :  { %14481 = vmatpush1.bf16.msra.mxu1 %v18642_v56  ;;  %v11736_v23 = vadd.f32 %v11735_v27, %v11734_v52 }
 0xa0d   :  { %14483 = vmatprep.subr.bf16.mxu1 %v18643_v55 }
 0xa0e   :  { %14389 = vmatpush1.bf16.msra.mxu0 %v18644_v19  ;;  %15155 = vrcp.f32 %v11736_v23  ;;  %v18656_v19 = vld [vmem:[#allocation44_spill] sm:$0xff] }
 0xa10   :  { %14485 = vmatpush1.bf16.msra.mxu1 %v18645_v22 }
 0xa11   :  { %12407 = vmatmul.mubr.f32.vlgmr.msra.gmra.mrb[48].mxu0 %v17345_v58 }
 0xa12   :  { %13134 = vmatprep.mubr.f32.mxu0 %v18425_v28  ;;  %v15154_v54 = vpop.eup %15153 }
 0xa13   :  { %13054 = vmatmul.mubr.f32.vlgmr.msra.gmra.mrb[48].mxu1 %v17345_v58  ;;  %v11745_v58 = vadd.f32 %v11744_v7, %v17981_v25 }
 0xa14   :  { %13599 = vmatprep.mubr.f32.mxu1 %v18425_v28 }
 0xa15   :  { %v11746_v45 = vrot.slane %v11745_v58, 2 }
 0xa17   :  { %v11747_v8 = vadd.f32 %v11746_v45, %v11745_v58  ;;  %v18661_v45 = vld [vmem:[#allocation40_spill] sm:$0xff] }
 0xa18   :  { %v15156_v18 = vpop.eup %15155 }
 0xa19   :  { %v11748_v57 = vrot.slane %v11747_v8, 1 }
 0xa1b   :  { %v11749_v42 = vadd.f32 %v11748_v57, %v11747_v8 }
 0xa1d   :  { %15157 = vrcp.f32 %v11749_v42 }
 0xa1e   :  { %15159 = vrcp.f32 %v11762_v51 }
 0xa27   :  { %v15158_v10 = vpop.eup %15157 }
 0xa28   :  { %v15160_v13 = vpop.eup %15159 }
 0xae4   :  { %v12408_v5 = vpop.f32.mrb[48].mxu0 }
 0xae5   :  { %v13061_v0 = vmul.f32 %v15154_v54, %v12408_v5  ;;  %v12410_v1 = vpop.f32.mrb[49].mxu0 }
 0xae6   :  { %v13055_v25 = vpop.f32.mrb[48].mxu1  ;;  %v13063_v2 = vmul.f32 %v15156_v18, %v12410_v1 }
 0xae7   :  { %v13070_v31 = vand.u32 4294901760, %v13061_v0  ;;  %v13065_v59 = vmul.f32 %v15158_v10, %v13055_v25  ;;  %v13057_v11 = vpop.f32.mrb[49].mxu1 }
 0xae8   :  { %v13068_v40 = vand.u32 4294901760, %v13063_v2  ;;  %v13067_v30 = vmul.f32 %v15160_v13, %v13057_v11 }
 0xae9   :  { %v13153_v6 = vsub.f32 %v13061_v0, %v13070_v31  ;;  %v13535_v44 = vand.u32 4294901760, %v13065_v59 }
 0xaea   :  { %v13147_v46 = vsub.f32 %v13063_v2, %v13068_v40  ;;  %v13533_v29 = vand.u32 4294901760, %v13067_v30  ;;  %13069 = vmatprep.subr.mxu0 %v13068_v40 }
 0xaeb   :  { %v13154_v4 = vand.u32 4294901760, %v13153_v6  ;;  %v13618_v56 = vsub.f32 %v13065_v59, %v13535_v44  ;;  %13071 = vmatpush1.msra.mxu0 %v13070_v31 }
 0xaec   :  { %v13612_v55 = vsub.f32 %v13067_v30, %v13533_v29  ;;  %13534 = vmatprep.subr.mxu1 %v13533_v29  ;;  %13140 = vmatmul.mubr.f32.vlgmr.msra.gmra.mrb[50].mxu0 %v18656_v19  ;;  %v13148_v22 = vand.u32 4294901760, %v13147_v46 }
 0xaed   :  { %v13155_v9 = vsub.f32 %v13153_v6, %v13154_v4  ;;  %v13619_v34 = vand.u32 4294901760, %v13618_v56  ;;  %13536 = vmatpush1.msra.mxu1 %v13535_v44  ;;  %13220 = vmatprep.mubr.f32.mxu0 %v18425_v28 }
 0xaee   :  { %13605 = vmatmul.mubr.f32.vlgmr.msra.gmra.mrb[50].mxu1 %v18656_v19  ;;  %v13149_v24 = vsub.f32 %v13147_v46, %v13148_v22  ;;  %v13613_v20 = vand.u32 4294901760, %v13612_v55 }
 0xaef   :  { %v13620_v38 = vsub.f32 %v13618_v56, %v13619_v34  ;;  %13685 = vmatprep.mubr.f32.mxu1 %v18425_v28  ;;  %v13156_v21 = vand.u32 4294901760, %v13155_v9 }
 0xaf0   :  { %v13150_v32 = vand.u32 4294901760, %v13149_v24  ;;  %v13614_v16 = vsub.f32 %v13612_v55, %v13613_v20 }
 0xaf1   :  { %v13621_v37 = vand.u32 4294901760, %v13620_v38 }
 0xaf2   :  { %13151 = vmatprep.subr.mxu0 %v13150_v32  ;;  %v13615_v53 = vand.u32 4294901760, %v13614_v16 }
 0xaf3   :  { %13157 = vmatpush1.msra.mxu0 %v13156_v21 }
 0xaf4   :  { %13616 = vmatprep.subr.mxu1 %v13615_v53  ;;  %13222 = vmatmul.mubr.f32.vlgmr.msra.gmra.mrb[50].mxu0 %v18657_v26 }
 0xaf5   :  { %13622 = vmatpush1.msra.mxu1 %v13621_v37  ;;  %13230 = vmatprep.subr.mxu0 %v13147_v46 }
 0xaf6   :  { %13687 = vmatmul.mubr.f32.vlgmr.msra.gmra.mrb[50].mxu1 %v18657_v26  ;;  %13695 = vmatprep.subr.mxu1 %v13612_v55 }
 0xaf7   :  { %13233 = vmatpush1.msra.mxu0 %v13153_v6  ;;  %13698 = vmatpush1.msra.mxu1 %v13618_v56 }
 0xaf8   :  { %13306 = vmatprep.subr.mxu0 %v13068_v40  ;;  %13771 = vmatprep.subr.mxu1 %v13533_v29 }
 0xaf9   :  { %13296 = vmatprep.mubr.f32.mxu0 %v18425_v28  ;;  %13761 = vmatprep.mubr.f32.mxu1 %v18425_v28 }
 0xafc   :  { %13299 = vmatmul.mubr.f32.vlgmr.msra.gmra.mrb[50].mxu0 %v18658_v3 }
 0xafd   :  { %13308 = vmatpush1.msra.mxu0 %v13070_v31  ;;  %13371 = vmatprep.mubr.f32.mxu0 %v18425_v28 }
 0xafe   :  { %13764 = vmatmul.mubr.f32.vlgmr.msra.gmra.mrb[50].mxu1 %v18658_v3  ;;  %13384 = vmatprep.subr.mxu0 %v13148_v22 }
 0xaff   :  { %13773 = vmatpush1.msra.mxu1 %v13535_v44  ;;  %13836 = vmatprep.mubr.f32.mxu1 %v18425_v28 }
 0xb00   :  { %13849 = vmatprep.subr.mxu1 %v13613_v20 }
 0xb04   :  { %13375 = vmatmul.mubr.f32.vlgmr.msra.gmra.mrb[50].mxu0 %v18659_v60 }
 0xb05   :  { %13388 = vmatpush1.msra.mxu0 %v13154_v4  ;;  %13451 = vmatprep.mubr.f32.mxu0 %v18425_v28  ;;  %v14101_v4 = vld [vmem:[%s18119_s5 + $0x8] sm:$0xff] }
 0xb06   :  { %13840 = vmatmul.mubr.f32.vlgmr.msra.gmra.mrb[50].mxu1 %v18659_v60  ;;  %13460 = vmatprep.subr.mxu0 %v13068_v40 }
 0xb07   :  { %13853 = vmatpush1.msra.mxu1 %v13619_v34  ;;  %13916 = vmatprep.mubr.f32.mxu1 %v18425_v28 }
 0xb08   :  { %13925 = vmatprep.subr.mxu1 %v13533_v29 }
 0xb0c   :  { %13453 = vmatmul.mubr.f32.vlgmr.msra.gmra.mrb[50].mxu0 %v18657_v26 }
 0xb0d   :  { %13462 = vmatpush1.msra.mxu0 %v13070_v31  ;;  %13525 = vmatprep.mubr.f32.mxu0 %v18425_v28  ;;  %v15264_v31 = vmov 0  }
 0xb0e   :  { %13918 = vmatmul.mubr.f32.vlgmr.msra.gmra.mrb[50].mxu1 %v18657_v26  ;;  %15015 = vset.pattern.permute.xlu1 %v15264_v31 }
 0xb0f   :  { %13927 = vmatpush1.msra.mxu1 %v13535_v44  ;;  %13990 = vmatprep.mubr.f32.mxu1 %v18425_v28  ;;  %v14038_v44 = vld [vmem:[%s18119_s5] sm:$0xff]  ;;  %s15229_s5 = scalar_lea.vmem %s14087_s21, 1024 }
 0xb10   :  { %15016 = vset.pattern.permute.xlu0 %v15264_v31  ;;  %p15230_p10 = scmp.ne.s32.totalorder %s14087_s21, %s15229_s5  ;;  %p15235_p12 = scmp.lt.s32.totalorder %s15229_s5, %s15229_s5 }
 0xb12   :  { %p15236_p13 = por %p15235_p12, %p15234_p11 }
 0xb14   :  { %13527 = vmatmul.mubr.f32.vlgmr.msra.gmra.mrb[50].mxu0 %v18657_v26  ;;  %p15237_p0 = pnand %p15236_p13, %p15230_p10 }
 0xb16   :  { %13992 = vmatmul.mubr.f32.vlgmr.msra.gmra.mrb[50].mxu1 %v18657_v26 }
 0xbe7   :  { %v13528_v39 = vpop.f32.mrb[50].mxu0 }
 0xbe8   :  { %v13530_v35 = vpop.f32.mrb[51].mxu0 }
 0xbe9   :  { %v13993_v61 = vpop.f32.mrb[50].mxu1  ;;  %v14003_v43 = vadd.f32 %v13530_v35, %v13528_v39 }
 0xbea   :  { %v13995_v14 = vpop.f32.mrb[51].mxu1 }
 0xbeb   :  { %v14004_v7 = vadd.f32 %v14003_v43, %v13993_v61 }
 0xbed   :  { %v14005_v50 = vadd.f32 %v14004_v7, %v13995_v14 }
 0xbef   :  { %14006 = vadd.xlane.f32.xlu0 %v14005_v50 }
 0xc7c   :  { %v14007_v49 = vpop.xlane.xlu0 %14006 }
 0xc7d   :  { %v14008_v58 = vadd.f32 %v14007_v49, %v14002_v33 }
 0xc7f   :  { %v14009_v62 = vmul.f32 0.0009765625, %v14008_v58 }
 0xc81   :  { %v14010_v41 = vsub.f32 %v18660_v36, %v14009_v62  ;;  %v14011_v28 = vsub.f32 %v18661_v45, %v14009_v62  ;;  %v14012_v63 = vsub.f32 %v18662_v17, %v14009_v62  ;;  %v14023_v52 = vsub.f32 %v13528_v39, %v14009_v62 }
 0xc82   :  { %v14024_v8 = vsub.f32 %v13530_v35, %v14009_v62  ;;  %v14025_v12 = vsub.f32 %v13993_v61, %v14009_v62  ;;  %v14013_v27 = vsub.f32 %v18663_v48, %v14009_v62  ;;  %v14026_v15 = vsub.f32 %v13995_v14, %v14009_v62 }
 0xc83   :  { %v14014_v57 = vmul.f32 %v14010_v41, %v14010_v41  ;;  %v14015_v47 = vmul.f32 %v14011_v28, %v14011_v28  ;;  %v14027_v23 = vmul.f32 %v14023_v52, %v14023_v52  ;;  %v14016_v51 = vmul.f32 %v14012_v63, %v14012_v63 }
 0xc84   :  { %v14028_v42 = vmul.f32 %v14024_v8, %v14024_v8  ;;  %v14029_v5 = vmul.f32 %v14025_v12, %v14025_v12  ;;  %v14017_v0 = vmul.f32 %v14013_v27, %v14013_v27  ;;  %v14030_v10 = vmul.f32 %v14026_v15, %v14026_v15 }
 0xc85   :  { %v14018_v54 = vadd.f32 %v14015_v47, %v14014_v57 }
 0xc86   :  { %v14031_v18 = vadd.f32 %v14028_v42, %v14027_v23 }
 0xc87   :  { %v14019_v1 = vadd.f32 %v14018_v54, %v14016_v51 }
 0xc88   :  { %v14032_v25 = vadd.f32 %v14031_v18, %v14029_v5 }
 0xc89   :  { %v14020_v2 = vadd.f32 %v14019_v1, %v14017_v0 }
 0xc8a   :  { %v14033_v13 = vadd.f32 %v14032_v25, %v14030_v10 }
 0xc8b   :  { %14021 = vadd.xlane.f32.xlu1 %v14020_v2 }
 0xc8f   :  { %14034 = vadd.xlane.f32.xlu1 %v14033_v13 }
 0xd18   :  { %v14022_v59 = vpop.xlane.xlu1 %14021 }
 0xd1c   :  { %v14035_v11 = vpop.xlane.xlu1 %14034 }
 0xd1d   :  { %v14036_v40 = vadd.f32 %v14035_v11, %v14022_v59 }
 0xd1f   :  { %v14037_v30 = vmul.f32 0.0009765625, %v14036_v40 }
 0xd21   :  { %v14041_v6 = vadd.f32 1e-05, %v14037_v30 }
 0xd23   :  { %15161 = vrsqrt.f32 %v14041_v6 }
 0xd2d   :  { %v15162_v46 = vpop.eup %15161 }
 0xd2e   :  { %v14043_v29 = vmul.f32 %v15162_v46, %v14038_v44 }
 0xd30   :  { %14048 = vperm.xlu1 %15015, %v14043_v29   ;;  %v14044_v56 = vmul.f32 %v14043_v29, %v14009_v62 }
 0xd32   :  { %v14045_v55 = vsub.f32 %v14101_v4, %v14044_v56 }
 0xd34   :  { %14057 = vperm.xlu1 %15015, %v14045_v55  }
 0xdaf   :  { %v14049_v19 = vpop.permute.xlu1 %14048 }
 0xdb0   :  { %v14051_v22 = vmul.f32 %v14049_v19, %v18660_v36  ;;  %v14052_v9 = vmul.f32 %v14049_v19, %v18661_v45  ;;  %v14053_v34 = vmul.f32 %v14049_v19, %v18662_v17  ;;  %v14054_v24 = vmul.f32 %v14049_v19, %v18663_v48 }
 0xdb1   :  { %v14068_v20 = vmul.f32 %v14049_v19, %v13528_v39  ;;  %v14069_v38 = vmul.f32 %v14049_v19, %v13530_v35  ;;  %v14070_v32 = vmul.f32 %v14049_v19, %v13993_v61  ;;  %v14071_v16 = vmul.f32 %v14049_v19, %v13995_v14 }
 0xdb3   :  { %v14058_v21 = vpop.permute.xlu1 %14057 }
 0xdb4   :  { %v14060_v53 = vadd.f32 %v14058_v21, %v14051_v22  ;;  %v14061_v37 = vadd.f32 %v14058_v21, %v14052_v9  ;;  %v14062_v26 = vadd.f32 %v14058_v21, %v14053_v34  ;;  %v14063_v3 = vadd.f32 %v14058_v21, %v14054_v24 }
 0xdb5   :  { %v14072_v60 = vadd.f32 %v14068_v20, %v14058_v21  ;;  %v14073_v43 = vadd.f32 %v14069_v38, %v14058_v21  ;;  %v14074_v7 = vadd.f32 %v14070_v32, %v14058_v21  ;;  %v14075_v50 = vadd.f32 %v14071_v16, %v14058_v21 }
 0xdb6   :  { %14064 = vst [vmem:[#allocation8] sm:$0xff] %v14060_v53  ;;  %14065 = vst [vmem:[#allocation8 + $0x8] sm:$0xff] %v14061_v37 }
 0xdb7   :  { %14066 = vst [vmem:[#allocation8 + $0x10] sm:$0xff] %v14062_v26  ;;  %14067 = vst [vmem:[#allocation8 + $0x18] sm:$0xff] %v14063_v3 }
 0xdb8   :  { %14077 = vst [vmem:[#allocation8 + $0x20] sm:$0xff] %v14072_v60  ;;  %14078 = vst [vmem:[#allocation8 + $0x28] sm:$0xff] %v14073_v43 }
 0xdb9   :  { %14079 = vst [vmem:[#allocation8 + $0x30] sm:$0xff] %v14074_v7  ;;  %14080 = vst [vmem:[#allocation8 + $0x38] sm:$0xff] %v14075_v50 }
 0xdba   :  { %15240 = shalt.err (!%p15237_p0)
}
 0xdbb   :  { %s15241_s25 = scalar_lea.hbm %s18120_s6, 1024 }
 0xdbc   :  { %p15242_p1 = scmp.ne.s32.totalorder %s18120_s6, %s15241_s25  ;;  %p15245_p2 = scmp.lt.u32.totalorder %s15241_s25, %s18120_s6 }
 0xdbe   :  { %p15247_p3 = pnand %p15245_p2, %p15242_p1 }
 0xdc0   :  { %15250 = shalt.err (!%p15247_p3)
}
 0xdc1   :  { %14092 = dma.vmem_to_hbm [thread:$0]  %s14087_s21, 1024, %s18120_s6, [#allocation4], %s15259_s9, %s15259_s9, %s15260_s10  }
 0xdc2   :  { %15255 = dma.done.wait [#allocation4], 1024  }
 0xdc3   :  { %15256 = vsyncadd [#allocation4], 4294966272 }
 0xdc4   :  { %14096 = vsyncpa [#allocation3], 1 }
 0xdc5   :  { %14097 = vsyncpa [#allocation6], 1 }
 0xdc6   :  { %14098 = vsyncpa [#allocation4], 1 }

</bundles_post_ra>
